<compile_context>
chip_gen: v5e
topology: v5e:2x2
jax: 0.10.0
libtpu: 0.0.40
codegen_flags: <defaults>
</compile_context>

<pallas_src>
import functools
import math

import jax
import jax.numpy as jnp
from jax.experimental import pallas as pl
from jax.experimental.pallas import tpu as pltpu


# ---------------------------------------------------------------------------
# Pallas kernel: full AttentionBlock forward for a block of Bt batch elements
# ---------------------------------------------------------------------------
def _attn_block_kernel(
    x_ref, ctx_ref, sbias_ref, cbias_ref,
    g1_ref, b1_ref, wq1_ref, wk1_ref, wv1_ref, wo1_ref,
    g2_ref, b2_ref, wq2_ref, wk2_ref, wv2_ref, wo2_ref,
    g3_ref, b3_ref, w12_ref, w3_ref,
    o_ref,
):
    f32, bf16 = jnp.float32, jnp.bfloat16
    H, _, D = wq1_ref.shape          # heads, emb_dim, head_dim
    hid = w3_ref.shape[0]            # SwiGLU hidden dim
    scale = 1.0 / math.sqrt(D)

    def _ln(v, g_ref, b_ref):
        # rowwise LayerNorm in f32
        mu = jnp.mean(v, axis=-1, keepdims=True)
        c = v - mu
        var = jnp.mean(c * c, axis=-1, keepdims=True)
        return c * jax.lax.rsqrt(var + 1e-5) * g_ref[...] + b_ref[...]

    # bf16 MXU matmuls with f32 accumulation
    NN = (((2,), (1,)), ((0,), (0,)))   # (H,M,K) @ (H,K,N)   -> (H,M,N)
    NT = (((2,), (2,)), ((0,), (0,)))   # (H,M,K) @ (H,N,K)^T -> (H,M,N)

    def _bdot(a, b, dims):
        return jax.lax.dot_general(a.astype(bf16), b.astype(bf16), dims,
                                   preferred_element_type=f32)

    def _dot2(a, b):
        return jnp.dot(a.astype(bf16), b.astype(bf16),
                       preferred_element_type=f32)

    def _mha(q_src, kv_src, wq_ref, wk_ref, wv_ref, wo_ref, bias):
        # q_src: (M, C) f32; kv_src: (Mk, Ck) f32; bias: (M, Mk) additive f32
        qb = jnp.broadcast_to(q_src.astype(bf16)[None], (H,) + q_src.shape)
        kb = jnp.broadcast_to(kv_src.astype(bf16)[None], (H,) + kv_src.shape)
        q = _bdot(qb, wq_ref[...], NN)                      # (H, M, D)
        k = _bdot(kb, wk_ref[...], NN)                      # (H, Mk, D)
        v = _bdot(kb, wv_ref[...], NN)                      # (H, Mk, D)
        s = _bdot(q, k, NT) * scale + bias[None]            # (H, M, Mk) f32
        s = s - jnp.max(s, axis=-1, keepdims=True)
        p = jnp.exp(s)
        p = p * pl.reciprocal(jnp.sum(p, axis=-1, keepdims=True), approx=True)
        o = _bdot(p, v, NN)                                  # (H, M, D)
        out_h = _bdot(o, wo_ref[...], NN)                    # (H, M, C)
        return jnp.sum(out_h, axis=0)                        # head-merge -> (M, C)

    x = x_ref[...].astype(f32)        # (M, C) residual stream, f32
    ctx = ctx_ref[...].astype(f32)    # (Mc, Cc)

    # ---- 1) x = x + Attention(LN1(x)) ----
    h1 = _ln(x, g1_ref, b1_ref)
    x = x + _mha(h1, h1, wq1_ref, wk1_ref, wv1_ref, wo1_ref, sbias_ref[...])

    # ---- 2) x = x + CrossAttention(LN2(x), context) ----
    h2 = _ln(x, g2_ref, b2_ref)
    x = x + _mha(h2, ctx, wq2_ref, wk2_ref, wv2_ref, wo2_ref, cbias_ref[...])

    # ---- 3) x = x + SwiGLU-MLP(LN3(x)) ----
    h3 = _ln(x, g3_ref, b3_ref)
    u = _dot2(h3, w12_ref[...])                               # (M, 2*hid), lane-dense
    a, g = u[:, :hid], u[:, hid:]
    sw = a * jax.nn.sigmoid(a) * g
    x = x + _dot2(sw, w3_ref[...])

    o_ref[...] = x.astype(o_ref.dtype)


# ---------------------------------------------------------------------------
# Wrapper
# ---------------------------------------------------------------------------
def _cost_estimate(B, L, Lc, C, Cc, hid, H):
    flops = 2 * B * (
        L * C * 3 * C            # self qkv projections
        + L * C * C              # self out projection
        + L * C * C              # cross q projection
        + Lc * Cc * 2 * C        # cross kv projections
        + L * C * C              # cross out projection
        + 2 * L * L * C          # self attention core
        + 2 * L * Lc * C         # cross attention core
        + L * C * 2 * hid        # mlp up (fused w1/w2)
        + L * hid * C)           # mlp down
    transcendentals = B * (H * L * L + H * L * Lc + L * hid)
    bytes_accessed = 4 * (2 * B * L * C + B * Lc * Cc) + 2 * (
        4 * C * C + Cc * 2 * C + C * C + C * 2 * hid + hid * C)
    return pl.CostEstimate(flops=int(flops), transcendentals=int(transcendentals),
                           bytes_accessed=int(bytes_accessed))


def attention_block_forward(x_nchw, context, params, *, num_heads, block_batch=None):
    B, C, Hh, Ww = x_nchw.shape
    L = Hh * Ww
    _, Lc, Cc = context.shape
    H = num_heads
    D = C // H
    hid = params["w1"].shape[1]

    # batch tile: pack enough batch elements per grid step to fill MXU rows
    if block_batch is None:
        bt = max(1, min(B, 256 // max(L, 1)))
        while B % bt:
            bt -= 1
    else:
        bt = block_batch
    assert B % bt == 0
    M, Mc = bt * L, bt * Lc

    # host-side layout glue: 'b c h w -> (b h w) c', context 'b l c -> (b l) c'
    x_2d = jnp.transpose(x_nchw, (0, 2, 3, 1)).reshape(B * L, C)
    ctx_2d = context.reshape(B * Lc, Cc)

    # block-diagonal additive biases: keep attention within each batch element
    rb = jnp.arange(M) // L
    cbv = jnp.arange(Mc) // Lc
    self_bias = jnp.where(rb[:, None] == rb[None, :], 0.0, -1e30).astype(jnp.float32)
    cross_bias = jnp.where(rb[:, None] == cbv[None, :], 0.0, -1e30).astype(jnp.float32)

    # host-side per-head weight layouts, pre-cast to bf16 for the MXU
    bf16 = jnp.bfloat16

    def heads_in(w):   # (Cin, H*D) -> (H, Cin, D)
        return jnp.transpose(w.reshape(w.shape[0], H, D), (1, 0, 2)).astype(bf16)

    def heads_out(w):  # (H*D, C) -> (H, D, C)
        return w.reshape(H, D, w.shape[1]).astype(bf16)

    w_qkv = params["w_qkv"]
    wq1 = heads_in(w_qkv[:, :C])
    wk1 = heads_in(w_qkv[:, C:2 * C])
    wv1 = heads_in(w_qkv[:, 2 * C:])
    wo1 = heads_out(params["w_attn_out"])
    wq2 = heads_in(params["w_q"])
    w_kv = params["w_kv"]
    wk2 = heads_in(w_kv[:, :C])
    wv2 = heads_in(w_kv[:, C:])
    wo2 = heads_out(params["w_cross_out"])
    w12 = jnp.concatenate([params["w1"], params["w2"]], axis=1).astype(bf16)
    w3 = params["w3"].astype(bf16)

    # NOTE: at large C, the constant-weight specs could be single-buffered
    # (pipeline_mode=pl.Buffered(1)) to save VMEM; left at default here.
    def full(shape):
        return pl.BlockSpec(shape, lambda i: (0,) * len(shape))

    out_2d = pl.pallas_call(
        _attn_block_kernel,
        out_shape=jax.ShapeDtypeStruct((B * L, C), jnp.float32),
        grid=(B // bt,),
        in_specs=[
            pl.BlockSpec((M, C), lambda i: (i, 0)),      # x rows (bt batch elems)
            pl.BlockSpec((Mc, Cc), lambda i: (i, 0)),    # context rows
            full((M, M)), full((M, Mc)),                 # attention biases
            full((1, C)), full((1, C)),                  # LN1
            full((H, C, D)), full((H, C, D)), full((H, C, D)), full((H, D, C)),
            full((1, C)), full((1, C)),                  # LN2
            full((H, C, D)), full((H, Cc, D)), full((H, Cc, D)), full((H, D, C)),
            full((1, C)), full((1, C)),                  # LN3
            full((C, 2 * hid)), full((hid, C)),          # MLP (fused w12, w3)
        ],
        out_specs=pl.BlockSpec((M, C), lambda i: (i, 0)),
        compiler_params=pltpu.CompilerParams(
            dimension_semantics=("parallel",),
            vmem_limit_bytes=64 * 1024 * 1024),
        cost_estimate=_cost_estimate(B, L, Lc, C, Cc, hid, H),
    )(
        x_2d, ctx_2d, self_bias, cross_bias,
        params["g1"], params["b1"], wq1, wk1, wv1, wo1,
        params["g2"], params["b2"], wq2, wk2, wv2, wo2,
        params["g3"], params["b3"], w12, w3,
    )

    # '(b h w) c -> b c h w'
    return jnp.transpose(out_2d.reshape(B, Hh, Ww, C), (0, 3, 1, 2))


# ---------------------------------------------------------------------------
# Pure-JAX reference (f32 math, for validation)
# ---------------------------------------------------------------------------
def attention_block_reference(x_nchw, context, p, *, num_heads):
    B, C, H, W = x_nchw.shape
    D = C // num_heads
    x = jnp.transpose(x_nchw, (0, 2, 3, 1)).reshape(B, H * W, C)

    def ln(x, g, b, eps=1e-5):
        mu = x.mean(-1, keepdims=True)
        var = ((x - mu) ** 2).mean(-1, keepdims=True)
        return (x - mu) * jax.lax.rsqrt(var + eps) * g + b

    def mha(q, k, v):
        Bq, Lq, _ = q.shape
        Lk = k.shape[1]
        qh = q.reshape(Bq, Lq, num_heads, D)
        kh = k.reshape(Bq, Lk, num_heads, D)
        vh = v.reshape(Bq, Lk, num_heads, D)
        s = jnp.einsum("bqhd,bkhd->bhqk", qh, kh) / math.sqrt(D)
        pattn = jax.nn.softmax(s, axis=-1)
        o = jnp.einsum("bhqk,bkhd->bqhd", pattn, vh)
        return o.reshape(Bq, Lq, C)

    h1 = ln(x, p["g1"][0], p["b1"][0])
    qkv = h1 @ p["w_qkv"]
    x = x + mha(qkv[..., :C], qkv[..., C:2 * C], qkv[..., 2 * C:]) @ p["w_attn_out"]

    h2 = ln(x, p["g2"][0], p["b2"][0])
    kv = context @ p["w_kv"]
    x = x + mha(h2 @ p["w_q"], kv[..., :C], kv[..., C:]) @ p["w_cross_out"]

    h3 = ln(x, p["g3"][0], p["b3"][0])
    a = h3 @ p["w1"]
    swiglu = (a * jax.nn.sigmoid(a)) * (h3 @ p["w2"])
    x = x + swiglu @ p["w3"]

    return jnp.transpose(x.reshape(B, H, W, C), (0, 3, 1, 2))


# ---------------------------------------------------------------------------
# Main
# ---------------------------------------------------------------------------
if __name__ == "__main__":
    B, C, H, W = 2, 128, 4, 4          # emb_dim = 128, seq = 16
    heads = 8
    cross_dim, Lc = 64, 8
    mlp_hid_dim = 96
    hid = int(2 / 3 * mlp_hid_dim)     # = 64, matches MLP.__init__

    key = jax.random.PRNGKey(0)
    ks = jax.random.split(key, 12)

    def w(k, shape, scale=0.02):
        return jax.random.normal(k, shape, jnp.float32) * scale

    # All Linear weights stored pre-transposed as (in, out) for y = x @ W.
    params = {
        "g1": jnp.ones((1, C), jnp.float32), "b1": jnp.zeros((1, C), jnp.float32),
        "w_qkv": w(ks[0], (C, 3 * C)),
        "w_attn_out": w(ks[1], (C, C)),
        "g2": jnp.ones((1, C), jnp.float32), "b2": jnp.zeros((1, C), jnp.float32),
        "w_q": w(ks[2], (C, C)),
        "w_kv": w(ks[3], (cross_dim, 2 * C)),
        "w_cross_out": w(ks[4], (C, C)),
        "g3": jnp.ones((1, C), jnp.float32), "b3": jnp.zeros((1, C), jnp.float32),
        "w1": w(ks[5], (C, hid)),
        "w2": w(ks[6], (C, hid)),
        "w3": w(ks[7], (hid, C)),
    }

    x = jax.random.normal(ks[8], (B, C, H, W), jnp.float32)
    context = jax.random.normal(ks[9], (B, Lc, cross_dim), jnp.float32)

    out = attention_block_forward(x, context, params, num_heads=heads)
    out = jax.block_until_ready(out)

    ref = attention_block_reference(x, context, params, num_heads=heads)
    ref = jax.block_until_ready(ref)

    assert out.shape == (B, C, H, W), out.shape
    assert bool(jnp.all(jnp.isfinite(out)))
    assert bool(jnp.allclose(out, ref, rtol=2e-2, atol=2e-2)), (
        float(jnp.max(jnp.abs(out - ref))))

    print("KERNEL_OK")
</pallas_src>

<mosaic_0001>
module attributes {stable_mosaic.version = 11 : i64} {
  func.func @_attn_block_kernel(%arg0: i32, %arg1: memref<32x128xf32, #tpu.memory_space<vmem>>, %arg2: memref<16x64xf32, #tpu.memory_space<vmem>>, %arg3: memref<32x32xf32, #tpu.memory_space<vmem>>, %arg4: memref<32x16xf32, #tpu.memory_space<vmem>>, %arg5: memref<1x128xf32, #tpu.memory_space<vmem>>, %arg6: memref<1x128xf32, #tpu.memory_space<vmem>>, %arg7: memref<8x128x16xbf16, #tpu.memory_space<vmem>>, %arg8: memref<8x128x16xbf16, #tpu.memory_space<vmem>>, %arg9: memref<8x128x16xbf16, #tpu.memory_space<vmem>>, %arg10: memref<8x16x128xbf16, #tpu.memory_space<vmem>>, %arg11: memref<1x128xf32, #tpu.memory_space<vmem>>, %arg12: memref<1x128xf32, #tpu.memory_space<vmem>>, %arg13: memref<8x128x16xbf16, #tpu.memory_space<vmem>>, %arg14: memref<8x64x16xbf16, #tpu.memory_space<vmem>>, %arg15: memref<8x64x16xbf16, #tpu.memory_space<vmem>>, %arg16: memref<8x16x128xbf16, #tpu.memory_space<vmem>>, %arg17: memref<1x128xf32, #tpu.memory_space<vmem>>, %arg18: memref<1x128xf32, #tpu.memory_space<vmem>>, %arg19: memref<128x128xbf16, #tpu.memory_space<vmem>>, %arg20: memref<64x128xbf16, #tpu.memory_space<vmem>>, %arg21: memref<32x128xf32, #tpu.memory_space<vmem>>) attributes {dimension_semantics = [#tpu.dimension_semantics<parallel>], iteration_bounds = array<i64: 1>, scalar_prefetch = 0 : i64, scratch_operands = 0 : i64, tpu.core_type = #tpu.core_type<tc>, window_params = [{transform_indices = @transform_0, window_bounds = array<i64: 32, 128>}, {transform_indices = @transform_1, window_bounds = array<i64: 16, 64>}, {pipeline_mode = #tpu.pipeline_mode<synchronous>, transform_indices = @transform_2, window_bounds = array<i64: 32, 32>}, {pipeline_mode = #tpu.pipeline_mode<synchronous>, transform_indices = @transform_3, window_bounds = array<i64: 32, 16>}, {pipeline_mode = #tpu.pipeline_mode<synchronous>, transform_indices = @transform_4, window_bounds = array<i64: 1, 128>}, {pipeline_mode = #tpu.pipeline_mode<synchronous>, transform_indices = @transform_5, window_bounds = array<i64: 1, 128>}, {pipeline_mode = #tpu.pipeline_mode<synchronous>, transform_indices = @transform_6, window_bounds = array<i64: 8, 128, 16>}, {pipeline_mode = #tpu.pipeline_mode<synchronous>, transform_indices = @transform_7, window_bounds = array<i64: 8, 128, 16>}, {pipeline_mode = #tpu.pipeline_mode<synchronous>, transform_indices = @transform_8, window_bounds = array<i64: 8, 128, 16>}, {pipeline_mode = #tpu.pipeline_mode<synchronous>, transform_indices = @transform_9, window_bounds = array<i64: 8, 16, 128>}, {pipeline_mode = #tpu.pipeline_mode<synchronous>, transform_indices = @transform_10, window_bounds = array<i64: 1, 128>}, {pipeline_mode = #tpu.pipeline_mode<synchronous>, transform_indices = @transform_11, window_bounds = array<i64: 1, 128>}, {pipeline_mode = #tpu.pipeline_mode<synchronous>, transform_indices = @transform_12, window_bounds = array<i64: 8, 128, 16>}, {pipeline_mode = #tpu.pipeline_mode<synchronous>, transform_indices = @transform_13, window_bounds = array<i64: 8, 64, 16>}, {pipeline_mode = #tpu.pipeline_mode<synchronous>, transform_indices = @transform_14, window_bounds = array<i64: 8, 64, 16>}, {pipeline_mode = #tpu.pipeline_mode<synchronous>, transform_indices = @transform_15, window_bounds = array<i64: 8, 16, 128>}, {pipeline_mode = #tpu.pipeline_mode<synchronous>, transform_indices = @transform_16, window_bounds = array<i64: 1, 128>}, {pipeline_mode = #tpu.pipeline_mode<synchronous>, transform_indices = @transform_17, window_bounds = array<i64: 1, 128>}, {pipeline_mode = #tpu.pipeline_mode<synchronous>, transform_indices = @transform_18, window_bounds = array<i64: 128, 128>}, {pipeline_mode = #tpu.pipeline_mode<synchronous>, transform_indices = @transform_19, window_bounds = array<i64: 64, 128>}, {transform_indices = @transform_20, window_bounds = array<i64: 32, 128>}]} {
    %c0 = arith.constant 0 : index
    %c0_0 = arith.constant 0 : index
    %0 = vector.load %arg1[%c0, %c0_0] : memref<32x128xf32, #tpu.memory_space<vmem>>, vector<32x128xf32>
    %c0_1 = arith.constant 0 : index
    %c0_2 = arith.constant 0 : index
    %1 = vector.load %arg2[%c0_1, %c0_2] : memref<16x64xf32, #tpu.memory_space<vmem>>, vector<16x64xf32>
    %cst = arith.constant dense<0.000000e+00> : vector<32xf32>
    %2 = vector.multi_reduction <add>, %0, %cst [1] : vector<32x128xf32> to vector<32xf32>
    %3 = vector.shape_cast %2 : vector<32xf32> to vector<32x1xf32>
    %cst_3 = arith.constant 1.280000e+02 : f32
    %4 = vector.broadcast %cst_3 : f32 to vector<32x1xf32>
    %5 = arith.divf %3, %4 : vector<32x1xf32>
    %6 = vector.broadcast %5 : vector<32x1xf32> to vector<32x128xf32>
    %7 = arith.subf %0, %6 : vector<32x128xf32>
    %8 = arith.mulf %7, %7 : vector<32x128xf32>
    %cst_4 = arith.constant dense<0.000000e+00> : vector<32xf32>
    %9 = vector.multi_reduction <add>, %8, %cst_4 [1] : vector<32x128xf32> to vector<32xf32>
    %10 = vector.shape_cast %9 : vector<32xf32> to vector<32x1xf32>
    %cst_5 = arith.constant 1.280000e+02 : f32
    %11 = vector.broadcast %cst_5 : f32 to vector<32x1xf32>
    %12 = arith.divf %10, %11 : vector<32x1xf32>
    %cst_6 = arith.constant 9.99999974E-6 : f32
    %13 = vector.broadcast %cst_6 : f32 to vector<32x1xf32>
    %14 = arith.addf %12, %13 : vector<32x1xf32>
    %15 = math.rsqrt %14 : vector<32x1xf32>
    %16 = vector.broadcast %15 : vector<32x1xf32> to vector<32x128xf32>
    %17 = arith.mulf %7, %16 : vector<32x128xf32>
    %c0_7 = arith.constant 0 : index
    %c0_8 = arith.constant 0 : index
    %18 = vector.load %arg5[%c0_7, %c0_8] : memref<1x128xf32, #tpu.memory_space<vmem>>, vector<1x128xf32>
    %19 = vector.broadcast %18 : vector<1x128xf32> to vector<32x128xf32>
    %20 = arith.mulf %17, %19 : vector<32x128xf32>
    %c0_9 = arith.constant 0 : index
    %c0_10 = arith.constant 0 : index
    %21 = vector.load %arg6[%c0_9, %c0_10] : memref<1x128xf32, #tpu.memory_space<vmem>>, vector<1x128xf32>
    %22 = vector.broadcast %21 : vector<1x128xf32> to vector<32x128xf32>
    %23 = arith.addf %20, %22 : vector<32x128xf32>
    %c0_11 = arith.constant 0 : index
    %c0_12 = arith.constant 0 : index
    %24 = vector.load %arg3[%c0_11, %c0_12] : memref<32x32xf32, #tpu.memory_space<vmem>>, vector<32x32xf32>
    %25 = arith.truncf %23 : vector<32x128xf32> to vector<32x128xbf16>
    %26 = vector.shape_cast %25 : vector<32x128xbf16> to vector<1x32x128xbf16>
    %27 = vector.shape_cast %26 : vector<1x32x128xbf16> to vector<1x32x128xbf16>
    %28 = vector.broadcast %27 : vector<1x32x128xbf16> to vector<8x32x128xbf16>
    %29 = arith.truncf %23 : vector<32x128xf32> to vector<32x128xbf16>
    %30 = vector.shape_cast %29 : vector<32x128xbf16> to vector<1x32x128xbf16>
    %31 = vector.shape_cast %30 : vector<1x32x128xbf16> to vector<1x32x128xbf16>
    %32 = vector.broadcast %31 : vector<1x32x128xbf16> to vector<8x32x128xbf16>
    %c0_13 = arith.constant 0 : index
    %c0_14 = arith.constant 0 : index
    %c0_15 = arith.constant 0 : index
    %33 = vector.load %arg7[%c0_13, %c0_14, %c0_15] : memref<8x128x16xbf16, #tpu.memory_space<vmem>>, vector<8x128x16xbf16>
    %cst_16 = arith.constant dense<0.000000e+00> : vector<8x32x16xf32>
    %34 = tpu.matmul %28, %33, %cst_16 {dimension_numbers = #tpu.dot_dimension_numbers<[2], [1], [1], [2], [0, 0, 0, 1, 1, 2], [0], [0]>} : vector<8x32x128xbf16>, vector<8x128x16xbf16>, vector<8x32x16xf32> -> vector<8x32x16xf32>
    %c0_17 = arith.constant 0 : index
    %c0_18 = arith.constant 0 : index
    %c0_19 = arith.constant 0 : index
    %35 = vector.load %arg8[%c0_17, %c0_18, %c0_19] : memref<8x128x16xbf16, #tpu.memory_space<vmem>>, vector<8x128x16xbf16>
    %cst_20 = arith.constant dense<0.000000e+00> : vector<8x32x16xf32>
    %36 = tpu.matmul %32, %35, %cst_20 {dimension_numbers = #tpu.dot_dimension_numbers<[2], [1], [1], [2], [0, 0, 0, 1, 1, 2], [0], [0]>} : vector<8x32x128xbf16>, vector<8x128x16xbf16>, vector<8x32x16xf32> -> vector<8x32x16xf32>
    %c0_21 = arith.constant 0 : index
    %c0_22 = arith.constant 0 : index
    %c0_23 = arith.constant 0 : index
    %37 = vector.load %arg9[%c0_21, %c0_22, %c0_23] : memref<8x128x16xbf16, #tpu.memory_space<vmem>>, vector<8x128x16xbf16>
    %cst_24 = arith.constant dense<0.000000e+00> : vector<8x32x16xf32>
    %38 = tpu.matmul %32, %37, %cst_24 {dimension_numbers = #tpu.dot_dimension_numbers<[2], [1], [1], [2], [0, 0, 0, 1, 1, 2], [0], [0]>} : vector<8x32x128xbf16>, vector<8x128x16xbf16>, vector<8x32x16xf32> -> vector<8x32x16xf32>
    %39 = arith.truncf %34 : vector<8x32x16xf32> to vector<8x32x16xbf16>
    %40 = arith.truncf %36 : vector<8x32x16xf32> to vector<8x32x16xbf16>
    %cst_25 = arith.constant dense<0.000000e+00> : vector<8x32x32xf32>
    %41 = tpu.matmul %39, %40, %cst_25 {dimension_numbers = #tpu.dot_dimension_numbers<[2], [2], [1], [1], [0, 0, 0, 1, 1, 1], [0], [0]>} : vector<8x32x16xbf16>, vector<8x32x16xbf16>, vector<8x32x32xf32> -> vector<8x32x32xf32>
    %cst_26 = arith.constant 2.500000e-01 : f32
    %42 = vector.broadcast %cst_26 : f32 to vector<8x32x32xf32>
    %43 = arith.mulf %41, %42 : vector<8x32x32xf32>
    %44 = vector.shape_cast %24 : vector<32x32xf32> to vector<1x32x32xf32>
    %45 = vector.broadcast %44 : vector<1x32x32xf32> to vector<8x32x32xf32>
    %46 = arith.addf %43, %45 : vector<8x32x32xf32>
    %cst_27 = arith.constant dense<0xFF800000> : vector<8x32xf32>
    %47 = vector.multi_reduction <maximumf>, %46, %cst_27 [2] : vector<8x32x32xf32> to vector<8x32xf32>
    %48 = vector.shape_cast %47 : vector<8x32xf32> to vector<8x32x1xf32>
    %49 = vector.broadcast %48 : vector<8x32x1xf32> to vector<8x32x32xf32>
    %50 = arith.subf %46, %49 : vector<8x32x32xf32>
    %51 = math.exp %50 : vector<8x32x32xf32>
    %cst_28 = arith.constant dense<0.000000e+00> : vector<8x32xf32>
    %52 = vector.multi_reduction <add>, %51, %cst_28 [2] : vector<8x32x32xf32> to vector<8x32xf32>
    %53 = vector.shape_cast %52 : vector<8x32xf32> to vector<8x32x1xf32>
    %54 = tpu.reciprocal %53 {approx = true} : vector<8x32x1xf32> -> vector<8x32x1xf32>
    %55 = vector.broadcast %54 : vector<8x32x1xf32> to vector<8x32x32xf32>
    %56 = arith.mulf %51, %55 : vector<8x32x32xf32>
    %57 = arith.truncf %56 : vector<8x32x32xf32> to vector<8x32x32xbf16>
    %58 = arith.truncf %38 : vector<8x32x16xf32> to vector<8x32x16xbf16>
    %cst_29 = arith.constant dense<0.000000e+00> : vector<8x32x16xf32>
    %59 = tpu.matmul %57, %58, %cst_29 {dimension_numbers = #tpu.dot_dimension_numbers<[2], [1], [1], [2], [0, 0, 0, 1, 1, 2], [0], [0]>} : vector<8x32x32xbf16>, vector<8x32x16xbf16>, vector<8x32x16xf32> -> vector<8x32x16xf32>
    %c0_30 = arith.constant 0 : index
    %c0_31 = arith.constant 0 : index
    %c0_32 = arith.constant 0 : index
    %60 = vector.load %arg10[%c0_30, %c0_31, %c0_32] : memref<8x16x128xbf16, #tpu.memory_space<vmem>>, vector<8x16x128xbf16>
    %61 = arith.truncf %59 : vector<8x32x16xf32> to vector<8x32x16xbf16>
    %cst_33 = arith.constant dense<0.000000e+00> : vector<8x32x128xf32>
    %62 = tpu.matmul %61, %60, %cst_33 {dimension_numbers = #tpu.dot_dimension_numbers<[2], [1], [1], [2], [0, 0, 0, 1, 1, 2], [0], [0]>} : vector<8x32x16xbf16>, vector<8x16x128xbf16>, vector<8x32x128xf32> -> vector<8x32x128xf32>
    %cst_34 = arith.constant dense<0.000000e+00> : vector<32x128xf32>
    %63 = vector.multi_reduction <add>, %62, %cst_34 [0] : vector<8x32x128xf32> to vector<32x128xf32>
    %64 = arith.addf %0, %63 : vector<32x128xf32>
    %cst_35 = arith.constant dense<0.000000e+00> : vector<32xf32>
    %65 = vector.multi_reduction <add>, %64, %cst_35 [1] : vector<32x128xf32> to vector<32xf32>
    %66 = vector.shape_cast %65 : vector<32xf32> to vector<32x1xf32>
    %cst_36 = arith.constant 1.280000e+02 : f32
    %67 = vector.broadcast %cst_36 : f32 to vector<32x1xf32>
    %68 = arith.divf %66, %67 : vector<32x1xf32>
    %69 = vector.broadcast %68 : vector<32x1xf32> to vector<32x128xf32>
    %70 = arith.subf %64, %69 : vector<32x128xf32>
    %71 = arith.mulf %70, %70 : vector<32x128xf32>
    %cst_37 = arith.constant dense<0.000000e+00> : vector<32xf32>
    %72 = vector.multi_reduction <add>, %71, %cst_37 [1] : vector<32x128xf32> to vector<32xf32>
    %73 = vector.shape_cast %72 : vector<32xf32> to vector<32x1xf32>
    %cst_38 = arith.constant 1.280000e+02 : f32
    %74 = vector.broadcast %cst_38 : f32 to vector<32x1xf32>
    %75 = arith.divf %73, %74 : vector<32x1xf32>
    %cst_39 = arith.constant 9.99999974E-6 : f32
    %76 = vector.broadcast %cst_39 : f32 to vector<32x1xf32>
    %77 = arith.addf %75, %76 : vector<32x1xf32>
    %78 = math.rsqrt %77 : vector<32x1xf32>
    %79 = vector.broadcast %78 : vector<32x1xf32> to vector<32x128xf32>
    %80 = arith.mulf %70, %79 : vector<32x128xf32>
    %c0_40 = arith.constant 0 : index
    %c0_41 = arith.constant 0 : index
    %81 = vector.load %arg11[%c0_40, %c0_41] : memref<1x128xf32, #tpu.memory_space<vmem>>, vector<1x128xf32>
    %82 = vector.broadcast %81 : vector<1x128xf32> to vector<32x128xf32>
    %83 = arith.mulf %80, %82 : vector<32x128xf32>
    %c0_42 = arith.constant 0 : index
    %c0_43 = arith.constant 0 : index
    %84 = vector.load %arg12[%c0_42, %c0_43] : memref<1x128xf32, #tpu.memory_space<vmem>>, vector<1x128xf32>
    %85 = vector.broadcast %84 : vector<1x128xf32> to vector<32x128xf32>
    %86 = arith.addf %83, %85 : vector<32x128xf32>
    %c0_44 = arith.constant 0 : index
    %c0_45 = arith.constant 0 : index
    %87 = vector.load %arg4[%c0_44, %c0_45] : memref<32x16xf32, #tpu.memory_space<vmem>>, vector<32x16xf32>
    %88 = arith.truncf %86 : vector<32x128xf32> to vector<32x128xbf16>
    %89 = vector.shape_cast %88 : vector<32x128xbf16> to vector<1x32x128xbf16>
    %90 = vector.shape_cast %89 : vector<1x32x128xbf16> to vector<1x32x128xbf16>
    %91 = vector.broadcast %90 : vector<1x32x128xbf16> to vector<8x32x128xbf16>
    %92 = arith.truncf %1 : vector<16x64xf32> to vector<16x64xbf16>
    %93 = vector.shape_cast %92 : vector<16x64xbf16> to vector<1x16x64xbf16>
    %94 = vector.shape_cast %93 : vector<1x16x64xbf16> to vector<1x16x64xbf16>
    %95 = vector.broadcast %94 : vector<1x16x64xbf16> to vector<8x16x64xbf16>
    %c0_46 = arith.constant 0 : index
    %c0_47 = arith.constant 0 : index
    %c0_48 = arith.constant 0 : index
    %96 = vector.load %arg13[%c0_46, %c0_47, %c0_48] : memref<8x128x16xbf16, #tpu.memory_space<vmem>>, vector<8x128x16xbf16>
    %cst_49 = arith.constant dense<0.000000e+00> : vector<8x32x16xf32>
    %97 = tpu.matmul %91, %96, %cst_49 {dimension_numbers = #tpu.dot_dimension_numbers<[2], [1], [1], [2], [0, 0, 0, 1, 1, 2], [0], [0]>} : vector<8x32x128xbf16>, vector<8x128x16xbf16>, vector<8x32x16xf32> -> vector<8x32x16xf32>
    %c0_50 = arith.constant 0 : index
    %c0_51 = arith.constant 0 : index
    %c0_52 = arith.constant 0 : index
    %98 = vector.load %arg14[%c0_50, %c0_51, %c0_52] : memref<8x64x16xbf16, #tpu.memory_space<vmem>>, vector<8x64x16xbf16>
    %cst_53 = arith.constant dense<0.000000e+00> : vector<8x16x16xf32>
    %99 = tpu.matmul %95, %98, %cst_53 {dimension_numbers = #tpu.dot_dimension_numbers<[2], [1], [1], [2], [0, 0, 0, 1, 1, 2], [0], [0]>} : vector<8x16x64xbf16>, vector<8x64x16xbf16>, vector<8x16x16xf32> -> vector<8x16x16xf32>
    %c0_54 = arith.constant 0 : index
    %c0_55 = arith.constant 0 : index
    %c0_56 = arith.constant 0 : index
    %100 = vector.load %arg15[%c0_54, %c0_55, %c0_56] : memref<8x64x16xbf16, #tpu.memory_space<vmem>>, vector<8x64x16xbf16>
    %cst_57 = arith.constant dense<0.000000e+00> : vector<8x16x16xf32>
    %101 = tpu.matmul %95, %100, %cst_57 {dimension_numbers = #tpu.dot_dimension_numbers<[2], [1], [1], [2], [0, 0, 0, 1, 1, 2], [0], [0]>} : vector<8x16x64xbf16>, vector<8x64x16xbf16>, vector<8x16x16xf32> -> vector<8x16x16xf32>
    %102 = arith.truncf %97 : vector<8x32x16xf32> to vector<8x32x16xbf16>
    %103 = arith.truncf %99 : vector<8x16x16xf32> to vector<8x16x16xbf16>
    %cst_58 = arith.constant dense<0.000000e+00> : vector<8x32x16xf32>
    %104 = tpu.matmul %102, %103, %cst_58 {dimension_numbers = #tpu.dot_dimension_numbers<[2], [2], [1], [1], [0, 0, 0, 1, 1, 1], [0], [0]>} : vector<8x32x16xbf16>, vector<8x16x16xbf16>, vector<8x32x16xf32> -> vector<8x32x16xf32>
    %cst_59 = arith.constant 2.500000e-01 : f32
    %105 = vector.broadcast %cst_59 : f32 to vector<8x32x16xf32>
    %106 = arith.mulf %104, %105 : vector<8x32x16xf32>
    %107 = vector.shape_cast %87 : vector<32x16xf32> to vector<1x32x16xf32>
    %108 = vector.broadcast %107 : vector<1x32x16xf32> to vector<8x32x16xf32>
    %109 = arith.addf %106, %108 : vector<8x32x16xf32>
    %cst_60 = arith.constant dense<0xFF800000> : vector<8x32xf32>
    %110 = vector.multi_reduction <maximumf>, %109, %cst_60 [2] : vector<8x32x16xf32> to vector<8x32xf32>
    %111 = vector.shape_cast %110 : vector<8x32xf32> to vector<8x32x1xf32>
    %112 = vector.broadcast %111 : vector<8x32x1xf32> to vector<8x32x16xf32>
    %113 = arith.subf %109, %112 : vector<8x32x16xf32>
    %114 = math.exp %113 : vector<8x32x16xf32>
    %cst_61 = arith.constant dense<0.000000e+00> : vector<8x32xf32>
    %115 = vector.multi_reduction <add>, %114, %cst_61 [2] : vector<8x32x16xf32> to vector<8x32xf32>
    %116 = vector.shape_cast %115 : vector<8x32xf32> to vector<8x32x1xf32>
    %117 = tpu.reciprocal %116 {approx = true} : vector<8x32x1xf32> -> vector<8x32x1xf32>
    %118 = vector.broadcast %117 : vector<8x32x1xf32> to vector<8x32x16xf32>
    %119 = arith.mulf %114, %118 : vector<8x32x16xf32>
    %120 = arith.truncf %119 : vector<8x32x16xf32> to vector<8x32x16xbf16>
    %121 = arith.truncf %101 : vector<8x16x16xf32> to vector<8x16x16xbf16>
    %cst_62 = arith.constant dense<0.000000e+00> : vector<8x32x16xf32>
    %122 = tpu.matmul %120, %121, %cst_62 {dimension_numbers = #tpu.dot_dimension_numbers<[2], [1], [1], [2], [0, 0, 0, 1, 1, 2], [0], [0]>} : vector<8x32x16xbf16>, vector<8x16x16xbf16>, vector<8x32x16xf32> -> vector<8x32x16xf32>
    %c0_63 = arith.constant 0 : index
    %c0_64 = arith.constant 0 : index
    %c0_65 = arith.constant 0 : index
    %123 = vector.load %arg16[%c0_63, %c0_64, %c0_65] : memref<8x16x128xbf16, #tpu.memory_space<vmem>>, vector<8x16x128xbf16>
    %124 = arith.truncf %122 : vector<8x32x16xf32> to vector<8x32x16xbf16>
    %cst_66 = arith.constant dense<0.000000e+00> : vector<8x32x128xf32>
    %125 = tpu.matmul %124, %123, %cst_66 {dimension_numbers = #tpu.dot_dimension_numbers<[2], [1], [1], [2], [0, 0, 0, 1, 1, 2], [0], [0]>} : vector<8x32x16xbf16>, vector<8x16x128xbf16>, vector<8x32x128xf32> -> vector<8x32x128xf32>
    %cst_67 = arith.constant dense<0.000000e+00> : vector<32x128xf32>
    %126 = vector.multi_reduction <add>, %125, %cst_67 [0] : vector<8x32x128xf32> to vector<32x128xf32>
    %127 = arith.addf %64, %126 : vector<32x128xf32>
    %cst_68 = arith.constant dense<0.000000e+00> : vector<32xf32>
    %128 = vector.multi_reduction <add>, %127, %cst_68 [1] : vector<32x128xf32> to vector<32xf32>
    %129 = vector.shape_cast %128 : vector<32xf32> to vector<32x1xf32>
    %cst_69 = arith.constant 1.280000e+02 : f32
    %130 = vector.broadcast %cst_69 : f32 to vector<32x1xf32>
    %131 = arith.divf %129, %130 : vector<32x1xf32>
    %132 = vector.broadcast %131 : vector<32x1xf32> to vector<32x128xf32>
    %133 = arith.subf %127, %132 : vector<32x128xf32>
    %134 = arith.mulf %133, %133 : vector<32x128xf32>
    %cst_70 = arith.constant dense<0.000000e+00> : vector<32xf32>
    %135 = vector.multi_reduction <add>, %134, %cst_70 [1] : vector<32x128xf32> to vector<32xf32>
    %136 = vector.shape_cast %135 : vector<32xf32> to vector<32x1xf32>
    %cst_71 = arith.constant 1.280000e+02 : f32
    %137 = vector.broadcast %cst_71 : f32 to vector<32x1xf32>
    %138 = arith.divf %136, %137 : vector<32x1xf32>
    %cst_72 = arith.constant 9.99999974E-6 : f32
    %139 = vector.broadcast %cst_72 : f32 to vector<32x1xf32>
    %140 = arith.addf %138, %139 : vector<32x1xf32>
    %141 = math.rsqrt %140 : vector<32x1xf32>
    %142 = vector.broadcast %141 : vector<32x1xf32> to vector<32x128xf32>
    %143 = arith.mulf %133, %142 : vector<32x128xf32>
    %c0_73 = arith.constant 0 : index
    %c0_74 = arith.constant 0 : index
    %144 = vector.load %arg17[%c0_73, %c0_74] : memref<1x128xf32, #tpu.memory_space<vmem>>, vector<1x128xf32>
    %145 = vector.broadcast %144 : vector<1x128xf32> to vector<32x128xf32>
    %146 = arith.mulf %143, %145 : vector<32x128xf32>
    %c0_75 = arith.constant 0 : index
    %c0_76 = arith.constant 0 : index
    %147 = vector.load %arg18[%c0_75, %c0_76] : memref<1x128xf32, #tpu.memory_space<vmem>>, vector<1x128xf32>
    %148 = vector.broadcast %147 : vector<1x128xf32> to vector<32x128xf32>
    %149 = arith.addf %146, %148 : vector<32x128xf32>
    %c0_77 = arith.constant 0 : index
    %c0_78 = arith.constant 0 : index
    %150 = vector.load %arg19[%c0_77, %c0_78] : memref<128x128xbf16, #tpu.memory_space<vmem>>, vector<128x128xbf16>
    %151 = arith.truncf %149 : vector<32x128xf32> to vector<32x128xbf16>
    %cst_79 = arith.constant dense<0.000000e+00> : vector<32x128xf32>
    %152 = tpu.matmul %151, %150, %cst_79 {dimension_numbers = #tpu.dot_dimension_numbers<[1], [0], [0], [1], [0, 0, 1, 1], [], []>} : vector<32x128xbf16>, vector<128x128xbf16>, vector<32x128xf32> -> vector<32x128xf32>
    %153 = vector.extract_strided_slice %152 {offsets = [0, 0], sizes = [32, 64], strides = [1, 1]} : vector<32x128xf32> to vector<32x64xf32>
    %154 = vector.extract_strided_slice %152 {offsets = [0, 64], sizes = [32, 64], strides = [1, 1]} : vector<32x128xf32> to vector<32x64xf32>
    %155 = arith.negf %153 : vector<32x64xf32>
    %156 = math.exp %155 : vector<32x64xf32>
    %cst_80 = arith.constant 1.000000e+00 : f32
    %157 = vector.broadcast %cst_80 : f32 to vector<32x64xf32>
    %158 = arith.addf %157, %156 : vector<32x64xf32>
    %159 = arith.divf %157, %158 : vector<32x64xf32>
    %160 = arith.mulf %153, %159 : vector<32x64xf32>
    %161 = arith.mulf %160, %154 : vector<32x64xf32>
    %c0_81 = arith.constant 0 : index
    %c0_82 = arith.constant 0 : index
    %162 = vector.load %arg20[%c0_81, %c0_82] : memref<64x128xbf16, #tpu.memory_space<vmem>>, vector<64x128xbf16>
    %163 = arith.truncf %161 : vector<32x64xf32> to vector<32x64xbf16>
    %cst_83 = arith.constant dense<0.000000e+00> : vector<32x128xf32>
    %164 = tpu.matmul %163, %162, %cst_83 {dimension_numbers = #tpu.dot_dimension_numbers<[1], [0], [0], [1], [0, 0, 1, 1], [], []>} : vector<32x64xbf16>, vector<64x128xbf16>, vector<32x128xf32> -> vector<32x128xf32>
    %165 = arith.addf %127, %164 : vector<32x128xf32>
    %c0_84 = arith.constant 0 : index
    %c0_85 = arith.constant 0 : index
    %166 = vector.load %arg21[%c0_84, %c0_85] : memref<32x128xf32, #tpu.memory_space<vmem>>, vector<32x128xf32>
    tpu.vector_store %arg21[%c0_84, %c0_85], %165 {strides = array<i32>} : memref<32x128xf32, #tpu.memory_space<vmem>>, vector<32x128xf32>,
    return
  }
  func.func @transform_0(%arg0: i32) -> (i32, i32) {
    %c0_i32 = arith.constant 0 : i32
    %c0_i32_0 = arith.constant 0 : i32
    return %arg0, %c0_i32 : i32, i32
  }
  func.func @transform_1(%arg0: i32) -> (i32, i32) {
    %c0_i32 = arith.constant 0 : i32
    %c0_i32_0 = arith.constant 0 : i32
    return %arg0, %c0_i32 : i32, i32
  }
  func.func @transform_2(%arg0: i32) -> (i32, i32) {
    %c0_i32 = arith.constant 0 : i32
    %c0_i32_0 = arith.constant 0 : i32
    %c0_i32_1 = arith.constant 0 : i32
    return %c0_i32, %c0_i32_0 : i32, i32
  }
  func.func @transform_3(%arg0: i32) -> (i32, i32) {
    %c0_i32 = arith.constant 0 : i32
    %c0_i32_0 = arith.constant 0 : i32
    %c0_i32_1 = arith.constant 0 : i32
    return %c0_i32, %c0_i32_0 : i32, i32
  }
  func.func @transform_4(%arg0: i32) -> (i32, i32) {
    %c0_i32 = arith.constant 0 : i32
    %c0_i32_0 = arith.constant 0 : i32
    %c0_i32_1 = arith.constant 0 : i32
    return %c0_i32, %c0_i32_0 : i32, i32
  }
  func.func @transform_5(%arg0: i32) -> (i32, i32) {
    %c0_i32 = arith.constant 0 : i32
    %c0_i32_0 = arith.constant 0 : i32
    %c0_i32_1 = arith.constant 0 : i32
    return %c0_i32, %c0_i32_0 : i32, i32
  }
  func.func @transform_6(%arg0: i32) -> (i32, i32, i32) {
    %c0_i32 = arith.constant 0 : i32
    %c0_i32_0 = arith.constant 0 : i32
    %c0_i32_1 = arith.constant 0 : i32
    %c0_i32_2 = arith.constant 0 : i32
    return %c0_i32, %c0_i32_0, %c0_i32_1 : i32, i32, i32
  }
  func.func @transform_7(%arg0: i32) -> (i32, i32, i32) {
    %c0_i32 = arith.constant 0 : i32
    %c0_i32_0 = arith.constant 0 : i32
    %c0_i32_1 = arith.constant 0 : i32
    %c0_i32_2 = arith.constant 0 : i32
    return %c0_i32, %c0_i32_0, %c0_i32_1 : i32, i32, i32
  }
  func.func @transform_8(%arg0: i32) -> (i32, i32, i32) {
    %c0_i32 = arith.constant 0 : i32
    %c0_i32_0 = arith.constant 0 : i32
    %c0_i32_1 = arith.constant 0 : i32
    %c0_i32_2 = arith.constant 0 : i32
    return %c0_i32, %c0_i32_0, %c0_i32_1 : i32, i32, i32
  }
  func.func @transform_9(%arg0: i32) -> (i32, i32, i32) {
    %c0_i32 = arith.constant 0 : i32
    %c0_i32_0 = arith.constant 0 : i32
    %c0_i32_1 = arith.constant 0 : i32
    %c0_i32_2 = arith.constant 0 : i32
    return %c0_i32, %c0_i32_0, %c0_i32_1 : i32, i32, i32
  }
  func.func @transform_10(%arg0: i32) -> (i32, i32) {
    %c0_i32 = arith.constant 0 : i32
    %c0_i32_0 = arith.constant 0 : i32
    %c0_i32_1 = arith.constant 0 : i32
    return %c0_i32, %c0_i32_0 : i32, i32
  }
  func.func @transform_11(%arg0: i32) -> (i32, i32) {
    %c0_i32 = arith.constant 0 : i32
    %c0_i32_0 = arith.constant 0 : i32
    %c0_i32_1 = arith.constant 0 : i32
    return %c0_i32, %c0_i32_0 : i32, i32
  }
  func.func @transform_12(%arg0: i32) -> (i32, i32, i32) {
    %c0_i32 = arith.constant 0 : i32
    %c0_i32_0 = arith.constant 0 : i32
    %c0_i32_1 = arith.constant 0 : i32
    %c0_i32_2 = arith.constant 0 : i32
    return %c0_i32, %c0_i32_0, %c0_i32_1 : i32, i32, i32
  }
  func.func @transform_13(%arg0: i32) -> (i32, i32, i32) {
    %c0_i32 = arith.constant 0 : i32
    %c0_i32_0 = arith.constant 0 : i32
    %c0_i32_1 = arith.constant 0 : i32
    %c0_i32_2 = arith.constant 0 : i32
    return %c0_i32, %c0_i32_0, %c0_i32_1 : i32, i32, i32
  }
  func.func @transform_14(%arg0: i32) -> (i32, i32, i32) {
    %c0_i32 = arith.constant 0 : i32
    %c0_i32_0 = arith.constant 0 : i32
    %c0_i32_1 = arith.constant 0 : i32
    %c0_i32_2 = arith.constant 0 : i32
    return %c0_i32, %c0_i32_0, %c0_i32_1 : i32, i32, i32
  }
  func.func @transform_15(%arg0: i32) -> (i32, i32, i32) {
    %c0_i32 = arith.constant 0 : i32
    %c0_i32_0 = arith.constant 0 : i32
    %c0_i32_1 = arith.constant 0 : i32
    %c0_i32_2 = arith.constant 0 : i32
    return %c0_i32, %c0_i32_0, %c0_i32_1 : i32, i32, i32
  }
  func.func @transform_16(%arg0: i32) -> (i32, i32) {
    %c0_i32 = arith.constant 0 : i32
    %c0_i32_0 = arith.constant 0 : i32
    %c0_i32_1 = arith.constant 0 : i32
    return %c0_i32, %c0_i32_0 : i32, i32
  }
  func.func @transform_17(%arg0: i32) -> (i32, i32) {
    %c0_i32 = arith.constant 0 : i32
    %c0_i32_0 = arith.constant 0 : i32
    %c0_i32_1 = arith.constant 0 : i32
    return %c0_i32, %c0_i32_0 : i32, i32
  }
  func.func @transform_18(%arg0: i32) -> (i32, i32) {
    %c0_i32 = arith.constant 0 : i32
    %c0_i32_0 = arith.constant 0 : i32
    %c0_i32_1 = arith.constant 0 : i32
    return %c0_i32, %c0_i32_0 : i32, i32
  }
  func.func @transform_19(%arg0: i32) -> (i32, i32) {
    %c0_i32 = arith.constant 0 : i32
    %c0_i32_0 = arith.constant 0 : i32
    %c0_i32_1 = arith.constant 0 : i32
    return %c0_i32, %c0_i32_0 : i32, i32
  }
  func.func @transform_20(%arg0: i32) -> (i32, i32) {
    %c0_i32 = arith.constant 0 : i32
    %c0_i32_0 = arith.constant 0 : i32
    return %arg0, %c0_i32 : i32, i32
  }
}

</mosaic_0001>

<bundles_post_ra>
// kernel: tpu_custom_call.1
= control target key start
LH: loop header
LB: loop body
LE: loop exit
PB: predicated region body
PF: predicated region fallthrough
CT: control target
= control target key end

     0   :  { %s12405_s0 = inlined_call_operand.vmem [shape: f32[32,128], index: 0, kind: input, shape index: {}]   ;;  %s12406_s1 = inlined_call_operand.vmem [shape: f32[16,64], index: 1, kind: input, shape index: {}]   ;;  %s12407_s2 = inlined_call_operand.vmem [shape: f32[32,32], index: 2, kind: input, shape index: {}]   ;;  %s12408_s3 = inlined_call_operand.vmem [shape: f32[32,16], index: 3, kind: input, shape index: {}]   ;;  %s12409_s4 = inlined_call_operand.vmem [shape: f32[1,128], index: 4, kind: input, shape index: {}]   ;;  %s12410_s5 = inlined_call_operand.vmem [shape: f32[1,128], index: 5, kind: input, shape index: {}]   ;;  %s12411_s6 = inlined_call_operand.vmem [shape: bf16[8,128,16], index: 6, kind: input, shape index: {}]   ;;  %s12412_s7 = inlined_call_operand.vmem [shape: bf16[8,128,16], index: 7, kind: input, shape index: {}]   ;;  %s12413_s8 = inlined_call_operand.vmem [shape: bf16[8,128,16], index: 8, kind: input, shape index: {}]   ;;  %s12414_s9 = inlined_call_operand.vmem [shape: bf16[8,16,128], index: 9, kind: input, shape index: {}]   ;;  %s12415_s10 = inlined_call_operand.vmem [shape: f32[1,128], index: 10, kind: input, shape index: {}]   ;;  %s12416_s11 = inlined_call_operand.vmem [shape: f32[1,128], index: 11, kind: input, shape index: {}]   ;;  %s12417_s12 = inlined_call_operand.vmem [shape: bf16[8,128,16], index: 12, kind: input, shape index: {}]   ;;  %s12418_s13 = inlined_call_operand.vmem [shape: bf16[8,64,16], index: 13, kind: input, shape index: {}]   ;;  %s12419_s14 = inlined_call_operand.vmem [shape: bf16[8,64,16], index: 14, kind: input, shape index: {}]   ;;  %s12420_s15 = inlined_call_operand.vmem [shape: bf16[8,16,128], index: 15, kind: input, shape index: {}]   ;;  %s12421_s16 = inlined_call_operand.vmem [shape: f32[1,128], index: 16, kind: input, shape index: {}]   ;;  %s12422_s17 = inlined_call_operand.vmem [shape: f32[1,128], index: 17, kind: input, shape index: {}]   ;;  %s12423_s18 = inlined_call_operand.vmem [shape: bf16[128,128], index: 18, kind: input, shape index: {}]   ;;  %s12424_s19 = inlined_call_operand.vmem [shape: bf16[64,128], index: 19, kind: input, shape index: {}]   ;;  %s12425_s20 = inlined_call_operand.hbm [shape: f32[32,128], index: 20, kind: output, shape index: {}]  }
   0x1   :  { %12432 = sst [smem:[#allocation6_spill]] %s12405_s0 }
   0x2   :  { %12433 = sst [smem:[#allocation7_spill]] %s12406_s1 }
   0x3   :  { %12434 = sst [smem:[#allocation8_spill]] %s12407_s2 }
   0x4   :  { %12435 = sst [smem:[#allocation9_spill]] %s12408_s3 }
   0x5   :  { %12436 = sst [smem:[#allocation10_spill]] %s12409_s4 }
   0x6   :  { %s12437_s23 = sld [smem:[#allocation6_spill]] }
   0xc   :  { %v69_v0 = vld [vmem:[%s12437_s23 + $0x10] sm:$0xff]  ;;  %v67_v1 = vld [vmem:[%s12437_s23] sm:$0xff] }
   0xd   :  { %77 = vadd.xlane.f32.xlu1 %v69_v0  ;;  %73 = vadd.xlane.f32.xlu0 %v67_v1 }
   0xe   :  { %25 = vsyncpa [#allocation3], 0  ;;  %v70_v2 = vld [vmem:[%s12437_s23 + $0x18] sm:$0xff]  ;;  %v68_v3 = vld [vmem:[%s12437_s23 + $0x8] sm:$0xff]  ;;  %v9612_v4 = vmov 128.0   ;;  %s12439_s28 = sld [smem:[#allocation10_spill]] }
   0xf   :  { %9284 = vrcp.f32 %v9612_v4  ;;  %v8928_v27 = vld [vmem:[%s12411_s6 + $0x38] sm:$0xff]  ;;  %v8927_v31 = vld [vmem:[%s12411_s6 + $0x30] sm:$0xff]  ;;  %v8926_v35 = vld [vmem:[%s12411_s6 + $0x28] sm:$0xff]  ;;  %vm2272_vm13 = vcmask 130048   ;;  %s12446_s26 = sld [smem:[#allocation8_spill]]  ;;  %vm2725_vm14 = vcmask 261120  }
  0x10   :  { %v8936_v28 = vld [vmem:[%s12411_s6 + $0x78] sm:$0xff]  ;;  %372 = vmatpush.bf16.msra.mxu0 %v8928_v27  ;;  %v8935_v32 = vld [vmem:[%s12411_s6 + $0x70] sm:$0xff]  ;;  %v8934_v36 = vld [vmem:[%s12411_s6 + $0x68] sm:$0xff]  ;;  %s9615_s2 = smov 128  }
  0x11   :  { %v8944_v29 = vld [vmem:[%s12411_s6 + $0xb8] sm:$0xff]  ;;  %439 = vmatpush.bf16.msra.mxu1 %v8936_v28  ;;  %v8943_v33 = vld [vmem:[%s12411_s6 + $0xb0] sm:$0xff]  ;;  %v8942_v37 = vld [vmem:[%s12411_s6 + $0xa8] sm:$0xff] }
  0x12   :  { %v8952_v30 = vld [vmem:[%s12411_s6 + $0xf8] sm:$0xff]  ;;  %506 = vmatpush.bf16.msra.mxu2 %v8944_v29  ;;  %v8951_v34 = vld [vmem:[%s12411_s6 + $0xf0] sm:$0xff]  ;;  %v8950_v38 = vld [vmem:[%s12411_s6 + $0xe8] sm:$0xff] }
  0x13   :  { %573 = vmatpush.bf16.msra.mxu3 %v8952_v30  ;;  %v8925_v39 = vld [vmem:[%s12411_s6 + $0x20] sm:$0xff]  ;;  %v8924_v43 = vld [vmem:[%s12411_s6 + $0x18] sm:$0xff]  ;;  %v8923_v47 = vld [vmem:[%s12411_s6 + $0x10] sm:$0xff] }
  0x14   :  { %373 = vmatpush.bf16.msra.mxu0 %v8927_v31  ;;  %v8933_v40 = vld [vmem:[%s12411_s6 + $0x60] sm:$0xff]  ;;  %v8932_v44 = vld [vmem:[%s12411_s6 + $0x58] sm:$0xff]  ;;  %v8931_v48 = vld [vmem:[%s12411_s6 + $0x50] sm:$0xff] }
  0x15   :  { %79 = vadd.xlane.f32.xlu1 %v70_v2  ;;  %75 = vadd.xlane.f32.xlu0 %v68_v3  ;;  %v9285_v5 = vpop.eup %9284  ;;  %v8941_v41 = vld [vmem:[%s12411_s6 + $0xa0] sm:$0xff]  ;;  %v8940_v45 = vld [vmem:[%s12411_s6 + $0x98] sm:$0xff]  ;;  %v8939_v49 = vld [vmem:[%s12411_s6 + $0x90] sm:$0xff] }
  0x16   :  { %v82_v6 = vmul.f32 128.0, %v9285_v5  ;;  %vm86_vm0 = vweird.f32 %v9285_v5  ;;  %440 = vmatpush.bf16.msra.mxu1 %v8935_v32  ;;  %507 = vmatpush.bf16.msra.mxu2 %v8943_v33  ;;  %v8949_v42 = vld [vmem:[%s12411_s6 + $0xe0] sm:$0xff]  ;;  %v8948_v46 = vld [vmem:[%s12411_s6 + $0xd8] sm:$0xff]  ;;  %v8947_v52 = vld [vmem:[%s12411_s6 + $0xd0] sm:$0xff] }
  0x17   :  { %574 = vmatpush.bf16.msra.mxu3 %v8951_v34  ;;  %v8922_v56 = vld [vmem:[%s12411_s6 + $0x8] sm:$0xff]  ;;  %v8921_v61 = vld [vmem:[%s12411_s6] sm:$0xff] }
  0x18   :  { %v83_v7 = vsub.f32 1.0, %v82_v6  ;;  %374 = vmatpush.bf16.msra.mxu0 %v8926_v35  ;;  %v8930_v57 = vld [vmem:[%s12411_s6 + $0x48] sm:$0xff]  ;;  %v8929_v62 = vld [vmem:[%s12411_s6 + $0x40] sm:$0xff] }
  0x19   :  { %v8938_v59 = vld [vmem:[%s12411_s6 + $0x88] sm:$0xff]  ;;  %v8937_v63 = vld [vmem:[%s12411_s6 + $0x80] sm:$0xff] }
  0x1a   :  { %v84_v8 = vmul.f32 %v9285_v5, %v83_v7  ;;  %441 = vmatpush.bf16.msra.mxu1 %v8934_v36  ;;  %508 = vmatpush.bf16.msra.mxu2 %v8942_v37  ;;  %v8946_v60 = vld [vmem:[%s12411_s6 + $0xc8] sm:$0xff] }
  0x1b   :  { %575 = vmatpush.bf16.msra.mxu3 %v8950_v38  ;;  %v8958_v27 = vld [vmem:[%s12411_s6 + $0x128] sm:$0xff] }
  0x1c   :  { %v85_v9 = vadd.f32 %v9285_v5, %v84_v8  ;;  %375 = vmatpush.bf16.msra.mxu0 %v8925_v39  ;;  %v8966_v28 = vld [vmem:[%s12411_s6 + $0x168] sm:$0xff]  ;;  %v8957_v39 = vld [vmem:[%s12411_s6 + $0x120] sm:$0xff] }
  0x1d   :  { %v8974_v30 = vld [vmem:[%s12411_s6 + $0x1a8] sm:$0xff] }
  0x1e   :  { %v9734_v10 = vsel %vm86_vm0, %v9285_v5, %v85_v9  ;;  %442 = vmatpush.bf16.msra.mxu1 %v8933_v40  ;;  %509 = vmatpush.bf16.msra.mxu2 %v8941_v41  ;;  %v8960_v9 = vld [vmem:[%s12411_s6 + $0x138] sm:$0xff]  ;;  %v8982_v31 = vld [vmem:[%s12411_s6 + $0x1e8] sm:$0xff]  ;;  %v8965_v40 = vld [vmem:[%s12411_s6 + $0x160] sm:$0xff] }
  0x1f   :  { %12438 = vst [vmem:[#allocation5_spill] sm:$0xff] %v9734_v10  ;;  %576 = vmatpush.bf16.msra.mxu3 %v8949_v42  ;;  %v8973_v42 = vld [vmem:[%s12411_s6 + $0x1a0] sm:$0xff] }
  0x20   :  { %376 = vmatpush.bf16.msra.mxu0 %v8924_v43  ;;  %v8981_v43 = vld [vmem:[%s12411_s6 + $0x1e0] sm:$0xff] }
  0x22   :  { %443 = vmatpush.bf16.msra.mxu1 %v8932_v44  ;;  %510 = vmatpush.bf16.msra.mxu2 %v8940_v45  ;;  %v9927_v44 = vld [vmem:[%s12439_s28] ss:$0 sm:$0xff] }
  0x23   :  { %577 = vmatpush.bf16.msra.mxu3 %v8948_v46 }
  0x24   :  { %377 = vmatpush.bf16.msra.mxu0 %v8923_v47 }
  0x26   :  { %444 = vmatpush.bf16.msra.mxu1 %v8931_v48  ;;  %511 = vmatpush.bf16.msra.mxu2 %v8939_v49  ;;  %v9933_v49 = vld [vmem:[%s12410_s5] ss:$0 sm:$0xff] }
  0x27   :  { %578 = vmatpush.bf16.msra.mxu3 %v8947_v52 }
  0x28   :  { %378 = vmatpush.bf16.msra.mxu0 %v8922_v56 }
  0x2a   :  { %445 = vmatpush.bf16.msra.mxu1 %v8930_v57  ;;  %512 = vmatpush.bf16.msra.mxu2 %v8938_v59  ;;  %v8980_v57 = vld [vmem:[%s12411_s6 + $0x1d8] sm:$0xff]  ;;  %v9011_v59 = vld [vmem:[%s12412_s7 + $0xd0] sm:$0xff] }
  0x2b   :  { %579 = vmatpush.bf16.msra.mxu3 %v8946_v60  ;;  %v8955_v60 = vld [vmem:[%s12411_s6 + $0x110] sm:$0xff] }
  0x2c   :  { %379 = vmatpush.bf16.msra.mxu0 %v8921_v61  ;;  %v8963_v61 = vld [vmem:[%s12411_s6 + $0x150] sm:$0xff] }
  0x2e   :  { %446 = vmatpush.bf16.msra.mxu1 %v8929_v62  ;;  %513 = vmatpush.bf16.msra.mxu2 %v8937_v63 }
  0x30   :  { %640 = vmatpush.bf16.msrb.mxu0 %v8960_v9  ;;  %v8970_v9 = vld [vmem:[%s12411_s6 + $0x188] sm:$0xff] }
  0x80   :  { %v78_v11 = vpop.xlane.xlu1 %77  ;;  %v74_v12 = vpop.xlane.xlu0 %73 }
  0x81   :  { %v90_v13 = vmul.f32 %v9734_v10, %v78_v11  ;;  %v88_v14 = vmul.f32 %v9734_v10, %v74_v12  ;;  %v8968_v11 = vld [vmem:[%s12411_s6 + $0x178] sm:$0xff] }
  0x82   :  { %v8976_v12 = vld [vmem:[%s12411_s6 + $0x1b8] sm:$0xff]  ;;  %707 = vmatpush.bf16.msrb.mxu1 %v8968_v11  ;;  %v8978_v11 = vld [vmem:[%s12411_s6 + $0x1c8] sm:$0xff] }
  0x83   :  { %v9738_v15 = vsub.f32 %v69_v0, %v90_v13  ;;  %v9740_v16 = vsub.f32 %v67_v1, %v88_v14  ;;  %v8984_v13 = vld [vmem:[%s12411_s6 + $0x1f8] sm:$0xff]  ;;  %774 = vmatpush.bf16.msrb.mxu2 %v8976_v12 }
  0x85   :  { %v98_v17 = vmul.f32 %v9738_v15, %v9738_v15  ;;  %v96_v18 = vmul.f32 %v9740_v16, %v9740_v16 }
  0x87   :  { %104 = vadd.xlane.f32.xlu0 %v98_v17  ;;  %100 = vadd.xlane.f32.xlu2 %v96_v18  ;;  %v8959_v18 = vld [vmem:[%s12411_s6 + $0x130] sm:$0xff] }
  0x88   :  { %v80_v19 = vpop.xlane.xlu1 %79  ;;  %v76_v20 = vpop.xlane.xlu0 %75  ;;  %641 = vmatpush.bf16.msrb.mxu0 %v8959_v18 }
  0x89   :  { %v91_v21 = vmul.f32 %v9734_v10, %v80_v19  ;;  %v89_v22 = vmul.f32 %v9734_v10, %v76_v20  ;;  %v8967_v19 = vld [vmem:[%s12411_s6 + $0x170] sm:$0xff] }
  0x8a   :  { %v8975_v20 = vld [vmem:[%s12411_s6 + $0x1b0] sm:$0xff]  ;;  %708 = vmatpush.bf16.msrb.mxu1 %v8967_v19 }
  0x8b   :  { %v9748_v23 = vsub.f32 %v70_v2, %v91_v21  ;;  %v9750_v24 = vsub.f32 %v68_v3, %v89_v22  ;;  %v8945_v2 = vld [vmem:[%s12411_s6 + $0xc0] sm:$0xff]  ;;  %v8983_v21 = vld [vmem:[%s12411_s6 + $0x1f0] sm:$0xff]  ;;  %775 = vmatpush.bf16.msrb.mxu2 %v8975_v20 }
  0x8c   :  { %580 = vmatpush.bf16.msra.mxu3 %v8945_v2  ;;  %642 = vmatpush.bf16.msrb.mxu0 %v8958_v27  ;;  %v8953_v20 = vld [vmem:[%s12411_s6 + $0x100] sm:$0xff] }
  0x8d   :  { %v99_v25 = vmul.f32 %v9748_v23, %v9748_v23  ;;  %v97_v26 = vmul.f32 %v9750_v24, %v9750_v24 }
  0x8e   :  { %709 = vmatpush.bf16.msrb.mxu1 %v8966_v28 }
  0x8f   :  { %106 = vadd.xlane.f32.xlu1 %v99_v25  ;;  %102 = vadd.xlane.f32.xlu2 %v97_v26 }
  0x90   :  { %841 = vmatpush.bf16.msrb.mxu3 %v8984_v13  ;;  %776 = vmatpush.bf16.msrb.mxu2 %v8974_v30  ;;  %v8992_v30 = vld [vmem:[%s12412_s7 + $0x38] sm:$0xff] }
  0x91   :  { %643 = vmatpush.bf16.msrb.mxu0 %v8957_v39 }
  0x92   :  { %710 = vmatpush.bf16.msrb.mxu1 %v8965_v40  ;;  %v8990_v40 = vld [vmem:[%s12412_s7 + $0x28] sm:$0xff] }
  0x94   :  { %842 = vmatpush.bf16.msrb.mxu3 %v8983_v21  ;;  %777 = vmatpush.bf16.msrb.mxu2 %v8973_v42  ;;  %v8961_v21 = vld [vmem:[%s12411_s6 + $0x140] sm:$0xff]  ;;  %v9006_v42 = vld [vmem:[%s12412_s7 + $0xa8] sm:$0xff] }
  0x98   :  { %843 = vmatpush.bf16.msrb.mxu3 %v8982_v31  ;;  %v9008_v31 = vld [vmem:[%s12412_s7 + $0xb8] sm:$0xff] }
  0x9c   :  { %844 = vmatpush.bf16.msrb.mxu3 %v8981_v43  ;;  %v9014_v43 = vld [vmem:[%s12412_s7 + $0xe8] sm:$0xff] }
  0xa0   :  { %845 = vmatpush.bf16.msrb.mxu3 %v8980_v57  ;;  %v9003_v57 = vld [vmem:[%s12412_s7 + $0x90] sm:$0xff] }
  0xfa   :  { %v101_v50 = vpop.xlane.xlu2 %100  ;;  %v105_v51 = vpop.xlane.xlu0 %104 }
  0xfb   :  { %v108_v53 = vmul.f32 %v101_v50, %v9734_v10  ;;  %v110_v54 = vmul.f32 %v105_v51, %v9734_v10 }
  0xfd   :  { %v112_v55 = vadd.f32 1e-05, %v108_v53  ;;  %v9836_v58 = vadd.f32 1e-05, %v110_v54  ;;  %v8964_v53 = vld [vmem:[%s12411_s6 + $0x158] sm:$0xff] }
  0xfe   :  { %v8972_v54 = vld [vmem:[%s12411_s6 + $0x198] sm:$0xff]  ;;  %711 = vmatpush.bf16.msrb.mxu1 %v8964_v53 }
  0xff   :  { %9286 = vrsqrt.f32 %v112_v55  ;;  %vm122_vm2 = vweird.f32 %v112_v55  ;;  %vm142_vm9 = vweird.f32 %v9836_v58  ;;  %778 = vmatpush.bf16.msrb.mxu2 %v8972_v54  ;;  %v9004_v53 = vld [vmem:[%s12412_s7 + $0x98] sm:$0xff] }
 0x100   :  { %9288 = vrsqrt.f32 %v9836_v58  ;;  %v9012_v54 = vld [vmem:[%s12412_s7 + $0xd8] sm:$0xff] }
 0x102   :  { %v107_v0 = vpop.xlane.xlu1 %106  ;;  %v103_v1 = vpop.xlane.xlu2 %102  ;;  %712 = vmatpush.bf16.msrb.mxu1 %v8963_v61  ;;  %v8994_v61 = vld [vmem:[%s12412_s7 + $0x48] sm:$0xff] }
 0x103   :  { %v111_v3 = vmul.f32 %v107_v0, %v9734_v10  ;;  %v109_v4 = vmul.f32 %v103_v1, %v9734_v10  ;;  %v8971_v0 = vld [vmem:[%s12411_s6 + $0x190] sm:$0xff] }
 0x104   :  { %v8979_v1 = vld [vmem:[%s12411_s6 + $0x1d0] sm:$0xff]  ;;  %779 = vmatpush.bf16.msrb.mxu2 %v8971_v0  ;;  %v8985_v0 = vld [vmem:[%s12412_s7] sm:$0xff] }
 0x105   :  { %v9287_v5 = vpop.eup %9286  ;;  %v9859_v6 = vadd.f32 1e-05, %v111_v3  ;;  %v9861_v7 = vadd.f32 1e-05, %v109_v4  ;;  %846 = vmatpush.bf16.msrb.mxu3 %v8979_v1  ;;  %v8993_v1 = vld [vmem:[%s12412_s7 + $0x40] sm:$0xff] }
 0x106   :  { %v117_v8 = vmul.f32 %v9287_v5, %v112_v55  ;;  %v9876_v14 = vpop.eup %9288  ;;  %vm123_vm1 = vweird.f32 %v9287_v5 }
 0x107   :  { %9290 = vrsqrt.f32 %v9859_v6  ;;  %v137_v25 = vmul.f32 %v9876_v14, %v9836_v58  ;;  %vm124_vm3 = vmor %vm122_vm2, %vm123_vm1  ;;  %vm152_vm5 = vweird.f32 %v9859_v6  ;;  %vm132_vm7 = vweird.f32 %v9861_v7  ;;  %v9009_v58 = vld [vmem:[%s12412_s7 + $0xc0] sm:$0xff] }
 0x108   :  { %v118_v17 = vmul.f32 %v9287_v5, %v117_v8  ;;  %9292 = vrsqrt.f32 %v9861_v7  ;;  %vm143_vm10 = vweird.f32 %v9876_v14  ;;  %v8962_v8 = vld [vmem:[%s12411_s6 + $0x148] sm:$0xff]  ;;  %780 = vmatpush.bf16.msrb.mxu2 %v8970_v9  ;;  %v9047_v9 = vld [vmem:[%s12412_s7 + $0x1f0] sm:$0xff] }
 0x109   :  { %v138_v35 = vmul.f32 %v9876_v14, %v137_v25  ;;  %vm9983_vm12 = vmor %vm142_vm9, %vm143_vm10  ;;  %713 = vmatpush.bf16.msrb.mxu1 %v8962_v8  ;;  %847 = vmatpush.bf16.msrb.mxu3 %v8978_v11  ;;  %v9031_v8 = vld [vmem:[%s12412_s7 + $0x170] sm:$0xff]  ;;  %v9022_v11 = vld [vmem:[%s12412_s7 + $0x128] sm:$0xff] }
 0x10a   :  { %v119_v22 = vmul.f32 0.5, %v118_v17 }
 0x10b   :  { %v139_v47 = vmul.f32 0.5, %v138_v35  ;;  %v8999_v35 = vld [vmem:[%s12412_s7 + $0x70] sm:$0xff] }
 0x10c   :  { %v120_v26 = vsub.f32 1.5, %v119_v22  ;;  %v8969_v22 = vld [vmem:[%s12411_s6 + $0x180] sm:$0xff] }
 0x10d   :  { %v9899_v29 = vpop.eup %9290  ;;  %v140_v55 = vsub.f32 1.5, %v139_v47  ;;  %714 = vmatpush.bf16.msrb.mxu1 %v8961_v21  ;;  %781 = vmatpush.bf16.msrb.mxu2 %v8969_v22  ;;  %v8997_v47 = vld [vmem:[%s12412_s7 + $0x60] sm:$0xff]  ;;  %v9020_v22 = vld [vmem:[%s12412_s7 + $0x118] sm:$0xff] }
 0x10e   :  { %v9293_v32 = vpop.eup %9292  ;;  %v121_v33 = vmul.f32 %v9287_v5, %v120_v26  ;;  %v147_v34 = vmul.f32 %v9899_v29, %v9859_v6  ;;  %vm153_vm6 = vweird.f32 %v9899_v29  ;;  %v8954_v6 = vld [vmem:[%s12411_s6 + $0x108] sm:$0xff]  ;;  %v9045_v21 = vld [vmem:[%s12412_s7 + $0x1e0] sm:$0xff] }
 0x10f   :  { %v127_v36 = vmul.f32 %v9293_v32, %v9861_v7  ;;  %vm133_vm4 = vweird.f32 %v9293_v32  ;;  %vm9977_vm11 = vmor %vm152_vm5, %vm153_vm6  ;;  %v141_v4 = vmul.f32 %v9876_v14, %v140_v55  ;;  %v8987_v55 = vld [vmem:[%s12412_s7 + $0x10] sm:$0xff] }
 0x110   :  { %v125_v37 = vsel %vm124_vm3, %v9287_v5, %v121_v33  ;;  %v148_v38 = vmul.f32 %v9899_v29, %v147_v34  ;;  %vm9951_vm8 = vmor %vm132_vm7, %vm133_vm4  ;;  %v8991_v34 = vld [vmem:[%s12412_s7 + $0x30] sm:$0xff]  ;;  %v9040_v5 = vld [vmem:[%s12412_s7 + $0x1b8] sm:$0xff] }
 0x111   :  { %v128_v41 = vmul.f32 %v9293_v32, %v127_v36  ;;  %v156_v45 = vmul.f32 %v125_v37, %v9740_v16  ;;  %v8956_v16 = vld [vmem:[%s12411_s6 + $0x118] sm:$0xff]  ;;  %v145_v17 = vsel %vm9983_vm12, %v9876_v14, %v141_v4  ;;  %v9007_v36 = vld [vmem:[%s12412_s7 + $0xb0] sm:$0xff] }
 0x112   :  { %v149_v46 = vmul.f32 0.5, %v148_v38  ;;  %644 = vmatpush.bf16.msrb.mxu0 %v8956_v16  ;;  %v158_v25 = vmul.f32 %v145_v17, %v9738_v15  ;;  %v9000_v15 = vld [vmem:[%s12412_s7 + $0x78] sm:$0xff]  ;;  %v9015_v37 = vld [vmem:[%s12412_s7 + $0xf0] sm:$0xff]  ;;  %v9046_v17 = vld [vmem:[%s12412_s7 + $0x1e8] sm:$0xff] }
 0x113   :  { %v129_v48 = vmul.f32 0.5, %v128_v41  ;;  %v164_v52 = vmul.f32 %v9927_v44, %v156_v45  ;;  %v8998_v41 = vld [vmem:[%s12412_s7 + $0x68] sm:$0xff]  ;;  %v8996_v16 = vld [vmem:[%s12412_s7 + $0x58] sm:$0xff] }
 0x114   :  { %v150_v50 = vsub.f32 1.5, %v149_v46  ;;  %v8989_v46 = vld [vmem:[%s12412_s7 + $0x20] sm:$0xff]  ;;  %v9032_v4 = vld [vmem:[%s12412_s7 + $0x178] sm:$0xff] }
 0x115   :  { %v130_v51 = vsub.f32 1.5, %v129_v48  ;;  %v172_v2 = vadd.f32 %v9933_v49, %v164_v52  ;;  %v9005_v48 = vld [vmem:[%s12412_s7 + $0xa0] sm:$0xff]  ;;  %v8988_v52 = vld [vmem:[%s12412_s7 + $0x18] sm:$0xff] }
 0x116   :  { %v151_v62 = vmul.f32 %v9899_v29, %v150_v50  ;;  %645 = vmatpush.bf16.msrb.mxu0 %v8955_v60  ;;  %v8986_v60 = vld [vmem:[%s12412_s7 + $0x8] sm:$0xff] }
 0x117   :  { %v131_v56 = vmul.f32 %v9293_v32, %v130_v51  ;;  %v180_v12 = vpack.c.bf16 %v172_v2, %v172_v2  ;;  %v9001_v2 = vld [vmem:[%s12412_s7 + $0x80] sm:$0xff] }
 0x119   :  { %v135_v63 = vsel %vm9951_vm8, %v9293_v32, %v131_v56  ;;  %v316_v14 = vunpack.c.l.b16 %v180_v12  ;;  %v9016_v32 = vld [vmem:[%s12412_s7 + $0xf8] sm:$0xff]  ;;  %v8995_v56 = vld [vmem:[%s12412_s7 + $0x50] sm:$0xff]  ;;  %v9030_v12 = vld [vmem:[%s12412_s7 + $0x168] sm:$0xff] }
 0x11a   :  { %v157_v3 = vmul.f32 %v135_v63, %v9750_v24  ;;  %v155_v24 = vsel %vm9977_vm11, %v9899_v29, %v151_v62  ;;  %646 = vmatpush.bf16.msrb.mxu0 %v8954_v6  ;;  %v166_v29 = vmul.f32 %v9927_v44, %v158_v25  ;;  %v9002_v62 = vld [vmem:[%s12412_s7 + $0x88] sm:$0xff]  ;;  %v9023_v6 = vld [vmem:[%s12412_s7 + $0x130] sm:$0xff]  ;;  %v9044_v25 = vld [vmem:[%s12412_s7 + $0x1d8] sm:$0xff]  ;;  %vm4801_vm11 = vcmask 523264  }
 0x11b   :  { %v159_v18 = vmul.f32 %v155_v24, %v9748_v23  ;;  %v8977_v23 = vld [vmem:[%s12411_s6 + $0x1c0] sm:$0xff]  ;;  %v9010_v63 = vld [vmem:[%s12412_s7 + $0xc8] sm:$0xff]  ;;  %v9039_v24 = vld [vmem:[%s12412_s7 + $0x1b0] sm:$0xff] }
 0x11c   :  { %v165_v7 = vmul.f32 %v9927_v44, %v157_v3  ;;  %848 = vmatpush.bf16.msrb.mxu3 %v8977_v23  ;;  %v174_v38 = vadd.f32 %v9933_v49, %v166_v29  ;;  %v9024_v3 = vld [vmem:[%s12412_s7 + $0x138] sm:$0xff]  ;;  %v9035_v29 = vld [vmem:[%s12412_s7 + $0x190] sm:$0xff] }
 0x11d   :  { %v167_v27 = vmul.f32 %v9927_v44, %v159_v18  ;;  %v9021_v18 = vld [vmem:[%s12412_s7 + $0x120] sm:$0xff]  ;;  %v9028_v23 = vld [vmem:[%s12412_s7 + $0x158] sm:$0xff] }
 0x11e   :  { %v173_v13 = vadd.f32 %v9933_v49, %v165_v7  ;;  %647 = vmatpush.bf16.msrb.mxu0 %v8953_v20  ;;  %v182_v44 = vpack.c.bf16 %v174_v38, %v174_v38  ;;  %v9048_v7 = vld [vmem:[%s12412_s7 + $0x1f8] sm:$0xff]  ;;  %v9037_v20 = vld [vmem:[%s12412_s7 + $0x1a0] sm:$0xff] }
 0x11f   :  { %v175_v33 = vadd.f32 %v9933_v49, %v167_v27  ;;  %v9013_v49 = vld [vmem:[%s12412_s7 + $0xe0] sm:$0xff]  ;;  %v9027_v27 = vld [vmem:[%s12412_s7 + $0x150] sm:$0xff]  ;;  %v9056_v38 = vld [vmem:[%s12413_s8 + $0x38] sm:$0xff] }
 0x120   :  { %v181_v19 = vpack.c.bf16 %v173_v13, %v173_v13  ;;  %v318_v50 = vunpack.c.l.b16 %v182_v44  ;;  %v9038_v13 = vld [vmem:[%s12412_s7 + $0x1a8] sm:$0xff]  ;;  %v9071_v44 = vld [vmem:[%s12413_s8 + $0xb0] sm:$0xff] }
 0x121   :  { %v183_v39 = vpack.c.bf16 %v175_v33, %v175_v33  ;;  %v9042_v33 = vld [vmem:[%s12412_s7 + $0x1c8] sm:$0xff] }
 0x122   :  { %v317_v26 = vunpack.c.l.b16 %v181_v19  ;;  %v9029_v19 = vld [vmem:[%s12412_s7 + $0x160] sm:$0xff] }
 0x123   :  { %v319_v45 = vunpack.c.l.b16 %v183_v39  ;;  %v9064_v39 = vld [vmem:[%s12413_s8 + $0x78] sm:$0xff] }
 0x124   :  { %v10022_v28 = vpack.c.b16 %v317_v26, %v316_v14  ;;  %v9036_v14 = vld [vmem:[%s12412_s7 + $0x198] sm:$0xff]  ;;  %v9019_v26 = vld [vmem:[%s12412_s7 + $0x110] sm:$0xff] }
 0x125   :  { %v10079_v51 = vpack.c.b16 %v319_v45, %v318_v50  ;;  %v9079_v45 = vld [vmem:[%s12413_s8 + $0xf0] sm:$0xff]  ;;  %v9053_v50 = vld [vmem:[%s12413_s8 + $0x20] sm:$0xff] }
 0x126   :  { %380 = vmatmul.bf16.vlgmr.msra.gmra.mxu0 %v10022_v28  ;;  %447 = vmatmul.bf16.vlgmr.msra.gmra.mxu1 %v10022_v28 }
 0x127   :  { %514 = vmatmul.bf16.vlgmr.msra.gmra.mxu2 %v10022_v28  ;;  %581 = vmatmul.bf16.vlgmr.msra.gmra.mxu3 %v10022_v28 }
 0x128   :  { %1036 = vmatpush.bf16.msra.mxu0 %v8992_v30  ;;  %1103 = vmatpush.bf16.msra.mxu1 %v9000_v15  ;;  %v9043_v30 = vld [vmem:[%s12412_s7 + $0x1d0] sm:$0xff]  ;;  %v9018_v15 = vld [vmem:[%s12412_s7 + $0x108] sm:$0xff] }
 0x129   :  { %1170 = vmatpush.bf16.msra.mxu2 %v9008_v31  ;;  %1237 = vmatpush.bf16.msra.mxu3 %v9016_v32  ;;  %v9026_v31 = vld [vmem:[%s12412_s7 + $0x148] sm:$0xff] }
 0x12a   :  { %v9034_v32 = vld [vmem:[%s12412_s7 + $0x188] sm:$0xff] }
 0x12c   :  { %1037 = vmatpush.bf16.msra.mxu0 %v8991_v34  ;;  %1104 = vmatpush.bf16.msra.mxu1 %v8999_v35  ;;  %v9017_v34 = vld [vmem:[%s12412_s7 + $0x100] sm:$0xff] }
 0x12d   :  { %1171 = vmatpush.bf16.msra.mxu2 %v9007_v36  ;;  %1238 = vmatpush.bf16.msra.mxu3 %v9015_v37  ;;  %v9025_v35 = vld [vmem:[%s12412_s7 + $0x140] sm:$0xff] }
 0x12e   :  { %v9033_v36 = vld [vmem:[%s12412_s7 + $0x180] sm:$0xff] }
 0x12f   :  { %v9041_v37 = vld [vmem:[%s12412_s7 + $0x1c0] sm:$0xff]  ;;  %s12448_s7 = sld [smem:[#allocation7_spill]] }
 0x130   :  { %1038 = vmatpush.bf16.msra.mxu0 %v8990_v40  ;;  %1105 = vmatpush.bf16.msra.mxu1 %v8998_v41  ;;  %v9072_v40 = vld [vmem:[%s12413_s8 + $0xb8] sm:$0xff] }
 0x131   :  { %1172 = vmatpush.bf16.msra.mxu2 %v9006_v42  ;;  %1239 = vmatpush.bf16.msra.mxu3 %v9014_v43  ;;  %v9080_v41 = vld [vmem:[%s12413_s8 + $0xf8] sm:$0xff]  ;;  %v9055_v42 = vld [vmem:[%s12413_s8 + $0x30] sm:$0xff] }
 0x132   :  { %v9063_v43 = vld [vmem:[%s12413_s8 + $0x70] sm:$0xff] }
 0x134   :  { %1039 = vmatpush.bf16.msra.mxu0 %v8989_v46  ;;  %1106 = vmatpush.bf16.msra.mxu1 %v8997_v47  ;;  %v9054_v46 = vld [vmem:[%s12413_s8 + $0x28] sm:$0xff] }
 0x135   :  { %1173 = vmatpush.bf16.msra.mxu2 %v9005_v48  ;;  %1240 = vmatpush.bf16.msra.mxu3 %v9013_v49  ;;  %v9062_v47 = vld [vmem:[%s12413_s8 + $0x68] sm:$0xff] }
 0x136   :  { %385 = vmatmul.bf16.gmra.mxu0 %v10079_v51  ;;  %452 = vmatmul.bf16.gmra.mxu1 %v10079_v51  ;;  %v9070_v48 = vld [vmem:[%s12413_s8 + $0xa8] sm:$0xff] }
 0x137   :  { %519 = vmatmul.bf16.gmra.mxu2 %v10079_v51  ;;  %586 = vmatmul.bf16.gmra.mxu3 %v10079_v51  ;;  %v9078_v49 = vld [vmem:[%s12413_s8 + $0xe8] sm:$0xff] }
 0x138   :  { %1040 = vmatpush.bf16.msra.mxu0 %v8988_v52  ;;  %1107 = vmatpush.bf16.msra.mxu1 %v8996_v16  ;;  %v9061_v52 = vld [vmem:[%s12413_s8 + $0x60] sm:$0xff] }
 0x139   :  { %1174 = vmatpush.bf16.msra.mxu2 %v9004_v53  ;;  %1241 = vmatpush.bf16.msra.mxu3 %v9012_v54  ;;  %v9069_v16 = vld [vmem:[%s12413_s8 + $0xa0] sm:$0xff]  ;;  %v9052_v54 = vld [vmem:[%s12413_s8 + $0x18] sm:$0xff] }
 0x13a   :  { %v9077_v53 = vld [vmem:[%s12413_s8 + $0xe0] sm:$0xff] }
 0x13c   :  { %1041 = vmatpush.bf16.msra.mxu0 %v8987_v55  ;;  %1108 = vmatpush.bf16.msra.mxu1 %v8995_v56  ;;  %v9060_v55 = vld [vmem:[%s12413_s8 + $0x58] sm:$0xff] }
 0x13d   :  { %1175 = vmatpush.bf16.msra.mxu2 %v9003_v57  ;;  %1242 = vmatpush.bf16.msra.mxu3 %v9011_v59  ;;  %v9068_v56 = vld [vmem:[%s12413_s8 + $0x98] sm:$0xff]  ;;  %v9051_v59 = vld [vmem:[%s12413_s8 + $0x10] sm:$0xff] }
 0x13e   :  { %v9076_v57 = vld [vmem:[%s12413_s8 + $0xd8] sm:$0xff] }
 0x140   :  { %1042 = vmatpush.bf16.msra.mxu0 %v8986_v60  ;;  %1109 = vmatpush.bf16.msra.mxu1 %v8994_v61  ;;  %v9059_v60 = vld [vmem:[%s12413_s8 + $0x50] sm:$0xff] }
 0x141   :  { %1176 = vmatpush.bf16.msra.mxu2 %v9002_v62  ;;  %1243 = vmatpush.bf16.msra.mxu3 %v9010_v63  ;;  %v9067_v61 = vld [vmem:[%s12413_s8 + $0x90] sm:$0xff]  ;;  %v9050_v63 = vld [vmem:[%s12413_s8 + $0x8] sm:$0xff] }
 0x142   :  { %v9075_v62 = vld [vmem:[%s12413_s8 + $0xd0] sm:$0xff] }
 0x144   :  { %1043 = vmatpush.bf16.msra.mxu0 %v8985_v0  ;;  %1110 = vmatpush.bf16.msra.mxu1 %v8993_v1  ;;  %v9058_v0 = vld [vmem:[%s12413_s8 + $0x48] sm:$0xff] }
 0x145   :  { %1177 = vmatpush.bf16.msra.mxu2 %v9001_v2  ;;  %1244 = vmatpush.bf16.msra.mxu3 %v9009_v58  ;;  %v9066_v1 = vld [vmem:[%s12413_s8 + $0x88] sm:$0xff]  ;;  %v9049_v58 = vld [vmem:[%s12413_s8] sm:$0xff] }
 0x146   :  { %648 = vmatmul.bf16.vlgmr.msrb.gmra.mxu0 %v10022_v28  ;;  %715 = vmatmul.bf16.vlgmr.msrb.gmra.mxu1 %v10022_v28  ;;  %v9074_v2 = vld [vmem:[%s12413_s8 + $0xc8] sm:$0xff] }
 0x147   :  { %782 = vmatmul.bf16.vlgmr.msrb.gmra.mxu2 %v10022_v28  ;;  %849 = vmatmul.bf16.vlgmr.msrb.gmra.mxu3 %v10022_v28 }
 0x148   :  { %1304 = vmatpush.bf16.msrb.mxu0 %v9024_v3  ;;  %1371 = vmatpush.bf16.msrb.mxu1 %v9032_v4  ;;  %v9057_v3 = vld [vmem:[%s12413_s8 + $0x40] sm:$0xff] }
 0x149   :  { %1438 = vmatpush.bf16.msrb.mxu2 %v9040_v5  ;;  %1505 = vmatpush.bf16.msrb.mxu3 %v9048_v7  ;;  %v9065_v4 = vld [vmem:[%s12413_s8 + $0x80] sm:$0xff]  ;;  %v9088_v7 = vld [vmem:[%s12413_s8 + $0x138] sm:$0xff] }
 0x14a   :  { %v9073_v5 = vld [vmem:[%s12413_s8 + $0xc0] sm:$0xff] }
 0x14c   :  { %1305 = vmatpush.bf16.msrb.mxu0 %v9023_v6  ;;  %1372 = vmatpush.bf16.msrb.mxu1 %v9031_v8  ;;  %v9096_v6 = vld [vmem:[%s12413_s8 + $0x178] sm:$0xff] }
 0x14d   :  { %1439 = vmatpush.bf16.msrb.mxu2 %v9039_v24  ;;  %1506 = vmatpush.bf16.msrb.mxu3 %v9047_v9  ;;  %v9104_v8 = vld [vmem:[%s12413_s8 + $0x1b8] sm:$0xff]  ;;  %v9087_v9 = vld [vmem:[%s12413_s8 + $0x130] sm:$0xff] }
 0x14e   :  { %v9112_v24 = vld [vmem:[%s12413_s8 + $0x1f8] sm:$0xff] }
 0x150   :  { %1306 = vmatpush.bf16.msrb.mxu0 %v9022_v11  ;;  %1373 = vmatpush.bf16.msrb.mxu1 %v9030_v12  ;;  %v9095_v11 = vld [vmem:[%s12413_s8 + $0x170] sm:$0xff] }
 0x151   :  { %1440 = vmatpush.bf16.msrb.mxu2 %v9038_v13  ;;  %1507 = vmatpush.bf16.msrb.mxu3 %v9046_v17  ;;  %v9103_v12 = vld [vmem:[%s12413_s8 + $0x1b0] sm:$0xff]  ;;  %v9086_v17 = vld [vmem:[%s12413_s8 + $0x128] sm:$0xff] }
 0x152   :  { %v9111_v13 = vld [vmem:[%s12413_s8 + $0x1f0] sm:$0xff] }
 0x154   :  { %1307 = vmatpush.bf16.msrb.mxu0 %v9021_v18  ;;  %1374 = vmatpush.bf16.msrb.mxu1 %v9029_v19  ;;  %v9094_v18 = vld [vmem:[%s12413_s8 + $0x168] sm:$0xff] }
 0x155   :  { %1441 = vmatpush.bf16.msrb.mxu2 %v9037_v20  ;;  %1508 = vmatpush.bf16.msrb.mxu3 %v9045_v21  ;;  %v9102_v19 = vld [vmem:[%s12413_s8 + $0x1a8] sm:$0xff]  ;;  %v9085_v21 = vld [vmem:[%s12413_s8 + $0x120] sm:$0xff] }
 0x156   :  { %653 = vmatmul.bf16.gmra.mxu0 %v10079_v51  ;;  %720 = vmatmul.bf16.gmra.mxu1 %v10079_v51  ;;  %v9110_v20 = vld [vmem:[%s12413_s8 + $0x1e8] sm:$0xff] }
 0x157   :  { %787 = vmatmul.bf16.gmra.mxu2 %v10079_v51  ;;  %854 = vmatmul.bf16.gmra.mxu3 %v10079_v51 }
 0x158   :  { %1308 = vmatpush.bf16.msrb.mxu0 %v9020_v22  ;;  %1375 = vmatpush.bf16.msrb.mxu1 %v9028_v23  ;;  %v9093_v22 = vld [vmem:[%s12413_s8 + $0x160] sm:$0xff] }
 0x159   :  { %1442 = vmatpush.bf16.msrb.mxu2 %v9036_v14  ;;  %1509 = vmatpush.bf16.msrb.mxu3 %v9044_v25  ;;  %v9101_v23 = vld [vmem:[%s12413_s8 + $0x1a0] sm:$0xff]  ;;  %v9084_v25 = vld [vmem:[%s12413_s8 + $0x118] sm:$0xff] }
 0x15a   :  { %v9109_v14 = vld [vmem:[%s12413_s8 + $0x1e0] sm:$0xff] }
 0x15c   :  { %1309 = vmatpush.bf16.msrb.mxu0 %v9019_v26  ;;  %1376 = vmatpush.bf16.msrb.mxu1 %v9027_v27  ;;  %v9092_v26 = vld [vmem:[%s12413_s8 + $0x158] sm:$0xff] }
 0x15d   :  { %1443 = vmatpush.bf16.msrb.mxu2 %v9035_v29  ;;  %1510 = vmatpush.bf16.msrb.mxu3 %v9043_v30  ;;  %v9100_v27 = vld [vmem:[%s12413_s8 + $0x198] sm:$0xff]  ;;  %v9083_v30 = vld [vmem:[%s12413_s8 + $0x110] sm:$0xff] }
 0x15e   :  { %v9108_v29 = vld [vmem:[%s12413_s8 + $0x1d8] sm:$0xff] }
 0x160   :  { %1310 = vmatpush.bf16.msrb.mxu0 %v9018_v15  ;;  %1377 = vmatpush.bf16.msrb.mxu1 %v9026_v31  ;;  %v9091_v15 = vld [vmem:[%s12413_s8 + $0x150] sm:$0xff] }
 0x161   :  { %1444 = vmatpush.bf16.msrb.mxu2 %v9034_v32  ;;  %1511 = vmatpush.bf16.msrb.mxu3 %v9042_v33  ;;  %v9099_v31 = vld [vmem:[%s12413_s8 + $0x190] sm:$0xff]  ;;  %v9082_v33 = vld [vmem:[%s12413_s8 + $0x108] sm:$0xff] }
 0x162   :  { %v9107_v32 = vld [vmem:[%s12413_s8 + $0x1d0] sm:$0xff] }
 0x164   :  { %1311 = vmatpush.bf16.msrb.mxu0 %v9017_v34  ;;  %1378 = vmatpush.bf16.msrb.mxu1 %v9025_v35  ;;  %v9090_v34 = vld [vmem:[%s12413_s8 + $0x148] sm:$0xff] }
 0x165   :  { %1445 = vmatpush.bf16.msrb.mxu2 %v9033_v36  ;;  %1512 = vmatpush.bf16.msrb.mxu3 %v9041_v37  ;;  %v9098_v35 = vld [vmem:[%s12413_s8 + $0x188] sm:$0xff]  ;;  %v9081_v37 = vld [vmem:[%s12413_s8 + $0x100] sm:$0xff] }
 0x166   :  { %1044 = vmatmul.bf16.vlgmr.msra.gmra.mxu0 %v10022_v28  ;;  %1111 = vmatmul.bf16.vlgmr.msra.gmra.mxu1 %v10022_v28  ;;  %v9106_v36 = vld [vmem:[%s12413_s8 + $0x1c8] sm:$0xff] }
 0x167   :  { %1178 = vmatmul.bf16.vlgmr.msra.gmra.mxu2 %v10022_v28  ;;  %1245 = vmatmul.bf16.vlgmr.msra.gmra.mxu3 %v10022_v28 }
 0x168   :  { %1700 = vmatpush.bf16.msra.mxu0 %v9056_v38  ;;  %1767 = vmatpush.bf16.msra.mxu1 %v9064_v39  ;;  %v9089_v38 = vld [vmem:[%s12413_s8 + $0x140] sm:$0xff] }
 0x169   :  { %1834 = vmatpush.bf16.msra.mxu2 %v9072_v40  ;;  %1901 = vmatpush.bf16.msra.mxu3 %v9080_v41  ;;  %v9097_v39 = vld [vmem:[%s12413_s8 + $0x180] sm:$0xff] }
 0x16c   :  { %1701 = vmatpush.bf16.msra.mxu0 %v9055_v42  ;;  %1768 = vmatpush.bf16.msra.mxu1 %v9063_v43  ;;  %v9105_v42 = vld [vmem:[%s12413_s8 + $0x1c0] sm:$0xff] }
 0x16d   :  { %1835 = vmatpush.bf16.msra.mxu2 %v9071_v44  ;;  %1902 = vmatpush.bf16.msra.mxu3 %v9079_v45 }
 0x170   :  { %1702 = vmatpush.bf16.msra.mxu0 %v9054_v46  ;;  %1769 = vmatpush.bf16.msra.mxu1 %v9062_v47 }
 0x171   :  { %1836 = vmatpush.bf16.msra.mxu2 %v9070_v48  ;;  %1903 = vmatpush.bf16.msra.mxu3 %v9078_v49 }
 0x174   :  { %1703 = vmatpush.bf16.msra.mxu0 %v9053_v50  ;;  %1770 = vmatpush.bf16.msra.mxu1 %v9061_v52 }
 0x175   :  { %1837 = vmatpush.bf16.msra.mxu2 %v9069_v16  ;;  %1904 = vmatpush.bf16.msra.mxu3 %v9077_v53 }
 0x176   :  { %1049 = vmatmul.bf16.gmra.mxu0 %v10079_v51  ;;  %1116 = vmatmul.bf16.gmra.mxu1 %v10079_v51 }
 0x177   :  { %1183 = vmatmul.bf16.gmra.mxu2 %v10079_v51  ;;  %1250 = vmatmul.bf16.gmra.mxu3 %v10079_v51 }
 0x178   :  { %1704 = vmatpush.bf16.msra.mxu0 %v9052_v54  ;;  %1771 = vmatpush.bf16.msra.mxu1 %v9060_v55 }
 0x179   :  { %1838 = vmatpush.bf16.msra.mxu2 %v9068_v56  ;;  %1905 = vmatpush.bf16.msra.mxu3 %v9076_v57 }
 0x17c   :  { %1705 = vmatpush.bf16.msra.mxu0 %v9051_v59  ;;  %1772 = vmatpush.bf16.msra.mxu1 %v9059_v60 }
 0x17d   :  { %1839 = vmatpush.bf16.msra.mxu2 %v9067_v61  ;;  %1906 = vmatpush.bf16.msra.mxu3 %v9075_v62 }
 0x180   :  { %1706 = vmatpush.bf16.msra.mxu0 %v9050_v63  ;;  %1773 = vmatpush.bf16.msra.mxu1 %v9058_v0 }
 0x181   :  { %1840 = vmatpush.bf16.msra.mxu2 %v9066_v1  ;;  %1907 = vmatpush.bf16.msra.mxu3 %v9074_v2 }
 0x184   :  { %1707 = vmatpush.bf16.msra.mxu0 %v9049_v58  ;;  %1774 = vmatpush.bf16.msra.mxu1 %v9057_v3 }
 0x185   :  { %1841 = vmatpush.bf16.msra.mxu2 %v9065_v4  ;;  %1908 = vmatpush.bf16.msra.mxu3 %v9073_v5 }
 0x186   :  { %1312 = vmatmul.bf16.vlgmr.msrb.gmra.mxu0 %v10022_v28  ;;  %1379 = vmatmul.bf16.vlgmr.msrb.gmra.mxu1 %v10022_v28 }
 0x187   :  { %1446 = vmatmul.bf16.vlgmr.msrb.gmra.mxu2 %v10022_v28  ;;  %1513 = vmatmul.bf16.vlgmr.msrb.gmra.mxu3 %v10022_v28 }
 0x188   :  { %1968 = vmatpush.bf16.msrb.mxu0 %v9088_v7  ;;  %2035 = vmatpush.bf16.msrb.mxu1 %v9096_v6 }
 0x189   :  { %2102 = vmatpush.bf16.msrb.mxu2 %v9104_v8  ;;  %2169 = vmatpush.bf16.msrb.mxu3 %v9112_v24 }
 0x18c   :  { %1969 = vmatpush.bf16.msrb.mxu0 %v9087_v9  ;;  %2036 = vmatpush.bf16.msrb.mxu1 %v9095_v11 }
 0x18d   :  { %2103 = vmatpush.bf16.msrb.mxu2 %v9103_v12  ;;  %2170 = vmatpush.bf16.msrb.mxu3 %v9111_v13 }
 0x190   :  { %1970 = vmatpush.bf16.msrb.mxu0 %v9086_v17  ;;  %2037 = vmatpush.bf16.msrb.mxu1 %v9094_v18 }
 0x191   :  { %2104 = vmatpush.bf16.msrb.mxu2 %v9102_v19  ;;  %2171 = vmatpush.bf16.msrb.mxu3 %v9110_v20 }
 0x194   :  { %1971 = vmatpush.bf16.msrb.mxu0 %v9085_v21  ;;  %2038 = vmatpush.bf16.msrb.mxu1 %v9093_v22 }
 0x195   :  { %2105 = vmatpush.bf16.msrb.mxu2 %v9101_v23  ;;  %2172 = vmatpush.bf16.msrb.mxu3 %v9109_v14 }
 0x196   :  { %1317 = vmatmul.bf16.gmra.mxu0 %v10079_v51  ;;  %1384 = vmatmul.bf16.gmra.mxu1 %v10079_v51 }
 0x197   :  { %1451 = vmatmul.bf16.gmra.mxu2 %v10079_v51  ;;  %1518 = vmatmul.bf16.gmra.mxu3 %v10079_v51 }
 0x198   :  { %1972 = vmatpush.bf16.msrb.mxu0 %v9084_v25  ;;  %2039 = vmatpush.bf16.msrb.mxu1 %v9092_v26 }
 0x199   :  { %2106 = vmatpush.bf16.msrb.mxu2 %v9100_v27  ;;  %2173 = vmatpush.bf16.msrb.mxu3 %v9108_v29 }
 0x19c   :  { %1973 = vmatpush.bf16.msrb.mxu0 %v9083_v30  ;;  %2040 = vmatpush.bf16.msrb.mxu1 %v9091_v15 }
 0x19d   :  { %2107 = vmatpush.bf16.msrb.mxu2 %v9099_v31  ;;  %2174 = vmatpush.bf16.msrb.mxu3 %v9107_v32 }
 0x1a0   :  { %1974 = vmatpush.bf16.msrb.mxu0 %v9082_v33  ;;  %2041 = vmatpush.bf16.msrb.mxu1 %v9090_v34 }
 0x1a1   :  { %2108 = vmatpush.bf16.msrb.mxu2 %v9098_v35  ;;  %2175 = vmatpush.bf16.msrb.mxu3 %v9106_v36 }
 0x1a3   :  { %v10442_v40 = vpop.f32.mrf.mxu0  ;;  %v10444_v41 = vpop.f32.mrf.mxu1 }
 0x1a4   :  { %1975 = vmatpush.bf16.msrb.mxu0 %v9081_v37  ;;  %2042 = vmatpush.bf16.msrb.mxu1 %v9089_v38 }
 0x1a5   :  { %2109 = vmatpush.bf16.msrb.mxu2 %v9097_v39  ;;  %2176 = vmatpush.bf16.msrb.mxu3 %v9105_v42 }
 0x1a6   :  { %1708 = vmatmul.bf16.vlgmr.msra.gmra.mxu0 %v10022_v28  ;;  %1775 = vmatmul.bf16.vlgmr.msra.gmra.mxu1 %v10022_v28 }
 0x1a7   :  { %1842 = vmatmul.bf16.vlgmr.msra.gmra.mxu2 %v10022_v28  ;;  %1909 = vmatmul.bf16.vlgmr.msra.gmra.mxu3 %v10022_v28 }
 0x1aa   :  { %v10453_v43 = vpop.f32.mrf.mxu2  ;;  %v10455_v44 = vpop.f32.mrf.mxu3 }
 0x1ab   :  { %v10457_v45 = vpop.f32.mrf.mxu0  ;;  %v10459_v46 = vpop.f32.mrf.mxu1 }
 0x1b2   :  { %v10461_v47 = vpop.f32.mrf.mxu2  ;;  %v10463_v48 = vpop.f32.mrf.mxu3 }
 0x1b3   :  { %v10465_v49 = vpop.f32.mrf.mxu0  ;;  %v10467_v50 = vpop.f32.mrf.mxu1 }
 0x1b6   :  { %1713 = vmatmul.bf16.gmra.mxu0 %v10079_v51  ;;  %1780 = vmatmul.bf16.gmra.mxu1 %v10079_v51 }
 0x1b7   :  { %1847 = vmatmul.bf16.gmra.mxu2 %v10079_v51  ;;  %1914 = vmatmul.bf16.gmra.mxu3 %v10079_v51 }
 0x1ba   :  { %v10473_v52 = vpop.f32.mrf.mxu2  ;;  %v10475_v16 = vpop.f32.mrf.mxu3 }
 0x1bb   :  { %v10477_v53 = vpop.f32.mrf.mxu0  ;;  %v10479_v54 = vpop.f32.mrf.mxu1 }
 0x1c2   :  { %v10481_v55 = vpop.f32.mrf.mxu2  ;;  %v10483_v56 = vpop.f32.mrf.mxu3 }
 0x1c3   :  { %v10485_v57 = vpop.f32.mrf.mxu0  ;;  %v10487_v59 = vpop.f32.mrf.mxu1 }
 0x1c6   :  { %1976 = vmatmul.bf16.vlgmr.msrb.gmra.mxu0 %v10022_v28  ;;  %2043 = vmatmul.bf16.vlgmr.msrb.gmra.mxu1 %v10022_v28 }
 0x1c7   :  { %2110 = vmatmul.bf16.vlgmr.msrb.gmra.mxu2 %v10022_v28  ;;  %2177 = vmatmul.bf16.vlgmr.msrb.gmra.mxu3 %v10022_v28 }
 0x1ca   :  { %v10493_v60 = vpop.f32.mrf.mxu2  ;;  %v10495_v61 = vpop.f32.mrf.mxu3 }
 0x1cb   :  { %v10497_v62 = vpop.f32.mrf.mxu0  ;;  %v10499_v63 = vpop.f32.mrf.mxu1 }
 0x1d2   :  { %v10501_v0 = vpop.f32.mrf.mxu2  ;;  %v10503_v1 = vpop.f32.mrf.mxu3 }
 0x1d3   :  { %v10505_v2 = vpop.f32.mrf.mxu0  ;;  %v10507_v58 = vpop.f32.mrf.mxu1 }
 0x1d6   :  { %1981 = vmatmul.bf16.gmra.mxu0 %v10079_v51  ;;  %2048 = vmatmul.bf16.gmra.mxu1 %v10079_v51 }
 0x1d7   :  { %2115 = vmatmul.bf16.gmra.mxu2 %v10079_v51  ;;  %2182 = vmatmul.bf16.gmra.mxu3 %v10079_v51 }
 0x1da   :  { %v10513_v28 = vpop.f32.mrf.mxu2  ;;  %v10515_v3 = vpop.f32.mrf.mxu3 }
 0x1db   :  { %v10517_v4 = vpop.f32.mrf.mxu0  ;;  %v10519_v5 = vpop.f32.mrf.mxu1 }
 0x1e2   :  { %v10521_v7 = vpop.f32.mrf.mxu2  ;;  %v10523_v6 = vpop.f32.mrf.mxu3 }
 0x1e3   :  { %v1045_v8 = vpop.f32.mrf.mxu0  ;;  %v1112_v24 = vpop.f32.mrf.mxu1 }
 0x1e4   :  { %v2220_v34 = vpack.c.bf16 %v1045_v8, %v1045_v8  ;;  %v2224_v37 = vpack.c.bf16 %v1112_v24, %v1112_v24 }
 0x1e6   :  { %v2266_v8 = vunpack.c.l.b16 %v2220_v34  ;;  %v2318_v24 = vunpack.c.l.b16 %v2224_v37 }
 0x1ea   :  { %v10525_v9 = vpop.f32.mrf.mxu2  ;;  %v10527_v11 = vpop.f32.mrf.mxu3 }
 0x1eb   :  { %v1047_v12 = vpop.f32.mrf.mxu0  ;;  %v1114_v51 = vpop.f32.mrf.mxu1  ;;  %v2232_v37 = vpack.c.bf16 %v10527_v11, %v10527_v11 }
 0x1ec   :  { %v2221_v29 = vpack.c.bf16 %v1047_v12, %v1047_v12  ;;  %v2225_v33 = vpack.c.bf16 %v1114_v51, %v1114_v51 }
 0x1ee   :  { %v2267_v38 = vunpack.c.l.b16 %v2221_v29  ;;  %v2319_v12 = vunpack.c.l.b16 %v2225_v33 }
 0x1f0   :  { %v2270_v29 = vpack.c.b16 %v2267_v38, %v2266_v8 }
 0x1f2   :  { %v10529_v13 = vpop.f32.mrf.mxu2  ;;  %v10531_v17 = vpop.f32.mrf.mxu3 }
 0x1f3   :  { %v1050_v18 = vpop.f32.mrf.mxu0  ;;  %v1117_v19 = vpop.f32.mrf.mxu1 }
 0x1f4   :  { %v2222_v20 = vpack.c.bf16 %v1050_v18, %v1050_v18  ;;  %v2226_v21 = vpack.c.bf16 %v1117_v19, %v1117_v19 }
 0x1f6   :  { %v2268_v30 = vunpack.c.l.b16 %v2222_v20  ;;  %v2320_v15 = vunpack.c.l.b16 %v2226_v21 }
 0x1fa   :  { %v1184_v22 = vpop.f32.mrf.mxu2  ;;  %v1251_v23 = vpop.f32.mrf.mxu3 }
 0x1fb   :  { %v1052_v14 = vpop.f32.mrf.mxu0  ;;  %v1119_v25 = vpop.f32.mrf.mxu1  ;;  %v2230_v39 = vpack.c.bf16 %v1184_v22, %v1184_v22  ;;  %v2234_v42 = vpack.c.bf16 %v1251_v23, %v1251_v23 }
 0x1fc   :  { %v2223_v26 = vpack.c.bf16 %v1052_v14, %v1052_v14  ;;  %v2227_v27 = vpack.c.bf16 %v1119_v25, %v1119_v25 }
 0x1fe   :  { %v2269_v31 = vunpack.c.l.b16 %v2223_v26  ;;  %v2321_v32 = vunpack.c.l.b16 %v2227_v27  ;;  %v2371_v26 = vunpack.c.l.b16 %v2230_v39  ;;  %v2422_v27 = vunpack.c.l.b16 %v2234_v42 }
 0x200   :  { %v2271_v35 = vpack.c.b16 %v2269_v31, %v2268_v30  ;;  %v2323_v36 = vpack.c.b16 %v2321_v32, %v2320_v15  ;;  %v2189_v30 = vpack.c.bf16 %v10457_v45, %v10457_v45  ;;  %v2191_v15 = vpack.c.bf16 %v10477_v53, %v10477_v53 }
 0x201   :  { %v2322_v31 = vpack.c.b16 %v2319_v12, %v2318_v24  ;;  %v2229_v32 = vpack.c.bf16 %v10529_v13, %v10529_v13  ;;  %v2193_v45 = vpack.c.bf16 %v10459_v46, %v10459_v46  ;;  %v2195_v53 = vpack.c.bf16 %v10479_v54, %v10479_v54 }
 0x202   :  { %v1186_v18 = vpop.f32.mrf.mxu2  ;;  %v1253_v19 = vpop.f32.mrf.mxu3  ;;  %v2283_v10 = vsel %vm2272_vm13, %v2271_v35, 0  ;;  %v2334_v14 = vsel %vm2272_vm13, %v2323_v36, 0  ;;  %v2188_v35 = vpack.c.bf16 %v10442_v40, %v10442_v40  ;;  %v2192_v36 = vpack.c.bf16 %v10444_v41, %v10444_v41 }
 0x203   :  { %v2231_v20 = vpack.c.bf16 %v1186_v18, %v1186_v18  ;;  %v2235_v21 = vpack.c.bf16 %v1253_v19, %v1253_v19  ;;  %v10535_v25 = vpop.f32.mrf.mxu0  ;;  %v10537_v51 = vpop.f32.mrf.mxu1  ;;  %2291 = vmatpush.bf16.xpose.msra.mxu0 %v2283_v10  ;;  %9269 = vmatpush.bf16.xpose.msra.mxu2 %v2283_v10  ;;  %v2233_v10 = vpack.c.bf16 %v10531_v17, %v10531_v17  ;;  %v2280_v41 = vsel %vm2272_vm13, %v2270_v29, 0 }
 0x204   :  { %2342 = vmatpush.bf16.xpose.msra.mxu1 %v2334_v14  ;;  %9271 = vmatpush.bf16.xpose.msra.mxu3 %v2334_v14  ;;  %v2190_v13 = vpack.c.bf16 %v10465_v49, %v10465_v49  ;;  %v2228_v17 = vpack.c.bf16 %v10525_v9, %v10525_v9  ;;  %v2257_v39 = vunpack.c.l.b16 %v2189_v30  ;;  %v2194_v46 = vpack.c.bf16 %v10467_v50, %v10467_v50 }
 0x205   :  { %v2372_v22 = vunpack.c.l.b16 %v2231_v20  ;;  %v2423_v23 = vunpack.c.l.b16 %v2235_v21  ;;  %v2259_v54 = vunpack.c.l.b16 %v2191_v15  ;;  %v2331_v9 = vsel %vm2272_vm13, %v2322_v31, 0 }
 0x206   :  { %v2370_v11 = vunpack.c.l.b16 %v2229_v32  ;;  %v2421_v18 = vunpack.c.l.b16 %v2233_v10  ;;  %v2309_v12 = vunpack.c.l.b16 %v2193_v45  ;;  %v2311_v20 = vunpack.c.l.b16 %v2195_v53 }
 0x207   :  { %v2374_v33 = vpack.c.b16 %v2372_v22, %v2371_v26  ;;  %v2425_v34 = vpack.c.b16 %v2423_v23, %v2422_v27  ;;  %v2256_v50 = vunpack.c.l.b16 %v2188_v35  ;;  %v2258_v21 = vunpack.c.l.b16 %v2190_v13 }
 0x208   :  { %v2369_v8 = vunpack.c.l.b16 %v2228_v17  ;;  %v2420_v24 = vunpack.c.l.b16 %v2232_v37  ;;  %v2308_v22 = vunpack.c.l.b16 %v2192_v36  ;;  %v2310_v23 = vunpack.c.l.b16 %v2194_v46 }
 0x209   :  { %v2385_v19 = vsel %vm2272_vm13, %v2374_v33, 0  ;;  %v2436_v14 = vsel %vm2272_vm13, %v2425_v34, 0  ;;  %v2260_v26 = vpack.c.b16 %v2257_v39, %v2256_v50  ;;  %v2261_v27 = vpack.c.b16 %v2259_v54, %v2258_v21 }
 0x20a   :  { %v10561_v38 = vpop.f32.mrf.mxu2  ;;  %v10563_v40 = vpop.f32.mrf.mxu3  ;;  %v2373_v29 = vpack.c.b16 %v2370_v11, %v2369_v8  ;;  %v2424_v30 = vpack.c.b16 %v2421_v18, %v2420_v24  ;;  %v2312_v15 = vpack.c.b16 %v2309_v12, %v2308_v22  ;;  %v2313_v31 = vpack.c.b16 %v2311_v20, %v2310_v23 }
 0x20b   :  { %v10568_v42 = vpop.f32.mrf.mxu0  ;;  %v10570_v49 = vpop.f32.mrf.mxu1  ;;  %2292 = vmatpush.bf16.xpose.msra.mxu0 %v2280_v41  ;;  %9270 = vmatpush.bf16.xpose.msra.mxu2 %v2280_v41  ;;  %v2197_v45 = vpack.c.bf16 %v10461_v47, %v10461_v47  ;;  %v2196_v53 = vpack.c.bf16 %v10453_v43, %v10453_v43  ;;  %v2201_v13 = vpack.c.bf16 %v10463_v48, %v10463_v48 }
 0x20c   :  { %2343 = vmatpush.bf16.xpose.msra.mxu1 %v2331_v9  ;;  %9272 = vmatpush.bf16.xpose.msra.mxu3 %v2331_v9  ;;  %v2382_v35 = vsel %vm2272_vm13, %v2373_v29, 0  ;;  %v2433_v36 = vsel %vm2272_vm13, %v2424_v30, 0  ;;  %v2200_v46 = vpack.c.bf16 %v10455_v44, %v10455_v44  ;;  %v2237_v43 = vpack.c.bf16 %v10568_v42, %v10568_v42 }
 0x20d   :  { %v2360_v54 = vunpack.c.l.b16 %v2197_v45  ;;  %v2411_v47 = vunpack.c.l.b16 %v2201_v13  ;;  %v2241_v24 = vpack.c.bf16 %v10570_v49, %v10570_v49  ;;  %v2236_v44 = vpack.c.bf16 %v10535_v25, %v10535_v25 }
 0x20e   :  { %v2410_v21 = vunpack.c.l.b16 %v2200_v46  ;;  %v2240_v22 = vpack.c.bf16 %v10537_v51, %v10537_v51  ;;  %v2472_v30 = vunpack.c.l.b16 %v2237_v43 }
 0x20f   :  { %v2471_v45 = vunpack.c.l.b16 %v2236_v44 }
 0x212   :  { %v10575_v32 = vpop.f32.mrf.mxu2  ;;  %v10577_v10 = vpop.f32.mrf.mxu3  ;;  %8179 = vmatmul.msk.bf16.vlgmr.msra.gmra.mxu0 %vm2272_vm13, %v2260_v26  ;;  %8180 = vmatmul.msk.bf16.vlgmr.msra.gmra.mxu2 %vm2272_vm13, %v2261_v27  ;;  %v2414_v27 = vpack.c.b16 %v2411_v47, %v2410_v21  ;;  %v2202_v21 = vpack.c.bf16 %v10475_v16, %v10475_v16 }
 0x213   :  { %2393 = vmatpush.bf16.xpose.msrb.mxu2 %v2385_v19  ;;  %8181 = vmatmul.msk.bf16.vlgmr.msra.gmra.mxu1 %vm2272_vm13, %v2312_v15  ;;  %v1318_v33 = vpop.f32.mrf.mxu0  ;;  %v1385_v34 = vpop.f32.mrf.mxu1  ;;  %v2245_v13 = vpack.c.bf16 %v10575_v32, %v10575_v32  ;;  %v2199_v32 = vpack.c.bf16 %v10481_v55, %v10481_v55 }
 0x214   :  { %2444 = vmatpush.bf16.xpose.msrb.mxu3 %v2436_v14  ;;  %v2238_v17 = vpack.c.bf16 %v1318_v33, %v1318_v33  ;;  %v2242_v37 = vpack.c.bf16 %v1385_v34, %v1385_v34  ;;  %v2359_v14 = vunpack.c.l.b16 %v2196_v53  ;;  %v2523_v34 = vunpack.c.l.b16 %v2241_v24 }
 0x215   :  { %8182 = vmatmul.msk.bf16.vlgmr.msra.gmra.mxu3 %vm2272_vm13, %v2313_v31  ;;  %v2522_v53 = vunpack.c.l.b16 %v2240_v22  ;;  %v2574_v47 = vunpack.c.l.b16 %v2245_v13  ;;  %v2208_v22 = vpack.c.bf16 %v10487_v59, %v10487_v59 }
 0x216   :  { %v2473_v12 = vunpack.c.l.b16 %v2238_v17  ;;  %v2524_v20 = vunpack.c.l.b16 %v2242_v37  ;;  %v2363_v8 = vpack.c.b16 %v2360_v54, %v2359_v14  ;;  %v2249_v17 = vpack.c.bf16 %v10577_v10, %v10577_v10 }
 0x217   :  { %v2244_v54 = vpack.c.bf16 %v10561_v38, %v10561_v38  ;;  %v2526_v14 = vpack.c.b16 %v2523_v34, %v2522_v53  ;;  %v2203_v10 = vpack.c.bf16 %v10483_v56, %v10483_v56  ;;  %v2198_v38 = vpack.c.bf16 %v10473_v52, %v10473_v52 }
 0x218   :  { %v2625_v43 = vunpack.c.l.b16 %v2249_v17 }
 0x21a   :  { %v1452_v41 = vpop.f32.mrf.mxu2  ;;  %v1519_v39 = vpop.f32.mrf.mxu3 }
 0x21b   :  { %2394 = vmatpush.bf16.xpose.msrb.mxu2 %v2382_v35  ;;  %v1320_v9 = vpop.f32.mrf.mxu0  ;;  %v1387_v11 = vpop.f32.mrf.mxu1  ;;  %v2246_v29 = vpack.c.bf16 %v1452_v41, %v1452_v41  ;;  %v2250_v42 = vpack.c.bf16 %v1519_v39, %v1519_v39 }
 0x21c   :  { %2445 = vmatpush.bf16.xpose.msrb.mxu3 %v2433_v36  ;;  %v2239_v18 = vpack.c.bf16 %v1320_v9, %v1320_v9  ;;  %v2243_v19 = vpack.c.bf16 %v1387_v11, %v1387_v11  ;;  %v2475_v9 = vpack.c.b16 %v2472_v30, %v2471_v45  ;;  %v2248_v11 = vpack.c.bf16 %v10563_v40, %v10563_v40 }
 0x21d   :  { %v2575_v37 = vunpack.c.l.b16 %v2246_v29  ;;  %v2626_v41 = vunpack.c.l.b16 %v2250_v42  ;;  %v2205_v40 = vpack.c.bf16 %v10497_v62, %v10497_v62  ;;  %v2535_v62 = vsel %vm2272_vm13, %v2526_v14, 0 }
 0x21e   :  { %v2474_v48 = vunpack.c.l.b16 %v2239_v18  ;;  %v2525_v50 = vunpack.c.l.b16 %v2243_v19  ;;  %v2484_v56 = vsel %vm2272_vm13, %v2475_v9, 0  ;;  %v2624_v24 = vunpack.c.l.b16 %v2248_v11 }
 0x21f   :  { %v2462_v29 = vunpack.c.l.b16 %v2205_v40  ;;  %v2361_v30 = vunpack.c.l.b16 %v2198_v38  ;;  %v2211_v9 = vpack.c.bf16 %v10519_v5, %v10519_v5 }
 0x220   :  { %v2476_v23 = vpack.c.b16 %v2474_v48, %v2473_v12  ;;  %v2527_v26 = vpack.c.b16 %v2525_v50, %v2524_v20  ;;  %v2209_v48 = vpack.c.bf16 %v10499_v63, %v10499_v63  ;;  %v2204_v63 = vpack.c.bf16 %v10485_v57, %v10485_v57 }
 0x221   :  { %v2628_v16 = vpack.c.b16 %v2625_v43, %v2624_v24  ;;  %v2515_v40 = vunpack.c.l.b16 %v2211_v9  ;;  %v2215_v9 = vpack.c.bf16 %v10521_v7, %v10521_v7 }
 0x222   :  { %v1454_v15 = vpop.f32.mrf.mxu2  ;;  %v1521_v31 = vpop.f32.mrf.mxu3  ;;  %8183 = vmatmul.msk.bf16.vlgmr.msrb.gmra.mxu2 %vm2272_vm13, %v2363_v8  ;;  %v2487_v33 = vsel %vm2272_vm13, %v2476_v23, 0  ;;  %v2538_v49 = vsel %vm2272_vm13, %v2527_v26, 0  ;;  %v2573_v8 = vunpack.c.l.b16 %v2244_v54  ;;  %v2362_v23 = vunpack.c.l.b16 %v2199_v32 }
 0x223   :  { %v2247_v35 = vpack.c.bf16 %v1454_v15, %v1454_v15  ;;  %v2251_v25 = vpack.c.bf16 %v1521_v31, %v1521_v31  ;;  %v10605_v51 = vpop.f32.mrf.mxu0  ;;  %v10607_v36 = vpop.f32.mrf.mxu1  ;;  %2495 = vmatpush.bf16.xpose.msrb.mxu0 %v2487_v33  ;;  %2546 = vmatpush.bf16.xpose.msrb.mxu1 %v2538_v49  ;;  %v2413_v26 = vunpack.c.l.b16 %v2203_v10  ;;  %v2513_v42 = vunpack.c.l.b16 %v2209_v48 }
 0x224   :  { %v2412_v15 = vunpack.c.l.b16 %v2202_v21  ;;  %v2461_v31 = vunpack.c.l.b16 %v2204_v63  ;;  %v2512_v33 = vunpack.c.l.b16 %v2208_v22  ;;  %v2364_v49 = vpack.c.b16 %v2362_v23, %v2361_v30 }
 0x225   :  { %8185 = vmatmul.msk.bf16.vlgmr.msrb.gmra.mxu3 %vm2272_vm13, %v2414_v27  ;;  %v2576_v39 = vunpack.c.l.b16 %v2247_v35  ;;  %v2627_v46 = vunpack.c.l.b16 %v2251_v25  ;;  %v2577_v27 = vpack.c.b16 %v2574_v47, %v2573_v8  ;;  %v2637_v57 = vsel %vm2272_vm13, %v2628_v16, 0 }
 0x226   :  { %v2415_v34 = vpack.c.b16 %v2413_v26, %v2412_v15  ;;  %v2465_v25 = vpack.c.b16 %v2462_v29, %v2461_v31  ;;  %v2516_v45 = vpack.c.b16 %v2513_v42, %v2512_v33  ;;  %v2207_v54 = vpack.c.bf16 %v10517_v4, %v10517_v4 }
 0x227   :  { %v2578_v18 = vpack.c.b16 %v2576_v39, %v2575_v37  ;;  %v2629_v19 = vpack.c.b16 %v2627_v46, %v2626_v41  ;;  %v2586_v35 = vsel %vm2272_vm13, %v2577_v27, 0  ;;  %v2212_v37 = vpack.c.bf16 %v10493_v60, %v10493_v60 }
 0x228   :  { %v2216_v41 = vpack.c.bf16 %v10495_v61, %v10495_v61  ;;  %v2213_v39 = vpack.c.bf16 %v10501_v0, %v10501_v0  ;;  %v2217_v46 = vpack.c.bf16 %v10503_v1, %v10503_v1  ;;  %v2206_v0 = vpack.c.bf16 %v10505_v2, %v10505_v2 }
 0x229   :  { %v2589_v12 = vsel %vm2272_vm13, %v2578_v18, 0  ;;  %v2640_v20 = vsel %vm2272_vm13, %v2629_v19, 0  ;;  %v2563_v11 = vunpack.c.l.b16 %v2212_v37  ;;  %v2210_v1 = vpack.c.bf16 %v10507_v58, %v10507_v58 }
 0x22a   :  { %v10629_v50 = vpop.f32.mrf.mxu2  ;;  %v10631_v55 = vpop.f32.mrf.mxu3  ;;  %2597 = vmatpush.bf16.xpose.msra.mxu2 %v2589_v12  ;;  %2648 = vmatpush.bf16.xpose.msra.mxu3 %v2640_v20  ;;  %v2614_v18 = vunpack.c.l.b16 %v2216_v41  ;;  %v2564_v10 = vunpack.c.l.b16 %v2213_v39  ;;  %v2615_v61 = vunpack.c.l.b16 %v2217_v46  ;;  %v2464_v38 = vunpack.c.l.b16 %v2207_v54 }
 0x22b   :  { %v10636_v52 = vpop.f32.mrf.mxu0  ;;  %v10638_v44 = vpop.f32.mrf.mxu1  ;;  %2496 = vmatpush.bf16.xpose.msrb.mxu0 %v2484_v56  ;;  %2547 = vmatpush.bf16.xpose.msrb.mxu1 %v2535_v62  ;;  %v3110_v48 = vpack.c.bf16 %v10605_v51, %v10605_v51  ;;  %v3114_v2 = vpack.c.bf16 %v10607_v36, %v10607_v36  ;;  %v2514_v63 = vunpack.c.l.b16 %v2210_v1  ;;  %v3118_v36 = vpack.c.bf16 %v10629_v50, %v10629_v50 }
 0x22c   :  { %v3111_v4 = vpack.c.bf16 %v10636_v52, %v10636_v52  ;;  %v3115_v5 = vpack.c.bf16 %v10638_v44, %v10638_v44  ;;  %v2567_v24 = vpack.c.b16 %v2564_v10, %v2563_v11  ;;  %v2618_v62 = vpack.c.b16 %v2615_v61, %v2614_v18 }
 0x22d   :  { %v2463_v52 = vunpack.c.l.b16 %v2206_v0  ;;  %v2517_v16 = vpack.c.b16 %v2515_v40, %v2514_v63  ;;  %v3156_v51 = vunpack.c.l.b16 %v3110_v48  ;;  %v3203_v30 = vunpack.c.l.b16 %v3114_v2 }
 0x22e   :  { %v3157_v22 = vunpack.c.l.b16 %v3111_v4  ;;  %v3204_v44 = vunpack.c.l.b16 %v3115_v5  ;;  %v3122_v50 = vpack.c.bf16 %v10631_v55, %v10631_v55  ;;  %v2219_v55 = vpack.c.bf16 %v10523_v6, %v10523_v6 }
 0x22f   :  { %v2466_v27 = vpack.c.b16 %v2464_v38, %v2463_v52  ;;  %v3250_v11 = vunpack.c.l.b16 %v3118_v36  ;;  %v2566_v1 = vunpack.c.l.b16 %v2215_v9 }
 0x230   :  { %v3297_v18 = vunpack.c.l.b16 %v3122_v50  ;;  %v2617_v6 = vunpack.c.l.b16 %v2219_v55 }
 0x232   :  { %v10647_v59 = vpop.f32.mrf.mxu2  ;;  %v10649_v53 = vpop.f32.mrf.mxu3  ;;  %2598 = vmatpush.bf16.xpose.msra.mxu2 %v2586_v35  ;;  %2649 = vmatpush.bf16.xpose.msra.mxu3 %v2637_v57 }
 0x233   :  { %8184 = vmatmul.msk.bf16.gmra.mxu2 %vm2272_vm13, %v2364_v49  ;;  %v1714_v13 = vpop.f32.mrf.mxu0  ;;  %v1781_v17 = vpop.f32.mrf.mxu1  ;;  %8187 = vmatmul.msk.bf16.vlgmr.msrb.gmra.mxu0 %vm2272_vm13, %v2465_v25  ;;  %v3119_v15 = vpack.c.bf16 %v10647_v59, %v10647_v59  ;;  %v3123_v49 = vpack.c.bf16 %v10649_v53, %v10649_v53  ;;  %v3207_v59 = vpack.c.b16 %v3204_v44, %v3203_v30 }
 0x234   :  { %8189 = vmatmul.msk.bf16.vlgmr.msrb.gmra.mxu1 %vm2272_vm13, %v2516_v45  ;;  %v3112_v19 = vpack.c.bf16 %v1714_v13, %v1714_v13  ;;  %v3116_v14 = vpack.c.bf16 %v1781_v17, %v1781_v17  ;;  %v3160_v45 = vpack.c.b16 %v3157_v22, %v3156_v51 }
 0x235   :  { %8186 = vmatmul.msk.bf16.gmra.mxu3 %vm2272_vm13, %v2415_v34  ;;  %v3251_v41 = vunpack.c.l.b16 %v3119_v15  ;;  %v3298_v39 = vunpack.c.l.b16 %v3123_v49 }
 0x236   :  { %v3158_v56 = vunpack.c.l.b16 %v3112_v19  ;;  %v3205_v58 = vunpack.c.l.b16 %v3116_v14 }
 0x237   :  { %v3254_v7 = vpack.c.b16 %v3251_v41, %v3250_v11  ;;  %v3301_v0 = vpack.c.b16 %v3298_v39, %v3297_v18 }
 0x23a   :  { %v1848_v60 = vpop.f32.mrf.mxu2  ;;  %v1915_v32 = vpop.f32.mrf.mxu3 }
 0x23b   :  { %v1716_v47 = vpop.f32.mrf.mxu0  ;;  %v1783_v43 = vpop.f32.mrf.mxu1  ;;  %v3120_v29 = vpack.c.bf16 %v1848_v60, %v1848_v60  ;;  %v3124_v42 = vpack.c.bf16 %v1915_v32, %v1915_v32  ;;  %v2214_v60 = vpack.c.bf16 %v10513_v28, %v10513_v28  ;;  %v2218_v32 = vpack.c.bf16 %v10515_v3, %v10515_v3 }
 0x23c   :  { %v3113_v12 = vpack.c.bf16 %v1716_v47, %v1716_v47  ;;  %v3117_v20 = vpack.c.bf16 %v1783_v43, %v1783_v43 }
 0x23d   :  { %v3252_v53 = vunpack.c.l.b16 %v3120_v29  ;;  %v3299_v13 = vunpack.c.l.b16 %v3124_v42  ;;  %v2565_v47 = vunpack.c.l.b16 %v2214_v60  ;;  %v2616_v43 = vunpack.c.l.b16 %v2218_v32 }
 0x23e   :  { %v3159_v21 = vunpack.c.l.b16 %v3113_v12  ;;  %v3206_v8 = vunpack.c.l.b16 %v3117_v20 }
 0x23f   :  { %v2568_v4 = vpack.c.b16 %v2566_v1, %v2565_v47  ;;  %v2619_v5 = vpack.c.b16 %v2617_v6, %v2616_v43 }
 0x240   :  { %v3161_v23 = vpack.c.b16 %v3159_v21, %v3158_v56  ;;  %v3208_v26 = vpack.c.b16 %v3206_v8, %v3205_v58 }
 0x242   :  { %v1850_v31 = vpop.f32.mrf.mxu2  ;;  %v1917_v33 = vpop.f32.mrf.mxu3  ;;  %3176 = vmatpush.bf16.msra.mxu0 %v3161_v23  ;;  %3223 = vmatpush.bf16.msra.mxu1 %v3208_v26 }
 0x243   :  { %v3121_v34 = vpack.c.bf16 %v1850_v31, %v1850_v31  ;;  %v3125_v35 = vpack.c.bf16 %v1917_v33, %v1917_v33  ;;  %8191 = vmatmul.msk.bf16.vlgmr.msra.gmra.mxu2 %vm2272_vm13, %v2567_v24  ;;  %v10687_v57 = vpop.f32.mrf.mxu0  ;;  %v10689_v25 = vpop.f32.mrf.mxu1  ;;  %8188 = vmatmul.msk.bf16.gmra.mxu0 %vm2272_vm13, %v2466_v27 }
 0x244   :  { %8190 = vmatmul.msk.bf16.gmra.mxu1 %vm2272_vm13, %v2517_v16  ;;  %v3126_v52 = vpack.c.bf16 %v10687_v57, %v10687_v57  ;;  %v3130_v63 = vpack.c.bf16 %v10689_v25, %v10689_v25 }
 0x245   :  { %8193 = vmatmul.msk.bf16.vlgmr.msra.gmra.mxu3 %vm2272_vm13, %v2618_v62  ;;  %v3253_v17 = vunpack.c.l.b16 %v3121_v34  ;;  %v3300_v37 = vunpack.c.l.b16 %v3125_v35 }
 0x246   :  { %3177 = vmatpush.bf16.msra.mxu0 %v3160_v45  ;;  %3224 = vmatpush.bf16.msra.mxu1 %v3207_v59  ;;  %v3344_v36 = vunpack.c.l.b16 %v3126_v52  ;;  %v3391_v15 = vunpack.c.l.b16 %v3130_v63  ;;  %v10760_v52 = vld [vmem:[%s12446_s26 + $0x18] sm:$0xff] }
 0x247   :  { %v3255_v46 = vpack.c.b16 %v3253_v17, %v3252_v53  ;;  %v3302_v54 = vpack.c.b16 %v3300_v37, %v3299_v13 }
 0x249   :  { %3270 = vmatpush.bf16.msrb.mxu2 %v3255_v46  ;;  %3317 = vmatpush.bf16.msrb.mxu3 %v3302_v54 }
 0x24a   :  { %v10699_v19 = vpop.f32.mrf.mxu2  ;;  %v10701_v14 = vpop.f32.mrf.mxu3 }
 0x24b   :  { %v1979_v10 = vpop.f32.mrf.mxu0  ;;  %v2046_v61 = vpop.f32.mrf.mxu1  ;;  %v3134_v25 = vpack.c.bf16 %v10699_v19, %v10699_v19  ;;  %v3138_v50 = vpack.c.bf16 %v10701_v14, %v10701_v14  ;;  %v10720_v14 = vld [vmem:[%s12446_s26] sm:$0xff] }
 0x24c   :  { %v3127_v21 = vpack.c.bf16 %v1979_v10, %v1979_v10  ;;  %v3131_v8 = vpack.c.bf16 %v2046_v61, %v2046_v61 }
 0x24d   :  { %3271 = vmatpush.bf16.msrb.mxu2 %v3254_v7  ;;  %3318 = vmatpush.bf16.msrb.mxu3 %v3301_v0  ;;  %v3438_v9 = vunpack.c.l.b16 %v3134_v25  ;;  %v3485_v55 = vunpack.c.l.b16 %v3138_v50 }
 0x24e   :  { %v3345_v27 = vunpack.c.l.b16 %v3127_v21  ;;  %v3392_v16 = vunpack.c.l.b16 %v3131_v8 }
 0x250   :  { %v3348_v45 = vpack.c.b16 %v3345_v27, %v3344_v36  ;;  %v3395_v59 = vpack.c.b16 %v3392_v16, %v3391_v15 }
 0x252   :  { %v2113_v12 = vpop.f32.mrf.mxu2  ;;  %v2180_v20 = vpop.f32.mrf.mxu3 }
 0x253   :  { %8192 = vmatmul.msk.bf16.gmra.mxu2 %vm2272_vm13, %v2568_v4  ;;  %v1982_v28 = vpop.f32.mrf.mxu0  ;;  %v2049_v3 = vpop.f32.mrf.mxu1  ;;  %v3135_v49 = vpack.c.bf16 %v2113_v12, %v2113_v12  ;;  %v3139_v34 = vpack.c.bf16 %v2180_v20, %v2180_v20  ;;  %v10735_v4 = vld [vmem:[%s12446_s26 + $0x10] sm:$0xff] }
 0x254   :  { %v3128_v38 = vpack.c.bf16 %v1982_v28, %v1982_v28  ;;  %v3132_v40 = vpack.c.bf16 %v2049_v3, %v2049_v3  ;;  %v10740_v28 = vld [vmem:[%s12446_s26 + $0x8] sm:$0xff] }
 0x255   :  { %8194 = vmatmul.msk.bf16.gmra.mxu3 %vm2272_vm13, %v2619_v5  ;;  %v3439_v41 = vunpack.c.l.b16 %v3135_v49  ;;  %v3486_v39 = vunpack.c.l.b16 %v3139_v34 }
 0x256   :  { %v3346_v22 = vunpack.c.l.b16 %v3128_v38  ;;  %v3393_v44 = vunpack.c.l.b16 %v3132_v40 }
 0x257   :  { %v3442_v11 = vpack.c.b16 %v3439_v41, %v3438_v9  ;;  %v3489_v18 = vpack.c.b16 %v3486_v39, %v3485_v55 }
 0x25a   :  { %v2116_v48 = vpop.f32.mrf.mxu2  ;;  %v2183_v2 = vpop.f32.mrf.mxu3 }
 0x25b   :  { %v1984_v56 = vpop.f32.mrf.mxu0  ;;  %v2051_v58 = vpop.f32.mrf.mxu1  ;;  %v3136_v51 = vpack.c.bf16 %v2116_v48, %v2116_v48  ;;  %v3140_v30 = vpack.c.bf16 %v2183_v2, %v2183_v2 }
 0x25c   :  { %v3129_v24 = vpack.c.bf16 %v1984_v56, %v1984_v56  ;;  %v3133_v62 = vpack.c.bf16 %v2051_v58, %v2051_v58 }
 0x25d   :  { %v3440_v53 = vunpack.c.l.b16 %v3136_v51  ;;  %v3487_v13 = vunpack.c.l.b16 %v3140_v30 }
 0x25e   :  { %v3347_v23 = vunpack.c.l.b16 %v3129_v24  ;;  %v3394_v26 = vunpack.c.l.b16 %v3133_v62 }
 0x260   :  { %v3349_v29 = vpack.c.b16 %v3347_v23, %v3346_v22  ;;  %v3396_v42 = vpack.c.b16 %v3394_v26, %v3393_v44 }
 0x262   :  { %v2118_v31 = vpop.f32.mrf.mxu2  ;;  %v2185_v33 = vpop.f32.mrf.mxu3  ;;  %3364 = vmatpush.bf16.msrb.mxu0 %v3349_v29  ;;  %3411 = vmatpush.bf16.msrb.mxu1 %v3396_v42 }
 0x263   :  { %v3137_v35 = vpack.c.bf16 %v2118_v31, %v2118_v31  ;;  %v3141_v57 = vpack.c.bf16 %v2185_v33, %v2185_v33 }
 0x265   :  { %v3441_v17 = vunpack.c.l.b16 %v3137_v35  ;;  %v3488_v37 = vunpack.c.l.b16 %v3141_v57 }
 0x266   :  { %3365 = vmatpush.bf16.msrb.mxu0 %v3348_v45  ;;  %3412 = vmatpush.bf16.msrb.mxu1 %v3395_v59 }
 0x267   :  { %v3443_v46 = vpack.c.b16 %v3441_v17, %v3440_v53  ;;  %v3490_v54 = vpack.c.b16 %v3488_v37, %v3487_v13 }
 0x269   :  { %3458 = vmatpush.bf16.msra.mxu2 %v3443_v46  ;;  %3505 = vmatpush.bf16.msra.mxu3 %v3490_v54 }
 0x26d   :  { %3459 = vmatpush.bf16.msra.mxu2 %v3442_v11  ;;  %3506 = vmatpush.bf16.msra.mxu3 %v3489_v18 }
 0x28f   :  { %v2294_v19 = vpop.f32.mrf.mxu0 }
 0x290   :  { %v2661_v60 = vmul.f32 0.25, %v2294_v19  ;;  %v2345_v32 = vpop.f32.mrf.mxu1 }
 0x291   :  { %v2665_v10 = vmul.f32 0.25, %v2345_v32 }
 0x292   :  { %v10723_v61 = vadd.f32 %v2661_v60, %v10720_v14 }
 0x293   :  { %v10726_v7 = vadd.f32 %v2665_v10, %v10720_v14 }
 0x294   :  { %v2726_v0 = vsel %vm2725_vm14, %v10723_v61, -inf }
 0x295   :  { %v2738_v1 = vsel %vm2725_vm14, %v10726_v7, -inf  ;;  %v2299_v6 = vpop.f32.mrf.mxu2  ;;  %2727 = vmax.xlane.f32.xlu0 %v2726_v0 }
 0x296   :  { %2739 = vmax.xlane.f32.xlu2 %v2738_v1  ;;  %v2663_v43 = vmul.f32 0.25, %v2299_v6 }
 0x297   :  { %v2296_v12 = vpop.f32.mrf.mxu0 }
 0x298   :  { %v2350_v47 = vpop.f32.mrf.mxu3  ;;  %v2347_v20 = vpop.f32.mrf.mxu1  ;;  %v10746_v40 = vadd.f32 %v2663_v43, %v10735_v4  ;;  %v2662_v48 = vmul.f32 0.25, %v2296_v12 }
 0x299   :  { %v2667_v5 = vmul.f32 0.25, %v2350_v47  ;;  %v2666_v3 = vmul.f32 0.25, %v2347_v20 }
 0x29a   :  { %v2732_v58 = vsel %vm2725_vm14, %v10746_v40, -inf  ;;  %v10763_v22 = vadd.f32 %v2662_v48, %v10740_v28 }
 0x29b   :  { %v10743_v38 = vadd.f32 %v2667_v5, %v10735_v4  ;;  %v10751_v56 = vadd.f32 %v2666_v3, %v10740_v28 }
 0x29c   :  { %v2729_v26 = vsel %vm2725_vm14, %v10763_v22, -inf }
 0x29d   :  { %v2744_v2 = vsel %vm2725_vm14, %v10743_v38, -inf  ;;  %v2301_v21 = vpop.f32.mrf.mxu2  ;;  %v2741_v8 = vsel %vm2725_vm14, %v10751_v56, -inf }
 0x29e   :  { %2745 = vmax.xlane.f32.xlu1 %v2744_v2  ;;  %2733 = vmax.xlane.f32.xlu2 %v2732_v58  ;;  %v2664_v62 = vmul.f32 0.25, %v2301_v21 }
 0x29f   :  { %2742 = vmax.xlane.f32.xlu0 %v2741_v8 }
 0x2a0   :  { %v2352_v24 = vpop.f32.mrf.mxu3  ;;  %v10769_v23 = vadd.f32 %v2664_v62, %v10760_v52 }
 0x2a1   :  { %v2668_v63 = vmul.f32 0.25, %v2352_v24 }
 0x2a2   :  { %v2735_v29 = vsel %vm2725_vm14, %v10769_v23, -inf }
 0x2a3   :  { %v10766_v44 = vadd.f32 %v2668_v63, %v10760_v52 }
 0x2a5   :  { %v2747_v27 = vsel %vm2725_vm14, %v10766_v44, -inf  ;;  %v2396_v16 = vpop.f32.mrf.mxu2 }
 0x2a6   :  { %2730 = vmax.xlane.f32.xlu1 %v2729_v26  ;;  %2748 = vmax.xlane.f32.xlu2 %v2747_v27  ;;  %v2669_v51 = vmul.f32 0.25, %v2396_v16 }
 0x2a7   :  { %2736 = vmax.xlane.f32.xlu0 %v2735_v29 }
 0x2a8   :  { %v2447_v42 = vpop.f32.mrf.mxu3  ;;  %v10781_v15 = vadd.f32 %v2669_v51, %v10720_v14 }
 0x2a9   :  { %v2673_v30 = vmul.f32 0.25, %v2447_v42 }
 0x2aa   :  { %v2750_v33 = vsel %vm2725_vm14, %v10781_v15, -inf }
 0x2ab   :  { %v10778_v36 = vadd.f32 %v2673_v30, %v10720_v14 }
 0x2ad   :  { %v2762_v31 = vsel %vm2725_vm14, %v10778_v36, -inf  ;;  %v2398_v49 = vpop.f32.mrf.mxu2 }
 0x2ae   :  { %2763 = vmax.xlane.f32.xlu1 %v2762_v31  ;;  %2751 = vmax.xlane.f32.xlu2 %v2750_v33  ;;  %v2670_v35 = vmul.f32 0.25, %v2398_v49 }
 0x2b0   :  { %v2449_v34 = vpop.f32.mrf.mxu3  ;;  %v10788_v25 = vadd.f32 %v2670_v35, %v10740_v28  ;;  %v2498_v50 = vpop.f32.mrf.mxu0 }
 0x2b1   :  { %v2674_v57 = vmul.f32 0.25, %v2449_v34  ;;  %v2549_v45 = vpop.f32.mrf.mxu1  ;;  %v2677_v53 = vmul.f32 0.25, %v2498_v50 }
 0x2b2   :  { %v2681_v13 = vmul.f32 0.25, %v2549_v45  ;;  %v2753_v17 = vsel %vm2725_vm14, %v10788_v25, -inf }
 0x2b3   :  { %v10791_v59 = vadd.f32 %v2674_v57, %v10740_v28  ;;  %2754 = vmax.xlane.f32.xlu0 %v2753_v17  ;;  %v10796_v37 = vadd.f32 %v2677_v53, %v10720_v14 }
 0x2b4   :  { %v10803_v9 = vadd.f32 %v2681_v13, %v10720_v14 }
 0x2b5   :  { %v2765_v41 = vsel %vm2725_vm14, %v10791_v59, -inf  ;;  %v2774_v54 = vsel %vm2725_vm14, %v10796_v37, -inf }
 0x2b6   :  { %2766 = vmax.xlane.f32.xlu2 %v2765_v41  ;;  %v2401_v46 = vpop.f32.mrf.mxu2  ;;  %2775 = vmax.xlane.f32.xlu1 %v2774_v54  ;;  %v2786_v32 = vsel %vm2725_vm14, %v10803_v9, -inf }
 0x2b7   :  { %v2671_v55 = vmul.f32 0.25, %v2401_v46 }
 0x2b8   :  { %v2452_v39 = vpop.f32.mrf.mxu3  ;;  %v2500_v11 = vpop.f32.mrf.mxu0 }
 0x2b9   :  { %v2551_v18 = vpop.f32.mrf.mxu1  ;;  %v2675_v19 = vmul.f32 0.25, %v2452_v39  ;;  %v2678_v60 = vmul.f32 0.25, %v2500_v11  ;;  %v10808_v10 = vadd.f32 %v2671_v55, %v10735_v4 }
 0x2ba   :  { %v2682_v1 = vmul.f32 0.25, %v2551_v18 }
 0x2bb   :  { %2787 = vmax.xlane.f32.xlu0 %v2786_v32  ;;  %v10811_v0 = vadd.f32 %v2678_v60, %v10740_v28  ;;  %v2756_v43 = vsel %vm2725_vm14, %v10808_v10, -inf  ;;  %v10818_v12 = vadd.f32 %v2675_v19, %v10735_v4 }
 0x2bc   :  { %v10823_v21 = vadd.f32 %v2682_v1, %v10740_v28 }
 0x2bd   :  { %v2777_v5 = vsel %vm2725_vm14, %v10811_v0, -inf  ;;  %v2768_v58 = vsel %vm2725_vm14, %v10818_v12, -inf }
 0x2be   :  { %v2403_v6 = vpop.f32.mrf.mxu2  ;;  %2757 = vmax.xlane.f32.xlu1 %v2756_v43  ;;  %2778 = vmax.xlane.f32.xlu2 %v2777_v5  ;;  %v2789_v26 = vsel %vm2725_vm14, %v10823_v21, -inf }
 0x2bf   :  { %v2672_v20 = vmul.f32 0.25, %v2403_v6 }
 0x2c0   :  { %v2454_v47 = vpop.f32.mrf.mxu3  ;;  %v2503_v3 = vpop.f32.mrf.mxu0 }
 0x2c1   :  { %v2554_v48 = vpop.f32.mrf.mxu1  ;;  %v10826_v8 = vadd.f32 %v2672_v20, %v10760_v52  ;;  %v2676_v24 = vmul.f32 0.25, %v2454_v47  ;;  %v2679_v49 = vmul.f32 0.25, %v2503_v3 }
 0x2c2   :  { %v2683_v2 = vmul.f32 0.25, %v2554_v48 }
 0x2c3   :  { %2769 = vmax.xlane.f32.xlu0 %v2768_v58  ;;  %v2759_v27 = vsel %vm2725_vm14, %v10826_v8, -inf  ;;  %v10838_v30 = vadd.f32 %v2676_v24, %v10760_v52  ;;  %v10853_v41 = vadd.f32 %v2679_v49, %v10735_v4 }
 0x2c4   :  { %v10833_v16 = vadd.f32 %v2683_v2, %v10735_v4 }
 0x2c5   :  { %v2771_v50 = vsel %vm2725_vm14, %v10838_v30, -inf }
 0x2c6   :  { %v2600_v62 = vpop.f32.mrf.mxu2  ;;  %2790 = vmax.xlane.f32.xlu1 %v2789_v26  ;;  %2760 = vmax.xlane.f32.xlu2 %v2759_v27  ;;  %v2792_v51 = vsel %vm2725_vm14, %v10833_v16, -inf }
 0x2c7   :  { %v2685_v42 = vmul.f32 0.25, %v2600_v62 }
 0x2c8   :  { %v2651_v63 = vpop.f32.mrf.mxu3  ;;  %v2505_v33 = vpop.f32.mrf.mxu0 }
 0x2c9   :  { %v2689_v29 = vmul.f32 0.25, %v2651_v63  ;;  %v2680_v34 = vmul.f32 0.25, %v2505_v33  ;;  %v10848_v53 = vadd.f32 %v2685_v42, %v10720_v14  ;;  %v2556_v46 = vpop.f32.mrf.mxu1 }
 0x2ca   :  { %v2684_v54 = vmul.f32 0.25, %v2556_v46 }
 0x2cb   :  { %v10841_v31 = vadd.f32 %v2689_v29, %v10720_v14  ;;  %2793 = vmax.xlane.f32.xlu0 %v2792_v51  ;;  %v2798_v17 = vsel %vm2725_vm14, %v10848_v53, -inf  ;;  %v10856_v39 = vadd.f32 %v2680_v34, %v10760_v52  ;;  %v2780_v14 = vsel %vm2725_vm14, %v10853_v41, -inf }
 0x2cc   :  { %v10868_v1 = vadd.f32 %v2684_v54, %v10760_v52 }
 0x2cd   :  { %v2810_v45 = vsel %vm2725_vm14, %v10841_v31, -inf  ;;  %v2783_v18 = vsel %vm2725_vm14, %v10856_v39, -inf }
 0x2ce   :  { %v2602_v35 = vpop.f32.mrf.mxu2  ;;  %2772 = vmax.xlane.f32.xlu1 %v2771_v50  ;;  %2811 = vmax.xlane.f32.xlu2 %v2810_v45  ;;  %v2795_v20 = vsel %vm2725_vm14, %v10868_v1, -inf }
 0x2cf   :  { %v2686_v47 = vmul.f32 0.25, %v2602_v35 }
 0x2d0   :  { %v2653_v57 = vpop.f32.mrf.mxu3 }
 0x2d1   :  { %v2690_v13 = vmul.f32 0.25, %v2653_v57  ;;  %v10881_v24 = vadd.f32 %v2686_v47, %v10740_v28 }
 0x2d3   :  { %2799 = vmax.xlane.f32.xlu0 %v2798_v17  ;;  %v10863_v19 = vadd.f32 %v2690_v13, %v10740_v28  ;;  %v2801_v27 = vsel %vm2725_vm14, %v10881_v24, -inf }
 0x2d5   :  { %v2813_v32 = vsel %vm2725_vm14, %v10863_v19, -inf }
 0x2d6   :  { %v2605_v55 = vpop.f32.mrf.mxu2  ;;  %2781 = vmax.xlane.f32.xlu1 %v2780_v14  ;;  %2784 = vmax.xlane.f32.xlu2 %v2783_v18 }
 0x2d7   :  { %v2687_v60 = vmul.f32 0.25, %v2605_v55 }
 0x2d8   :  { %v2656_v11 = vpop.f32.mrf.mxu3 }
 0x2d9   :  { %v10871_v6 = vadd.f32 %v2687_v60, %v10735_v4  ;;  %v2691_v26 = vmul.f32 0.25, %v2656_v11 }
 0x2db   :  { %2814 = vmax.xlane.f32.xlu0 %v2813_v32  ;;  %v2804_v3 = vsel %vm2725_vm14, %v10871_v6, -inf  ;;  %v10893_v42 = vadd.f32 %v2691_v26, %v10735_v4 }
 0x2dd   :  { %v2816_v28 = vsel %vm2725_vm14, %v10893_v42, -inf }
 0x2de   :  { %v2607_v43 = vpop.f32.mrf.mxu2  ;;  %2796 = vmax.xlane.f32.xlu1 %v2795_v20  ;;  %2805 = vmax.xlane.f32.xlu2 %v2804_v3 }
 0x2df   :  { %v2688_v48 = vmul.f32 0.25, %v2607_v43 }
 0x2e0   :  { %v2658_v5 = vpop.f32.mrf.mxu3 }
 0x2e1   :  { %v2692_v2 = vmul.f32 0.25, %v2658_v5  ;;  %v10878_v58 = vadd.f32 %v2688_v48, %v10760_v52 }
 0x2e3   :  { %v10884_v62 = vadd.f32 %v2692_v2, %v10760_v52  ;;  %v2807_v63 = vsel %vm2725_vm14, %v10878_v58, -inf }
 0x2e4   :  { %2808 = vmax.xlane.f32.xlu0 %v2807_v63 }
 0x2e5   :  { %v2819_v29 = vsel %vm2725_vm14, %v10884_v62, -inf }
 0x2e6   :  { %2802 = vmax.xlane.f32.xlu1 %v2801_v27  ;;  %2820 = vmax.xlane.f32.xlu2 %v2819_v29 }
 0x2ee   :  { %2817 = vmax.xlane.f32.xlu1 %v2816_v28 }
 0x308   :  { %v2728_v52 = vpop.xlane.xlu0 %2727 }
 0x309   :  { %v2740_v51 = vpop.xlane.xlu2 %2739  ;;  %v2822_v33 = vsub.f32 %v10723_v61, %v2728_v52 }
 0x30a   :  { %v2826_v49 = vsub.f32 %v10726_v7, %v2740_v51 }
 0x30b   :  { %v2854_v34 = vmul.f32 1.442695, %v2822_v33 }
 0x30c   :  { %v2862_v35 = vmul.f32 1.442695, %v2826_v49 }
 0x30d   :  { %9294 = vpow2.f32 %v2854_v34 }
 0x30e   :  { %9296 = vpow2.f32 %v2862_v35 }
 0x311   :  { %v2746_v57 = vpop.xlane.xlu1 %2745  ;;  %v2734_v50 = vpop.xlane.xlu2 %2733 }
 0x312   :  { %v2743_v45 = vpop.xlane.xlu0 %2742  ;;  %v2828_v2 = vsub.f32 %v10743_v38, %v2746_v57  ;;  %v2824_v28 = vsub.f32 %v10746_v40, %v2734_v50 }
 0x313   :  { %v2827_v4 = vsub.f32 %v10751_v56, %v2743_v45  ;;  %v10900_v13 = vpop.eup %9294 }
 0x314   :  { %v10902_v17 = vpop.eup %9296  ;;  %v2918_v54 = vsel %vm2725_vm14, %v10900_v13, 0.0  ;;  %v2866_v29 = vmul.f32 1.442695, %v2828_v2 }
 0x315   :  { %v2864_v46 = vmul.f32 1.442695, %v2827_v4  ;;  %v2930_v61 = vsel %vm2725_vm14, %v10902_v17, 0.0  ;;  %2919 = vadd.xlane.f32.xlu2 %v2918_v54 }
 0x316   :  { %2931 = vadd.xlane.f32.xlu1 %v2930_v61 }
 0x317   :  { %9298 = vpow2.f32 %v2864_v46 }
 0x319   :  { %v2731_v7 = vpop.xlane.xlu1 %2730  ;;  %v10909_v11 = vpop.xlane.xlu2 %2748 }
 0x31a   :  { %v2823_v55 = vsub.f32 %v10763_v22, %v2731_v7  ;;  %v2737_v18 = vpop.xlane.xlu0 %2736 }
 0x31b   :  { %v2825_v20 = vsub.f32 %v10769_v23, %v2737_v18 }
 0x31c   :  { %v2856_v56 = vmul.f32 1.442695, %v2823_v55 }
 0x31d   :  { %v10911_v14 = vpop.eup %9298  ;;  %v2860_v26 = vmul.f32 1.442695, %v2825_v20 }
 0x31e   :  { %9300 = vpow2.f32 %v2856_v56  ;;  %v2933_v60 = vsel %vm2725_vm14, %v10911_v14, 0.0 }
 0x31f   :  { %2934 = vadd.xlane.f32.xlu2 %v2933_v60 }
 0x321   :  { %v2764_v32 = vpop.xlane.xlu1 %2763  ;;  %v2752_v43 = vpop.xlane.xlu2 %2751 }
 0x322   :  { %v2834_v47 = vsub.f32 %v10778_v36, %v2764_v32  ;;  %v2830_v3 = vsub.f32 %v10781_v15, %v2752_v43 }
 0x324   :  { %v10916_v5 = vpop.eup %9300  ;;  %v2878_v22 = vmul.f32 1.442695, %v2834_v47  ;;  %v2870_v63 = vmul.f32 1.442695, %v2830_v3 }
 0x325   :  { %v2921_v48 = vsel %vm2725_vm14, %v10916_v5, 0.0 }
 0x326   :  { %9302 = vpow2.f32 %v2878_v22  ;;  %2922 = vadd.xlane.f32.xlu0 %v2921_v48  ;;  %v2755_v27 = vpop.xlane.xlu0 %2754 }
 0x327   :  { %9304 = vpow2.f32 %v2870_v63  ;;  %v2831_v36 = vsub.f32 %v10788_v25, %v2755_v27  ;;  %v2858_v25 = vmul.f32 1.442695, %v2824_v28 }
 0x328   :  { %9306 = vpow2.f32 %v2860_v26 }
 0x329   :  { %v2872_v23 = vmul.f32 1.442695, %v2831_v36  ;;  %v2767_v52 = vpop.xlane.xlu2 %2766  ;;  %v10927_v15 = vpop.xlane.xlu1 %2775 }
 0x32a   :  { %v2835_v49 = vsub.f32 %v10791_v59, %v2767_v52 }
 0x32b   :  { %9308 = vpow2.f32 %v2872_v23 }
 0x32c   :  { %v10925_v51 = vpop.eup %9302  ;;  %9310 = vpow2.f32 %v2866_v29  ;;  %v2880_v57 = vmul.f32 1.442695, %v2835_v49 }
 0x32d   :  { %v2954_v38 = vsel %vm2725_vm14, %v10925_v51, 0.0  ;;  %v10931_v33 = vpop.eup %9304  ;;  %9312 = vpow2.f32 %v2858_v25 }
 0x32e   :  { %2955 = vadd.xlane.f32.xlu2 %v2954_v38  ;;  %v2942_v40 = vsel %vm2725_vm14, %v10931_v33, 0.0  ;;  %v2788_v34 = vpop.xlane.xlu0 %2787  ;;  %v10936_v35 = vpop.eup %9306  ;;  %9314 = vpow2.f32 %v2880_v57 }
 0x32f   :  { %2943 = vadd.xlane.f32.xlu0 %v2942_v40  ;;  %v2927_v54 = vsel %vm2725_vm14, %v10936_v35, 0.0  ;;  %v2842_v32 = vsub.f32 %v10803_v9, %v2788_v34  ;;  %v2829_v9 = vsub.f32 %v10766_v44, %v10909_v11  ;;  %v2838_v44 = vsub.f32 %v10796_v37, %v10927_v15 }
 0x331   :  { %v10938_v50 = vpop.eup %9308  ;;  %v2758_v4 = vpop.xlane.xlu1 %2757  ;;  %v2894_v48 = vmul.f32 1.442695, %v2842_v32  ;;  %v2886_v37 = vmul.f32 1.442695, %v2838_v44 }
 0x332   :  { %v10940_v45 = vpop.eup %9310  ;;  %v2779_v46 = vpop.xlane.xlu2 %2778  ;;  %v2945_v59 = vsel %vm2725_vm14, %v10938_v50, 0.0  ;;  %v2832_v61 = vsub.f32 %v10808_v10, %v2758_v4 }
 0x333   :  { %2946 = vadd.xlane.f32.xlu1 %v2945_v59  ;;  %v2936_v7 = vsel %vm2725_vm14, %v10940_v45, 0.0  ;;  %v10949_v56 = vpop.eup %9312  ;;  %v2839_v49 = vsub.f32 %v10811_v0, %v2779_v46 }
 0x334   :  { %v2874_v60 = vmul.f32 1.442695, %v2832_v61  ;;  %v10953_v43 = vpop.eup %9314  ;;  %v2924_v10 = vsel %vm2725_vm14, %v10949_v56, 0.0 }
 0x335   :  { %v2888_v57 = vmul.f32 1.442695, %v2839_v49 }
 0x336   :  { %2928 = vadd.xlane.f32.xlu2 %v2927_v54  ;;  %v2770_v55 = vpop.xlane.xlu0 %2769 }
 0x337   :  { %2937 = vadd.xlane.f32.xlu0 %v2936_v7  ;;  %v2836_v18 = vsub.f32 %v10818_v12, %v2770_v55  ;;  %v2957_v12 = vsel %vm2725_vm14, %v10953_v43, 0.0 }
 0x339   :  { %v2882_v47 = vmul.f32 1.442695, %v2836_v18  ;;  %v10955_v20 = vpop.xlane.xlu1 %2790 }
 0x33a   :  { %v2761_v22 = vpop.xlane.xlu2 %2760 }
 0x33b   :  { %9316 = vpow2.f32 %v2882_v47  ;;  %v2833_v3 = vsub.f32 %v10826_v8, %v2761_v22  ;;  %2925 = vadd.xlane.f32.xlu1 %v2924_v10  ;;  %v2868_v8 = vmul.f32 1.442695, %v2829_v9 }
 0x33c   :  { %9318 = vpow2.f32 %v2874_v60 }
 0x33d   :  { %v2876_v2 = vmul.f32 1.442695, %v2833_v3 }
 0x33e   :  { %v10964_v63 = vpop.xlane.xlu0 %2793 }
 0x33f   :  { %2958 = vadd.xlane.f32.xlu0 %v2957_v12  ;;  %9320 = vpow2.f32 %v2876_v2 }
 0x340   :  { %9322 = vpow2.f32 %v2894_v48 }
 0x341   :  { %v10966_v26 = vpop.eup %9316  ;;  %v2773_v36 = vpop.xlane.xlu1 %2772  ;;  %9324 = vpow2.f32 %v2868_v8 }
 0x342   :  { %v10968_v27 = vpop.eup %9318  ;;  %v2812_v29 = vpop.xlane.xlu2 %2811  ;;  %v2960_v28 = vsel %vm2725_vm14, %v10966_v26, 0.0  ;;  %v2837_v23 = vsub.f32 %v10838_v30, %v2773_v36 }
 0x343   :  { %2961 = vadd.xlane.f32.xlu2 %v2960_v28  ;;  %v2948_v52 = vsel %vm2725_vm14, %v10968_v27, 0.0 }
 0x344   :  { %v2884_v11 = vmul.f32 1.442695, %v2837_v23 }
 0x345   :  { %v10977_v38 = vpop.eup %9320 }
 0x346   :  { %v2800_v25 = vpop.xlane.xlu0 %2799  ;;  %v10980_v40 = vpop.eup %9322  ;;  %9326 = vpow2.f32 %v2884_v11  ;;  %v2951_v30 = vsel %vm2725_vm14, %v10977_v38, 0.0 }
 0x347   :  { %2949 = vadd.xlane.f32.xlu0 %v2948_v52  ;;  %v2846_v34 = vsub.f32 %v10848_v53, %v2800_v25  ;;  %2952 = vadd.xlane.f32.xlu1 %v2951_v30  ;;  %v2978_v0 = vsel %vm2725_vm14, %v10980_v40, 0.0  ;;  %v10989_v46 = vpop.eup %9324  ;;  %v2850_v53 = vsub.f32 %v10841_v31, %v2812_v29 }
 0x348   :  { %v2939_v55 = vsel %vm2725_vm14, %v10989_v46, 0.0 }
 0x349   :  { %v2902_v15 = vmul.f32 1.442695, %v2846_v34  ;;  %v2782_v4 = vpop.xlane.xlu1 %2781  ;;  %v2910_v47 = vmul.f32 1.442695, %v2850_v53  ;;  %v2844_v53 = vsub.f32 %v10833_v16, %v10964_v63 }
 0x34a   :  { %v10985_v59 = vpop.xlane.xlu2 %2784  ;;  %v2840_v29 = vsub.f32 %v10853_v41, %v2782_v4 }
 0x34b   :  { %9328 = vpow2.f32 %v2902_v15  ;;  %2979 = vadd.xlane.f32.xlu2 %v2978_v0  ;;  %v2841_v63 = vsub.f32 %v10856_v39, %v10985_v59 }
 0x34c   :  { %v10991_v54 = vpop.eup %9326  ;;  %9330 = vpow2.f32 %v2886_v37  ;;  %v2890_v30 = vmul.f32 1.442695, %v2840_v29 }
 0x34d   :  { %9332 = vpow2.f32 %v2888_v57  ;;  %v2963_v61 = vsel %vm2725_vm14, %v10991_v54, 0.0 }
 0x34e   :  { %v2815_v7 = vpop.xlane.xlu0 %2814 }
 0x34f   :  { %2964 = vadd.xlane.f32.xlu0 %v2963_v61  ;;  %v2851_v18 = vsub.f32 %v10863_v19, %v2815_v7  ;;  %2940 = vadd.xlane.f32.xlu1 %v2939_v55 }
 0x351   :  { %v10999_v60 = vpop.eup %9328  ;;  %v2912_v32 = vmul.f32 1.442695, %v2851_v18  ;;  %v2797_v22 = vpop.xlane.xlu1 %2796 }
 0x352   :  { %v2806_v10 = vpop.xlane.xlu2 %2805  ;;  %v2990_v31 = vsel %vm2725_vm14, %v10999_v60, 0.0  ;;  %v11003_v3 = vpop.eup %9330  ;;  %v2845_v15 = vsub.f32 %v10868_v1, %v2797_v22 }
 0x353   :  { %9334 = vpow2.f32 %v2912_v32  ;;  %2991 = vadd.xlane.f32.xlu2 %v2990_v31  ;;  %v11005_v48 = vpop.eup %9332  ;;  %v2848_v2 = vsub.f32 %v10871_v6, %v2806_v10  ;;  %v2966_v19 = vsel %vm2725_vm14, %v11003_v3, 0.0  ;;  %v2898_v32 = vmul.f32 1.442695, %v2844_v53 }
 0x354   :  { %9336 = vpow2.f32 %v2910_v47  ;;  %v2969_v12 = vsel %vm2725_vm14, %v11005_v48, 0.0  ;;  %v2900_v61 = vmul.f32 1.442695, %v2845_v15 }
 0x355   :  { %v2906_v28 = vmul.f32 1.442695, %v2848_v2  ;;  %v2892_v2 = vmul.f32 1.442695, %v2841_v63 }
 0x357   :  { %2967 = vadd.xlane.f32.xlu0 %v2966_v19  ;;  %v2809_v9 = vpop.xlane.xlu0 %2808  ;;  %2970 = vadd.xlane.f32.xlu1 %v2969_v12 }
 0x358   :  { %v2849_v8 = vsub.f32 %v10878_v58, %v2809_v9  ;;  %v2843_v58 = vsub.f32 %v10823_v21, %v10955_v20 }
 0x359   :  { %v11013_v36 = vpop.eup %9334  ;;  %v2803_v44 = vpop.xlane.xlu1 %2802 }
 0x35a   :  { %v2908_v23 = vmul.f32 1.442695, %v2849_v8  ;;  %v3005_v6 = vsel %vm2725_vm14, %v11013_v36, 0.0  ;;  %v2847_v11 = vsub.f32 %v10881_v24, %v2803_v44  ;;  %v2821_v52 = vpop.xlane.xlu2 %2820  ;;  %v11019_v49 = vpop.eup %9336  ;;  %v2896_v37 = vmul.f32 1.442695, %v2843_v58 }
 0x35b   :  { %3006 = vadd.xlane.f32.xlu2 %v3005_v6  ;;  %v2853_v41 = vsub.f32 %v10884_v62, %v2821_v52  ;;  %v3002_v34 = vsel %vm2725_vm14, %v11019_v49, 0.0 }
 0x35c   :  { %9338 = vpow2.f32 %v2908_v23  ;;  %v2904_v25 = vmul.f32 1.442695, %v2847_v11 }
 0x35d   :  { %9340 = vpow2.f32 %v2906_v28  ;;  %v2916_v57 = vmul.f32 1.442695, %v2853_v41 }
 0x35e   :  { %9342 = vpow2.f32 %v2904_v25 }
 0x35f   :  { %3003 = vadd.xlane.f32.xlu1 %v3002_v34  ;;  %9344 = vpow2.f32 %v2890_v30 }
 0x360   :  { %9346 = vpow2.f32 %v2896_v37 }
 0x361   :  { %v2818_v4 = vpop.xlane.xlu1 %2817  ;;  %9348 = vpow2.f32 %v2916_v57 }
 0x362   :  { %v11026_v24 = vpop.eup %9338  ;;  %v2852_v0 = vsub.f32 %v10893_v42, %v2818_v4  ;;  %9350 = vpow2.f32 %v2900_v61 }
 0x363   :  { %v2999_v21 = vsel %vm2725_vm14, %v11026_v24, 0.0  ;;  %v11031_v20 = vpop.eup %9340 }
 0x364   :  { %3000 = vadd.xlane.f32.xlu2 %v2999_v21  ;;  %v11033_v62 = vpop.eup %9342  ;;  %v2996_v7 = vsel %vm2725_vm14, %v11031_v20, 0.0  ;;  %v2914_v18 = vmul.f32 1.442695, %v2852_v0 }
 0x365   :  { %v2993_v1 = vsel %vm2725_vm14, %v11033_v62, 0.0  ;;  %v11042_v55 = vpop.eup %9344 }
 0x366   :  { %2994 = vadd.xlane.f32.xlu0 %v2993_v1  ;;  %v11044_v47 = vpop.eup %9346  ;;  %v2972_v16 = vsel %vm2725_vm14, %v11042_v55, 0.0  ;;  %9352 = vpow2.f32 %v2914_v18 }
 0x367   :  { %2997 = vadd.xlane.f32.xlu1 %v2996_v7  ;;  %v11048_v42 = vpop.eup %9348  ;;  %9354 = vpow2.f32 %v2898_v32  ;;  %v2981_v22 = vsel %vm2725_vm14, %v11044_v47, 0.0 }
 0x368   :  { %v3011_v10 = vsel %vm2725_vm14, %v11048_v42, 0.0  ;;  %v11056_v31 = vpop.eup %9350  ;;  %9356 = vpow2.f32 %v2892_v2 }
 0x369   :  { %v2987_v12 = vsel %vm2725_vm14, %v11056_v31, 0.0 }
 0x36c   :  { %2973 = vadd.xlane.f32.xlu2 %v2972_v16  ;;  %v11058_v19 = vpop.eup %9352 }
 0x36d   :  { %v11062_v9 = vpop.eup %9354  ;;  %v3008_v39 = vsel %vm2725_vm14, %v11058_v19, 0.0 }
 0x36e   :  { %2982 = vadd.xlane.f32.xlu0 %v2981_v22  ;;  %v2984_v59 = vsel %vm2725_vm14, %v11062_v9, 0.0  ;;  %v11068_v8 = vpop.eup %9356 }
 0x36f   :  { %3012 = vadd.xlane.f32.xlu1 %v3011_v10  ;;  %v2975_v29 = vsel %vm2725_vm14, %v11068_v8, 0.0 }
 0x374   :  { %2988 = vadd.xlane.f32.xlu2 %v2987_v12 }
 0x376   :  { %3009 = vadd.xlane.f32.xlu0 %v3008_v39 }
 0x377   :  { %2985 = vadd.xlane.f32.xlu1 %v2984_v59 }
 0x37e   :  { %2976 = vadd.xlane.f32.xlu0 %v2975_v29 }
 0x388   :  { %v2920_v28 = vpop.xlane.xlu2 %2919 }
 0x389   :  { %v2932_v23 = vpop.xlane.xlu1 %2931 }
 0x38a   :  { %9358 = vrcp.f32 %v2932_v23 }
 0x38b   :  { %9360 = vrcp.f32 %v2920_v28 }
 0x390   :  { %v9359_v6 = vpop.eup %9358 }
 0x391   :  { %v3050_v11 = vmul.f32 %v9359_v6, %v10902_v17  ;;  %v9361_v58 = vpop.eup %9360 }
 0x392   :  { %v2935_v44 = vpop.xlane.xlu2 %2934  ;;  %v3046_v34 = vmul.f32 %v9361_v58, %v10900_v13 }
 0x393   :  { %9362 = vrcp.f32 %v2935_v44  ;;  %v3082_v30 = vpack.c.bf16 %v3050_v11, %v3050_v11 }
 0x394   :  { %v3078_v21 = vpack.c.bf16 %v3046_v34, %v3046_v34 }
 0x395   :  { %v3193_v57 = vunpack.c.l.b16 %v3082_v30 }
 0x396   :  { %v3146_v7 = vunpack.c.l.b16 %v3078_v21 }
 0x399   :  { %v2923_v52 = vpop.xlane.xlu0 %2922  ;;  %v9363_v25 = vpop.eup %9362 }
 0x39a   :  { %9364 = vrcp.f32 %v2923_v52  ;;  %v3051_v41 = vmul.f32 %v9363_v25, %v10911_v14 }
 0x39c   :  { %v3083_v37 = vpack.c.bf16 %v3051_v41, %v3051_v41 }
 0x39e   :  { %v3194_v4 = vunpack.c.l.b16 %v3083_v37 }
 0x3a0   :  { %v9365_v15 = vpop.eup %9364  ;;  %v3197_v61 = vpack.c.b16 %v3194_v4, %v3193_v57 }
 0x3a1   :  { %v3047_v0 = vmul.f32 %v9365_v15, %v10916_v5  ;;  %v2956_v53 = vpop.xlane.xlu2 %2955 }
 0x3a2   :  { %v2944_v17 = vpop.xlane.xlu0 %2943  ;;  %8197 = vmatmul.msk.bf16.vlgmr.msra.gmra.mxu1 %vm2725_vm14, %v3197_v61 }
 0x3a3   :  { %v3079_v1 = vpack.c.bf16 %v3047_v0, %v3047_v0  ;;  %9366 = vrcp.f32 %v2944_v17 }
 0x3a5   :  { %v3147_v18 = vunpack.c.l.b16 %v3079_v1 }
 0x3a6   :  { %v2947_v14 = vpop.xlane.xlu1 %2946 }
 0x3a7   :  { %v3150_v32 = vpack.c.b16 %v3147_v18, %v3146_v7  ;;  %9368 = vrcp.f32 %v2947_v14 }
 0x3a9   :  { %8195 = vmatmul.msk.bf16.vlgmr.msra.gmra.mxu0 %vm2725_vm14, %v3150_v32  ;;  %v2929_v13 = vpop.xlane.xlu2 %2928  ;;  %v9367_v16 = vpop.eup %9366 }
 0x3aa   :  { %9370 = vrcp.f32 %v2929_v13  ;;  %v2938_v63 = vpop.xlane.xlu0 %2937  ;;  %v3054_v5 = vmul.f32 %v9367_v16, %v10931_v33 }
 0x3ab   :  { %9372 = vrcp.f32 %v2956_v53 }
 0x3ac   :  { %v3086_v10 = vpack.c.bf16 %v3054_v5, %v3054_v5 }
 0x3ad   :  { %v9369_v22 = vpop.eup %9368 }
 0x3ae   :  { %v3055_v2 = vmul.f32 %v9369_v22, %v10938_v50  ;;  %v2926_v12 = vpop.xlane.xlu1 %2925  ;;  %v3240_v23 = vunpack.c.l.b16 %v3086_v10 }
 0x3af   :  { %9374 = vrcp.f32 %v2926_v12 }
 0x3b0   :  { %v9371_v39 = vpop.eup %9370  ;;  %v3087_v59 = vpack.c.bf16 %v3055_v2, %v3055_v2 }
 0x3b1   :  { %v9373_v28 = vpop.eup %9372  ;;  %v3049_v6 = vmul.f32 %v9371_v39, %v10936_v35 }
 0x3b2   :  { %v2959_v29 = vpop.xlane.xlu0 %2958  ;;  %v3241_v44 = vunpack.c.l.b16 %v3087_v59  ;;  %v3058_v33 = vmul.f32 %v9373_v28, %v10925_v51 }
 0x3b3   :  { %9376 = vrcp.f32 %v2959_v29  ;;  %v3081_v58 = vpack.c.bf16 %v3049_v6, %v3049_v6 }
 0x3b4   :  { %v3244_v11 = vpack.c.b16 %v3241_v44, %v3240_v23  ;;  %v3090_v34 = vpack.c.bf16 %v3058_v33, %v3058_v33 }
 0x3b5   :  { %v9375_v52 = vpop.eup %9374  ;;  %v3149_v57 = vunpack.c.l.b16 %v3081_v58 }
 0x3b6   :  { %v3048_v25 = vmul.f32 %v9375_v52, %v10949_v56  ;;  %8199 = vmatmul.msk.bf16.vlgmr.msrb.gmra.mxu2 %vm2725_vm14, %v3244_v11  ;;  %v2962_v50 = vpop.xlane.xlu2 %2961  ;;  %v3287_v51 = vunpack.c.l.b16 %v3090_v34 }
 0x3b8   :  { %v3080_v41 = vpack.c.bf16 %v3048_v25, %v3048_v25 }
 0x3b9   :  { %v9377_v30 = vpop.eup %9376 }
 0x3ba   :  { %v3059_v37 = vmul.f32 %v9377_v30, %v10953_v43  ;;  %v2950_v15 = vpop.xlane.xlu0 %2949  ;;  %v3148_v4 = vunpack.c.l.b16 %v3080_v41  ;;  %v2953_v21 = vpop.xlane.xlu1 %2952 }
 0x3bb   :  { %9378 = vrcp.f32 %v2950_v15 }
 0x3bc   :  { %v3091_v35 = vpack.c.bf16 %v3059_v37, %v3059_v37  ;;  %9380 = vrcp.f32 %v2953_v21  ;;  %v3151_v0 = vpack.c.b16 %v3149_v57, %v3148_v4 }
 0x3bd   :  { %9382 = vrcp.f32 %v2962_v50 }
 0x3be   :  { %v3288_v53 = vunpack.c.l.b16 %v3091_v35  ;;  %9384 = vrcp.f32 %v2938_v63  ;;  %8196 = vmatmul.msk.bf16.gmra.mxu0 %vm2725_vm14, %v3151_v0  ;;  %v11086_v56 = vpop.xlane.xlu2 %2979 }
 0x3c0   :  { %v3291_v61 = vpack.c.b16 %v3288_v53, %v3287_v51 }
 0x3c1   :  { %v9379_v1 = vpop.eup %9378 }
 0x3c2   :  { %v3056_v43 = vmul.f32 %v9379_v1, %v10968_v27  ;;  %8201 = vmatmul.msk.bf16.vlgmr.msrb.gmra.mxu3 %vm2725_vm14, %v3291_v61  ;;  %v9381_v17 = vpop.eup %9380  ;;  %v2965_v7 = vpop.xlane.xlu0 %2964 }
 0x3c3   :  { %v9383_v18 = vpop.eup %9382  ;;  %v3057_v14 = vmul.f32 %v9381_v17, %v10977_v38  ;;  %9386 = vrcp.f32 %v2965_v7  ;;  %v2941_v13 = vpop.xlane.xlu1 %2940 }
 0x3c4   :  { %v3088_v32 = vpack.c.bf16 %v3056_v43, %v3056_v43  ;;  %v9385_v16 = vpop.eup %9384  ;;  %9388 = vrcp.f32 %v2941_v13  ;;  %v3060_v22 = vmul.f32 %v9383_v18, %v10966_v26 }
 0x3c5   :  { %v3089_v5 = vpack.c.bf16 %v3057_v14, %v3057_v14  ;;  %v3052_v2 = vmul.f32 %v9385_v16, %v10940_v45 }
 0x3c6   :  { %v3242_v63 = vunpack.c.l.b16 %v3088_v32  ;;  %v2992_v10 = vpop.xlane.xlu2 %2991  ;;  %v3092_v29 = vpack.c.bf16 %v3060_v22, %v3060_v22 }
 0x3c7   :  { %v3243_v27 = vunpack.c.l.b16 %v3089_v5  ;;  %v3084_v38 = vpack.c.bf16 %v3052_v2, %v3052_v2 }
 0x3c8   :  { %v3289_v52 = vunpack.c.l.b16 %v3092_v29 }
 0x3c9   :  { %v9387_v12 = vpop.eup %9386  ;;  %v3245_v39 = vpack.c.b16 %v3243_v27, %v3242_v63  ;;  %v3195_v58 = vunpack.c.l.b16 %v3084_v38 }
 0x3ca   :  { %v9389_v59 = vpop.eup %9388  ;;  %v3061_v28 = vmul.f32 %v9387_v12, %v10991_v54  ;;  %v2968_v23 = vpop.xlane.xlu0 %2967 }
 0x3cb   :  { %v3053_v44 = vmul.f32 %v9389_v59, %v10989_v46  ;;  %9390 = vrcp.f32 %v2968_v23  ;;  %8200 = vmatmul.msk.bf16.gmra.mxu2 %vm2725_vm14, %v3245_v39  ;;  %v2971_v6 = vpop.xlane.xlu1 %2970 }
 0x3cc   :  { %v3093_v11 = vpack.c.bf16 %v3061_v28, %v3061_v28  ;;  %9392 = vrcp.f32 %v2971_v6 }
 0x3cd   :  { %v3085_v26 = vpack.c.bf16 %v3053_v44, %v3053_v44 }
 0x3ce   :  { %v3290_v45 = vunpack.c.l.b16 %v3093_v11  ;;  %v3007_v33 = vpop.xlane.xlu2 %3006 }
 0x3cf   :  { %v3196_v25 = vunpack.c.l.b16 %v3085_v26  ;;  %9394 = vrcp.f32 %v3007_v33 }
 0x3d0   :  { %v3292_v50 = vpack.c.b16 %v3290_v45, %v3289_v52 }
 0x3d1   :  { %v9391_v30 = vpop.eup %9390  ;;  %v3198_v54 = vpack.c.b16 %v3196_v25, %v3195_v58 }
 0x3d2   :  { %v9393_v41 = vpop.eup %9392  ;;  %v3062_v34 = vmul.f32 %v9391_v30, %v11003_v3  ;;  %8202 = vmatmul.msk.bf16.gmra.mxu3 %vm2725_vm14, %v3292_v50 }
 0x3d3   :  { %v3063_v46 = vmul.f32 %v9393_v41, %v11005_v48  ;;  %v3004_v37 = vpop.xlane.xlu1 %3003  ;;  %8198 = vmatmul.msk.bf16.gmra.mxu1 %vm2725_vm14, %v3198_v54 }
 0x3d4   :  { %v3094_v15 = vpack.c.bf16 %v3062_v34, %v3062_v34  ;;  %9396 = vrcp.f32 %v3004_v37 }
 0x3d5   :  { %v9395_v57 = vpop.eup %9394  ;;  %9398 = vrcp.f32 %v2992_v10  ;;  %v3095_v4 = vpack.c.bf16 %v3063_v46, %v3063_v46 }
 0x3d6   :  { %v3334_v35 = vunpack.c.l.b16 %v3094_v15  ;;  %v3075_v0 = vmul.f32 %v9395_v57, %v11013_v36 }
 0x3d7   :  { %v3335_v21 = vunpack.c.l.b16 %v3095_v4  ;;  %v3001_v51 = vpop.xlane.xlu2 %3000 }
 0x3d8   :  { %v3107_v43 = vpack.c.bf16 %v3075_v0, %v3075_v0 }
 0x3d9   :  { %v3338_v53 = vpack.c.b16 %v3335_v21, %v3334_v35  ;;  %v2995_v3 = vpop.xlane.xlu0 %2994 }
 0x3da   :  { %v9397_v61 = vpop.eup %9396  ;;  %9400 = vrcp.f32 %v2995_v3  ;;  %v3476_v32 = vunpack.c.l.b16 %v3107_v43 }
 0x3db   :  { %v9399_v1 = vpop.eup %9398  ;;  %v3074_v48 = vmul.f32 %v9397_v61, %v11019_v49  ;;  %v2998_v17 = vpop.xlane.xlu1 %2997  ;;  %8203 = vmatmul.msk.bf16.vlgmr.msrb.gmra.mxu0 %vm2725_vm14, %v3338_v53  ;;  %9402 = vrcp.f32 %v11086_v56 }
 0x3dc   :  { %v3070_v18 = vmul.f32 %v9399_v1, %v10999_v60  ;;  %9404 = vrcp.f32 %v2998_v17 }
 0x3dd   :  { %v3106_v7 = vpack.c.bf16 %v3074_v48, %v3074_v48 }
 0x3de   :  { %v3102_v63 = vpack.c.bf16 %v3070_v18, %v3070_v18  ;;  %v9114_v18 = vld [vmem:[%s12414_s9 + $0x8] sm:$0xff] }
 0x3df   :  { %v3475_v14 = vunpack.c.l.b16 %v3106_v7  ;;  %v2974_v36 = vpop.xlane.xlu2 %2973  ;;  %3636 = vmatpush.bf16.msra.mxu1 %v9114_v18 }
 0x3e0   :  { %v9401_v13 = vpop.eup %9400  ;;  %v3428_v2 = vunpack.c.l.b16 %v3102_v63 }
 0x3e1   :  { %v3479_v16 = vpack.c.b16 %v3476_v32, %v3475_v14  ;;  %v3071_v5 = vmul.f32 %v9401_v13, %v11033_v62  ;;  %v2983_v22 = vpop.xlane.xlu0 %2982  ;;  %v9403_v49 = vpop.eup %9402  ;;  %v9115_v13 = vld [vmem:[%s12414_s9 + $0x10] sm:$0xff] }
 0x3e2   :  { %9406 = vrcp.f32 %v2983_v22  ;;  %v3066_v60 = vmul.f32 %v9403_v49, %v10980_v40  ;;  %v9405_v12 = vpop.eup %9404  ;;  %3677 = vmatpush.bf16.msrb.mxu2 %v9115_v13 }
 0x3e3   :  { %v3013_v10 = vpop.xlane.xlu1 %3012  ;;  %8209 = vmatmul.msk.bf16.vlgmr.msra.gmra.mxu3 %vm2725_vm14, %v3479_v16  ;;  %9408 = vrcp.f32 %v3001_v51  ;;  %v3103_v56 = vpack.c.bf16 %v3071_v5, %v3071_v5  ;;  %v3072_v11 = vmul.f32 %v9405_v12, %v11031_v20  ;;  %v9116_v12 = vld [vmem:[%s12414_s9 + $0x18] sm:$0xff] }
 0x3e4   :  { %9410 = vrcp.f32 %v3013_v10  ;;  %v3098_v28 = vpack.c.bf16 %v3066_v60, %v3066_v60  ;;  %3718 = vmatpush.bf16.msrb.mxu3 %v9116_v12 }
 0x3e5   :  { %v3429_v27 = vunpack.c.l.b16 %v3103_v56  ;;  %9412 = vrcp.f32 %v2974_v36 }
 0x3e6   :  { %v3381_v52 = vunpack.c.l.b16 %v3098_v28 }
 0x3e7   :  { %v3432_v39 = vpack.c.b16 %v3429_v27, %v3428_v2  ;;  %v2989_v23 = vpop.xlane.xlu2 %2988 }
 0x3e8   :  { %v9407_v59 = vpop.eup %9406 }
 0x3e9   :  { %v9409_v29 = vpop.eup %9408  ;;  %v3067_v62 = vmul.f32 %v9407_v59, %v11044_v47  ;;  %v3010_v38 = vpop.xlane.xlu0 %3009  ;;  %8207 = vmatmul.msk.bf16.vlgmr.msra.gmra.mxu2 %vm2725_vm14, %v3432_v39  ;;  %v3104_v47 = vpack.c.bf16 %v3072_v11, %v3072_v11 }
 0x3ea   :  { %v9411_v44 = vpop.eup %9410  ;;  %9414 = vrcp.f32 %v3010_v38  ;;  %v3073_v26 = vmul.f32 %v9409_v29, %v11026_v24 }
 0x3eb   :  { %v2986_v6 = vpop.xlane.xlu1 %2985  ;;  %v3099_v40 = vpack.c.bf16 %v3067_v62, %v3067_v62  ;;  %v3077_v33 = vmul.f32 %v9411_v44, %v11048_v42  ;;  %v9413_v58 = vpop.eup %9412  ;;  %v3430_v24 = vunpack.c.l.b16 %v3104_v47  ;;  %v9117_v44 = vld [vmem:[%s12414_s9 + $0x20] sm:$0xff] }
 0x3ec   :  { %9416 = vrcp.f32 %v2986_v6  ;;  %v3105_v30 = vpack.c.bf16 %v3073_v26, %v3073_v26  ;;  %v3064_v42 = vmul.f32 %v9413_v58, %v11042_v55 }
 0x3ed   :  { %9418 = vrcp.f32 %v2989_v23  ;;  %v3382_v45 = vunpack.c.l.b16 %v3099_v40  ;;  %v3109_v41 = vpack.c.bf16 %v3077_v33, %v3077_v33 }
 0x3ee   :  { %v3431_v57 = vunpack.c.l.b16 %v3105_v30  ;;  %v3096_v61 = vpack.c.bf16 %v3064_v42, %v3064_v42 }
 0x3ef   :  { %v3385_v25 = vpack.c.b16 %v3382_v45, %v3381_v52  ;;  %v3478_v4 = vunpack.c.l.b16 %v3109_v41 }
 0x3f0   :  { %v9415_v50 = vpop.eup %9414  ;;  %v3433_v51 = vpack.c.b16 %v3431_v57, %v3430_v24  ;;  %v3336_v48 = vunpack.c.l.b16 %v3096_v61  ;;  %v9120_v24 = vld [vmem:[%s12414_s9 + $0x38] sm:$0xff] }
 0x3f1   :  { %v3076_v34 = vmul.f32 %v9415_v50, %v11058_v19  ;;  %v2977_v46 = vpop.xlane.xlu0 %2976  ;;  %8205 = vmatmul.msk.bf16.vlgmr.msrb.gmra.mxu1 %vm2725_vm14, %v3385_v25  ;;  %v9119_v25 = vld [vmem:[%s12414_s9 + $0x30] sm:$0xff]  ;;  %3882 = vmatpush.bf16.msra.mxu3 %v9120_v24 }
 0x3f2   :  { %v9417_v54 = vpop.eup %9416  ;;  %9420 = vrcp.f32 %v2977_v46  ;;  %3841 = vmatpush.bf16.msra.mxu2 %v9119_v25 }
 0x3f3   :  { %v9419_v20 = vpop.eup %9418  ;;  %v3108_v37 = vpack.c.bf16 %v3076_v34, %v3076_v34  ;;  %v3068_v15 = vmul.f32 %v9417_v54, %v11062_v9 }
 0x3f4   :  { %v3069_v35 = vmul.f32 %v9419_v20, %v11056_v31 }
 0x3f5   :  { %v3477_v21 = vunpack.c.l.b16 %v3108_v37  ;;  %v3100_v0 = vpack.c.bf16 %v3068_v15, %v3068_v15  ;;  %v9118_v15 = vld [vmem:[%s12414_s9 + $0x28] sm:$0xff] }
 0x3f6   :  { %v3101_v3 = vpack.c.bf16 %v3069_v35, %v3069_v35  ;;  %3800 = vmatpush.bf16.msrb.mxu1 %v9118_v15 }
 0x3f7   :  { %v3480_v53 = vpack.c.b16 %v3478_v4, %v3477_v21  ;;  %v3383_v9 = vunpack.c.l.b16 %v3100_v0 }
 0x3f8   :  { %v9421_v19 = vpop.eup %9420  ;;  %v3384_v55 = vunpack.c.l.b16 %v3101_v3 }
 0x3f9   :  { %v3065_v1 = vmul.f32 %v9421_v19, %v11068_v8  ;;  %8208 = vmatmul.msk.bf16.gmra.mxu2 %vm2725_vm14, %v3433_v51  ;;  %8210 = vmatmul.msk.bf16.gmra.mxu3 %vm2725_vm14, %v3480_v53  ;;  %v9113_v8 = vld [vmem:[%s12414_s9] sm:$0xff] }
 0x3fa   :  { %v3386_v31 = vpack.c.b16 %v3384_v55, %v3383_v9  ;;  %3595 = vmatpush.bf16.msra.mxu0 %v9113_v8 }
 0x3fb   :  { %v3097_v43 = vpack.c.bf16 %v3065_v1, %v3065_v1 }
 0x3fd   :  { %v3337_v17 = vunpack.c.l.b16 %v3097_v43 }
 0x3fe   :  { %3759 = vmatpush.bf16.msrb.mxu0 %v9117_v44 }
 0x3ff   :  { %v3339_v7 = vpack.c.b16 %v3337_v17, %v3336_v48 }
 0x401   :  { %8204 = vmatmul.msk.bf16.gmra.mxu0 %vm2725_vm14, %v3339_v7  ;;  %8206 = vmatmul.msk.bf16.gmra.mxu1 %vm2725_vm14, %v3386_v31 }
 0x41f   :  { %v3226_v32 = vpop.f32.mrf.mxu1 }
 0x420   :  { %v3538_v36 = vpack.c.bf16 %v3226_v32, %v3226_v32 }
 0x422   :  { %v3611_v5 = vunpack.c.l.b16 %v3538_v36 }
 0x426   :  { %v3179_v14 = vpop.f32.mrf.mxu0 }
 0x427   :  { %v3228_v16 = vpop.f32.mrf.mxu1  ;;  %v3534_v49 = vpack.c.bf16 %v3179_v14, %v3179_v14 }
 0x428   :  { %v3539_v63 = vpack.c.bf16 %v3228_v16, %v3228_v16 }
 0x429   :  { %v3570_v2 = vunpack.c.l.b16 %v3534_v49 }
 0x42a   :  { %v3612_v22 = vunpack.c.l.b16 %v3539_v63 }
 0x42c   :  { %v3615_v10 = vpack.c.b16 %v3612_v22, %v3611_v5 }
 0x42e   :  { %v3181_v56 = vpop.f32.mrf.mxu0  ;;  %8221 = vmatmul.msk.bf16.vlgmr.msra.gmra.mxu1 %vm2272_vm13, %v3615_v10 }
 0x42f   :  { %v3535_v60 = vpack.c.bf16 %v3181_v56, %v3181_v56 }
 0x431   :  { %v3571_v27 = vunpack.c.l.b16 %v3535_v60 }
 0x433   :  { %v3574_v39 = vpack.c.b16 %v3571_v27, %v3570_v2 }
 0x435   :  { %8215 = vmatmul.msk.bf16.vlgmr.msra.gmra.mxu0 %vm2272_vm13, %v3574_v39 }
 0x439   :  { %v3273_v59 = vpop.f32.mrf.mxu2 }
 0x43a   :  { %v3542_v28 = vpack.c.bf16 %v3273_v59, %v3273_v59 }
 0x43b   :  { %v3184_v29 = vpop.f32.mrf.mxu0 }
 0x43c   :  { %v3536_v23 = vpack.c.bf16 %v3184_v29, %v3184_v29  ;;  %v3652_v11 = vunpack.c.l.b16 %v3542_v28 }
 0x43e   :  { %v3572_v45 = vunpack.c.l.b16 %v3536_v23 }
 0x441   :  { %v3275_v62 = vpop.f32.mrf.mxu2 }
 0x442   :  { %v3543_v38 = vpack.c.bf16 %v3275_v62, %v3275_v62 }
 0x443   :  { %v3186_v6 = vpop.f32.mrf.mxu0 }
 0x444   :  { %v3653_v40 = vunpack.c.l.b16 %v3543_v38  ;;  %v3537_v26 = vpack.c.bf16 %v3186_v6, %v3186_v6 }
 0x445   :  { %v3320_v52 = vpop.f32.mrf.mxu3 }
 0x446   :  { %v3656_v33 = vpack.c.b16 %v3653_v40, %v3652_v11  ;;  %v3573_v58 = vunpack.c.l.b16 %v3537_v26  ;;  %v3546_v50 = vpack.c.bf16 %v3320_v52, %v3320_v52 }
 0x448   :  { %v3575_v47 = vpack.c.b16 %v3573_v58, %v3572_v45  ;;  %8227 = vmatmul.msk.bf16.vlgmr.msrb.gmra.mxu2 %vm2272_vm13, %v3656_v33  ;;  %v3693_v34 = vunpack.c.l.b16 %v3546_v50 }
 0x44a   :  { %8216 = vmatmul.msk.bf16.gmra.mxu0 %vm2272_vm13, %v3575_v47 }
 0x44d   :  { %v3322_v30 = vpop.f32.mrf.mxu3 }
 0x44e   :  { %v3547_v54 = vpack.c.bf16 %v3322_v30, %v3322_v30  ;;  %v3278_v41 = vpop.f32.mrf.mxu2 }
 0x44f   :  { %v3544_v57 = vpack.c.bf16 %v3278_v41, %v3278_v41 }
 0x450   :  { %v3694_v46 = vunpack.c.l.b16 %v3547_v54  ;;  %v3231_v20 = vpop.f32.mrf.mxu1 }
 0x451   :  { %v3540_v35 = vpack.c.bf16 %v3231_v20, %v3231_v20  ;;  %v3654_v53 = vunpack.c.l.b16 %v3544_v57 }
 0x452   :  { %v3697_v37 = vpack.c.b16 %v3694_v46, %v3693_v34 }
 0x453   :  { %v3613_v3 = vunpack.c.l.b16 %v3540_v35 }
 0x454   :  { %8233 = vmatmul.msk.bf16.vlgmr.msrb.gmra.mxu3 %vm2272_vm13, %v3697_v37 }
 0x455   :  { %v3325_v42 = vpop.f32.mrf.mxu3 }
 0x456   :  { %v3280_v4 = vpop.f32.mrf.mxu2  ;;  %v3548_v43 = vpack.c.bf16 %v3325_v42, %v3325_v42 }
 0x457   :  { %v3545_v21 = vpack.c.bf16 %v3280_v4, %v3280_v4 }
 0x458   :  { %v3233_v0 = vpop.f32.mrf.mxu1  ;;  %v3367_v51 = vpop.f32.mrf.mxu0  ;;  %v3695_v31 = vunpack.c.l.b16 %v3548_v43 }
 0x459   :  { %v3655_v19 = vunpack.c.l.b16 %v3545_v21  ;;  %v3541_v61 = vpack.c.bf16 %v3233_v0, %v3233_v0  ;;  %v3550_v7 = vpack.c.bf16 %v3367_v51, %v3367_v51 }
 0x45b   :  { %v3657_v1 = vpack.c.b16 %v3655_v19, %v3654_v53  ;;  %v3614_v9 = vunpack.c.l.b16 %v3541_v61  ;;  %v3734_v36 = vunpack.c.l.b16 %v3550_v7 }
 0x45d   :  { %v3616_v48 = vpack.c.b16 %v3614_v9, %v3613_v3  ;;  %8228 = vmatmul.msk.bf16.gmra.mxu2 %vm2272_vm13, %v3657_v1  ;;  %v3327_v55 = vpop.f32.mrf.mxu3 }
 0x45e   :  { %v3549_v17 = vpack.c.bf16 %v3327_v55, %v3327_v55 }
 0x45f   :  { %8222 = vmatmul.msk.bf16.gmra.mxu1 %vm2272_vm13, %v3616_v48 }
 0x460   :  { %v3696_v18 = vunpack.c.l.b16 %v3549_v17  ;;  %v3369_v8 = vpop.f32.mrf.mxu0 }
 0x461   :  { %v3551_v32 = vpack.c.bf16 %v3369_v8, %v3369_v8 }
 0x462   :  { %v3698_v14 = vpack.c.b16 %v3696_v18, %v3695_v31 }
 0x463   :  { %v3735_v13 = vunpack.c.l.b16 %v3551_v32 }
 0x464   :  { %8234 = vmatmul.msk.bf16.gmra.mxu3 %vm2272_vm13, %v3698_v14 }
 0x465   :  { %v3738_v16 = vpack.c.b16 %v3735_v13, %v3734_v36 }
 0x466   :  { %v3508_v63 = vpop.f32.mrf.mxu3 }
 0x467   :  { %8239 = vmatmul.msk.bf16.vlgmr.msrb.gmra.mxu0 %vm2272_vm13, %v3738_v16  ;;  %v3562_v5 = vpack.c.bf16 %v3508_v63, %v3508_v63 }
 0x469   :  { %v3857_v60 = vunpack.c.l.b16 %v3562_v5 }
 0x46c   :  { %v3461_v22 = vpop.f32.mrf.mxu2 }
 0x46d   :  { %v3558_v12 = vpack.c.bf16 %v3461_v22, %v3461_v22 }
 0x46e   :  { %v3510_v49 = vpop.f32.mrf.mxu3  ;;  %v3414_v56 = vpop.f32.mrf.mxu1 }
 0x46f   :  { %v3563_v10 = vpack.c.bf16 %v3510_v49, %v3510_v49  ;;  %v3554_v59 = vpack.c.bf16 %v3414_v56, %v3414_v56  ;;  %v3816_v62 = vunpack.c.l.b16 %v3558_v12 }
 0x471   :  { %v3858_v2 = vunpack.c.l.b16 %v3563_v10  ;;  %v3775_v44 = vunpack.c.l.b16 %v3554_v59 }
 0x473   :  { %v3861_v27 = vpack.c.b16 %v3858_v2, %v3857_v60 }
 0x474   :  { %v3463_v39 = vpop.f32.mrf.mxu2 }
 0x475   :  { %8257 = vmatmul.msk.bf16.vlgmr.msra.gmra.mxu3 %vm2272_vm13, %v3861_v27  ;;  %v3559_v29 = vpack.c.bf16 %v3463_v39, %v3463_v39 }
 0x476   :  { %v3416_v28 = vpop.f32.mrf.mxu1 }
 0x477   :  { %v3817_v23 = vunpack.c.l.b16 %v3559_v29  ;;  %v3555_v38 = vpack.c.bf16 %v3416_v28, %v3416_v28 }
 0x479   :  { %v3820_v6 = vpack.c.b16 %v3817_v23, %v3816_v62  ;;  %v3776_v11 = vunpack.c.l.b16 %v3555_v38 }
 0x47b   :  { %v3779_v40 = vpack.c.b16 %v3776_v11, %v3775_v44  ;;  %8251 = vmatmul.msk.bf16.vlgmr.msra.gmra.mxu2 %vm2272_vm13, %v3820_v6  ;;  %v9582_v6 = vld [vmem:[%s12437_s23] sm:$0xff] }
 0x47c   :  { %v3466_v26 = vpop.f32.mrf.mxu2  ;;  %v3513_v52 = vpop.f32.mrf.mxu3 }
 0x47d   :  { %8245 = vmatmul.msk.bf16.vlgmr.msrb.gmra.mxu1 %vm2272_vm13, %v3779_v40  ;;  %v3560_v58 = vpack.c.bf16 %v3466_v26, %v3466_v26  ;;  %v3564_v47 = vpack.c.bf16 %v3513_v52, %v3513_v52 }
 0x47e   :  { %v3372_v45 = vpop.f32.mrf.mxu0  ;;  %v3419_v33 = vpop.f32.mrf.mxu1 }
 0x47f   :  { %v3552_v25 = vpack.c.bf16 %v3372_v45, %v3372_v45  ;;  %v3556_v50 = vpack.c.bf16 %v3419_v33, %v3419_v33  ;;  %v3818_v46 = vunpack.c.l.b16 %v3560_v58  ;;  %v3859_v20 = vunpack.c.l.b16 %v3564_v47 }
 0x481   :  { %v3736_v35 = vunpack.c.l.b16 %v3552_v25  ;;  %v3777_v21 = vunpack.c.l.b16 %v3556_v50 }
 0x484   :  { %v3468_v30 = vpop.f32.mrf.mxu2  ;;  %v3515_v54 = vpop.f32.mrf.mxu3 }
 0x485   :  { %v3561_v41 = vpack.c.bf16 %v3468_v30, %v3468_v30  ;;  %v3565_v34 = vpack.c.bf16 %v3515_v54, %v3515_v54 }
 0x486   :  { %v3374_v24 = vpop.f32.mrf.mxu0  ;;  %v3421_v37 = vpop.f32.mrf.mxu1 }
 0x487   :  { %v3819_v15 = vunpack.c.l.b16 %v3561_v41  ;;  %v3860_v57 = vunpack.c.l.b16 %v3565_v34  ;;  %v3553_v42 = vpack.c.bf16 %v3374_v24, %v3374_v24  ;;  %v3557_v4 = vpack.c.bf16 %v3421_v37, %v3421_v37  ;;  %v9583_v41 = vld [vmem:[%s12437_s23 + $0x8] sm:$0xff] }
 0x489   :  { %v3821_v0 = vpack.c.b16 %v3819_v15, %v3818_v46  ;;  %v3862_v51 = vpack.c.b16 %v3860_v57, %v3859_v20  ;;  %v3737_v53 = vunpack.c.l.b16 %v3553_v42  ;;  %v3778_v19 = vunpack.c.l.b16 %v3557_v4 }
 0x48b   :  { %v3739_v61 = vpack.c.b16 %v3737_v53, %v3736_v35  ;;  %v3780_v3 = vpack.c.b16 %v3778_v19, %v3777_v21  ;;  %8252 = vmatmul.msk.bf16.gmra.mxu2 %vm2272_vm13, %v3821_v0  ;;  %8258 = vmatmul.msk.bf16.gmra.mxu3 %vm2272_vm13, %v3862_v51  ;;  %v9584_v21 = vld [vmem:[%s12437_s23 + $0x10] sm:$0xff] }
 0x48d   :  { %8240 = vmatmul.msk.bf16.gmra.mxu0 %vm2272_vm13, %v3739_v61  ;;  %8246 = vmatmul.msk.bf16.gmra.mxu1 %vm2272_vm13, %v3780_v3 }
 0x4ab   :  { %v3638_v43 = vpop.f32.mrf.mxu1 }
 0x4b2   :  { %v3597_v1 = vpop.f32.mrf.mxu0 }
 0x4b3   :  { %v3640_v7 = vpop.f32.mrf.mxu1  ;;  %v3894_v63 = vadd.f32 %v3638_v43, %v3597_v1  ;;  %v9585_v43 = vld [vmem:[%s12437_s23 + $0x18] sm:$0xff] }
 0x4ba   :  { %v3599_v55 = vpop.f32.mrf.mxu0 }
 0x4bb   :  { %v3901_v27 = vadd.f32 %v3640_v7, %v3599_v55 }
 0x4c7   :  { %v3602_v31 = vpop.f32.mrf.mxu0 }
 0x4cb   :  { %v3679_v48 = vpop.f32.mrf.mxu2 }
 0x4cc   :  { %v3895_v49 = vadd.f32 %v3894_v63, %v3679_v48 }
 0x4cf   :  { %v3604_v36 = vpop.f32.mrf.mxu0 }
 0x4d3   :  { %v3681_v18 = vpop.f32.mrf.mxu2 }
 0x4d4   :  { %v3902_v59 = vadd.f32 %v3901_v27, %v3681_v18  ;;  %v9144_v27 = vld [vmem:[%s12417_s12 + $0xb8] sm:$0xff] }
 0x4d5   :  { %4354 = vmatpush.bf16.msrb.mxu2 %v9144_v27  ;;  %v9174_v27 = vld [vmem:[%s12417_s12 + $0x1a8] sm:$0xff] }
 0x4d7   :  { %v3720_v9 = vpop.f32.mrf.mxu3 }
 0x4d8   :  { %v3896_v10 = vadd.f32 %v3895_v49, %v3720_v9 }
 0x4dc   :  { %v3643_v8 = vpop.f32.mrf.mxu1 }
 0x4dd   :  { %v3908_v40 = vadd.f32 %v3643_v8, %v3602_v31 }
 0x4df   :  { %v3722_v17 = vpop.f32.mrf.mxu3 }
 0x4e0   :  { %v3684_v14 = vpop.f32.mrf.mxu2  ;;  %v3903_v62 = vadd.f32 %v3902_v59, %v3722_v17  ;;  %v12447_v17 = vld [vmem:[#allocation5_spill] sm:$0xff]  ;;  %v9135_v59 = vld [vmem:[%s12417_s12 + $0x70] sm:$0xff] }
 0x4e1   :  { %v3909_v33 = vadd.f32 %v3908_v40, %v3684_v14  ;;  %v9133_v40 = vld [vmem:[%s12417_s12 + $0x60] sm:$0xff] }
 0x4e4   :  { %v3645_v13 = vpop.f32.mrf.mxu1  ;;  %v3761_v5 = vpop.f32.mrf.mxu0 }
 0x4e5   :  { %v3897_v60 = vadd.f32 %v3896_v10, %v3761_v5  ;;  %v3915_v46 = vadd.f32 %v3645_v13, %v3604_v36 }
 0x4e7   :  { %v3725_v32 = vpop.f32.mrf.mxu3 }
 0x4e8   :  { %v3686_v22 = vpop.f32.mrf.mxu2  ;;  %v3910_v47 = vadd.f32 %v3909_v33, %v3725_v32  ;;  %v9132_v33 = vld [vmem:[%s12417_s12 + $0x58] sm:$0xff] }
 0x4e9   :  { %v3916_v15 = vadd.f32 %v3915_v46, %v3686_v22 }
 0x4ec   :  { %v3763_v28 = vpop.f32.mrf.mxu0 }
 0x4ed   :  { %v3904_v44 = vadd.f32 %v3903_v62, %v3763_v28  ;;  %v9151_v28 = vld [vmem:[%s12417_s12 + $0xf0] sm:$0xff]  ;;  %v9126_v62 = vld [vmem:[%s12417_s12 + $0x28] sm:$0xff] }
 0x4ef   :  { %v3727_v16 = vpop.f32.mrf.mxu3 }
 0x4f0   :  { %v3917_v42 = vadd.f32 %v3916_v15, %v3727_v16  ;;  %v9138_v15 = vld [vmem:[%s12417_s12 + $0x88] sm:$0xff] }
 0x4f8   :  { %v3884_v2 = vpop.f32.mrf.mxu3 }
 0x4fa   :  { %v3802_v56 = vpop.f32.mrf.mxu1 }
 0x4fb   :  { %v3898_v12 = vadd.f32 %v3897_v60, %v3802_v56  ;;  %v9128_v60 = vld [vmem:[%s12417_s12 + $0x38] sm:$0xff] }
 0x4fc   :  { %4220 = vmatpush.bf16.msra.mxu0 %v9128_v60  ;;  %v9158_v60 = vld [vmem:[%s12417_s12 + $0x128] sm:$0xff] }
 0x4fe   :  { %v3843_v39 = vpop.f32.mrf.mxu2 }
 0x4ff   :  { %v3899_v29 = vadd.f32 %v3898_v12, %v3843_v39  ;;  %v9152_v12 = vld [vmem:[%s12417_s12 + $0xf8] sm:$0xff]  ;;  %v9127_v39 = vld [vmem:[%s12417_s12 + $0x30] sm:$0xff] }
 0x500   :  { %v3886_v52 = vpop.f32.mrf.mxu3  ;;  %4421 = vmatpush.bf16.msrb.mxu3 %v9152_v12  ;;  %4221 = vmatpush.bf16.msra.mxu0 %v9127_v39 }
 0x501   :  { %v3900_v23 = vadd.f32 %v3899_v29, %v3884_v2  ;;  %v9136_v2 = vld [vmem:[%s12417_s12 + $0x78] sm:$0xff]  ;;  %v9143_v29 = vld [vmem:[%s12417_s12 + $0xb0] sm:$0xff] }
 0x502   :  { %v3804_v38 = vpop.f32.mrf.mxu1  ;;  %4287 = vmatpush.bf16.msra.mxu1 %v9136_v2  ;;  %4355 = vmatpush.bf16.msrb.mxu2 %v9143_v29  ;;  %v9166_v2 = vld [vmem:[%s12417_s12 + $0x168] sm:$0xff]  ;;  %v11356_v29 = vld [vmem:[%s12415_s10] ss:$0 sm:$0xff] }
 0x503   :  { %v11166_v11 = vadd.f32 %v9582_v6, %v3900_v23  ;;  %v3905_v26 = vadd.f32 %v3904_v44, %v3804_v38  ;;  %v9134_v23 = vld [vmem:[%s12417_s12 + $0x68] sm:$0xff]  ;;  %v9125_v6 = vld [vmem:[%s12417_s12 + $0x20] sm:$0xff] }
 0x504   :  { %4422 = vmatpush.bf16.msrb.mxu3 %v9151_v28  ;;  %v9142_v38 = vld [vmem:[%s12417_s12 + $0xa8] sm:$0xff]  ;;  %4222 = vmatpush.bf16.msra.mxu0 %v9126_v62 }
 0x505   :  { %3926 = vadd.xlane.f32.xlu0 %v11166_v11  ;;  %v9150_v44 = vld [vmem:[%s12417_s12 + $0xe8] sm:$0xff] }
 0x506   :  { %v3845_v45 = vpop.f32.mrf.mxu2  ;;  %4288 = vmatpush.bf16.msra.mxu1 %v9135_v59  ;;  %4356 = vmatpush.bf16.msrb.mxu2 %v9142_v38  ;;  %v9182_v59 = vld [vmem:[%s12417_s12 + $0x1e8] sm:$0xff]  ;;  %v9157_v38 = vld [vmem:[%s12417_s12 + $0x120] sm:$0xff] }
 0x507   :  { %v3906_v58 = vadd.f32 %v3905_v26, %v3845_v45  ;;  %v9141_v26 = vld [vmem:[%s12417_s12 + $0xa0] sm:$0xff]  ;;  %v9124_v45 = vld [vmem:[%s12417_s12 + $0x18] sm:$0xff] }
 0x508   :  { %4423 = vmatpush.bf16.msrb.mxu3 %v9150_v44  ;;  %4223 = vmatpush.bf16.msra.mxu0 %v9125_v6  ;;  %v9165_v44 = vld [vmem:[%s12417_s12 + $0x160] sm:$0xff] }
 0x509   :  { %v3907_v25 = vadd.f32 %v3906_v58, %v3886_v52  ;;  %v9149_v52 = vld [vmem:[%s12417_s12 + $0xe0] sm:$0xff]  ;;  %v9140_v58 = vld [vmem:[%s12417_s12 + $0x98] sm:$0xff] }
 0x50a   :  { %v3766_v50 = vpop.f32.mrf.mxu0  ;;  %v3807_v30 = vpop.f32.mrf.mxu1  ;;  %4289 = vmatpush.bf16.msra.mxu1 %v9134_v23  ;;  %4357 = vmatpush.bf16.msrb.mxu2 %v9141_v26  ;;  %v9173_v6 = vld [vmem:[%s12417_s12 + $0x1a0] sm:$0xff] }
 0x50b   :  { %v3911_v54 = vadd.f32 %v3910_v47, %v3766_v50  ;;  %v11172_v34 = vadd.f32 %v9583_v41, %v3907_v25  ;;  %v9148_v47 = vld [vmem:[%s12417_s12 + $0xd8] sm:$0xff]  ;;  %v9123_v25 = vld [vmem:[%s12417_s12 + $0x10] sm:$0xff] }
 0x50c   :  { %4424 = vmatpush.bf16.msrb.mxu3 %v9149_v52  ;;  %4224 = vmatpush.bf16.msra.mxu0 %v9124_v45  ;;  %v9131_v50 = vld [vmem:[%s12417_s12 + $0x50] sm:$0xff]  ;;  %v9181_v52 = vld [vmem:[%s12417_s12 + $0x1e0] sm:$0xff] }
 0x50d   :  { %v3912_v20 = vadd.f32 %v3911_v54, %v3807_v30  ;;  %3928 = vadd.xlane.f32.xlu1 %v11172_v34  ;;  %v9139_v30 = vld [vmem:[%s12417_s12 + $0x90] sm:$0xff]  ;;  %v11375_v45 = vld [vmem:[%s12416_s11] ss:$0 sm:$0xff]  ;;  %s9616_s11 = smov 8  }
 0x50e   :  { %v3848_v24 = vpop.f32.mrf.mxu2  ;;  %v3889_v37 = vpop.f32.mrf.mxu3  ;;  %4290 = vmatpush.bf16.msra.mxu1 %v9133_v40  ;;  %4358 = vmatpush.bf16.msrb.mxu2 %v9140_v58  ;;  %v9147_v41 = vld [vmem:[%s12417_s12 + $0xd0] sm:$0xff] }
 0x50f   :  { %v3913_v57 = vadd.f32 %v3912_v20, %v3848_v24  ;;  %v9122_v24 = vld [vmem:[%s12417_s12 + $0x8] sm:$0xff] }
 0x510   :  { %4425 = vmatpush.bf16.msrb.mxu3 %v9148_v47  ;;  %4225 = vmatpush.bf16.msra.mxu0 %v9123_v25 }
 0x511   :  { %v3914_v4 = vadd.f32 %v3913_v57, %v3889_v37  ;;  %v9130_v37 = vld [vmem:[%s12417_s12 + $0x48] sm:$0xff] }
 0x512   :  { %v3768_v35 = vpop.f32.mrf.mxu0  ;;  %v3809_v53 = vpop.f32.mrf.mxu1  ;;  %4291 = vmatpush.bf16.msra.mxu1 %v9132_v33  ;;  %4359 = vmatpush.bf16.msrb.mxu2 %v9139_v30  ;;  %v9146_v57 = vld [vmem:[%s12417_s12 + $0xc8] sm:$0xff]  ;;  %v9164_v30 = vld [vmem:[%s12417_s12 + $0x158] sm:$0xff] }
 0x513   :  { %v11178_v0 = vadd.f32 %v9584_v21, %v3914_v4  ;;  %v3918_v51 = vadd.f32 %v3917_v42, %v3768_v35  ;;  %v9121_v42 = vld [vmem:[%s12417_s12] sm:$0xff] }
 0x514   :  { %4426 = vmatpush.bf16.msrb.mxu3 %v9147_v41  ;;  %4226 = vmatpush.bf16.msra.mxu0 %v9122_v24  ;;  %v9129_v4 = vld [vmem:[%s12417_s12 + $0x40] sm:$0xff]  ;;  %v9155_v24 = vld [vmem:[%s12417_s12 + $0x110] sm:$0xff] }
 0x515   :  { %v3919_v19 = vadd.f32 %v3918_v51, %v3809_v53  ;;  %3930 = vadd.xlane.f32.xlu2 %v11178_v0  ;;  %v9137_v35 = vld [vmem:[%s12417_s12 + $0x80] sm:$0xff] }
 0x516   :  { %v3850_v61 = vpop.f32.mrf.mxu2  ;;  %v3891_v1 = vpop.f32.mrf.mxu3  ;;  %4292 = vmatpush.bf16.msra.mxu1 %v9131_v50  ;;  %4360 = vmatpush.bf16.msrb.mxu2 %v9138_v15  ;;  %v9145_v51 = vld [vmem:[%s12417_s12 + $0xc0] sm:$0xff]  ;;  %v9156_v50 = vld [vmem:[%s12417_s12 + $0x118] sm:$0xff] }
 0x517   :  { %v3920_v3 = vadd.f32 %v3919_v19, %v3850_v61 }
 0x518   :  { %4427 = vmatpush.bf16.msrb.mxu3 %v9146_v57  ;;  %4227 = vmatpush.bf16.msra.mxu0 %v9121_v42  ;;  %v9171_v42 = vld [vmem:[%s12417_s12 + $0x190] sm:$0xff] }
 0x519   :  { %v3921_v9 = vadd.f32 %v3920_v3, %v3891_v1  ;;  %v9160_v3 = vld [vmem:[%s12417_s12 + $0x138] sm:$0xff] }
 0x51a   :  { %4293 = vmatpush.bf16.msra.mxu1 %v9130_v37  ;;  %4361 = vmatpush.bf16.msrb.mxu2 %v9137_v35  ;;  %v9168_v1 = vld [vmem:[%s12417_s12 + $0x178] sm:$0xff]  ;;  %v9163_v37 = vld [vmem:[%s12417_s12 + $0x150] sm:$0xff] }
 0x51b   :  { %v11184_v48 = vadd.f32 %v9585_v43, %v3921_v9  ;;  %v9176_v9 = vld [vmem:[%s12417_s12 + $0x1b8] sm:$0xff] }
 0x51c   :  { %4428 = vmatpush.bf16.msrb.mxu3 %v9145_v51  ;;  %4488 = vmatpush.bf16.msrb.mxu0 %v9160_v3 }
 0x51d   :  { %3932 = vadd.xlane.f32.xlu0 %v11184_v48 }
 0x51e   :  { %4294 = vmatpush.bf16.msra.mxu1 %v9129_v4  ;;  %4622 = vmatpush.bf16.msra.mxu2 %v9176_v9  ;;  %v9179_v4 = vld [vmem:[%s12417_s12 + $0x1d0] sm:$0xff] }
 0x522   :  { %4555 = vmatpush.bf16.msrb.mxu1 %v9168_v1  ;;  %v9178_v1 = vld [vmem:[%s12417_s12 + $0x1c8] sm:$0xff] }
 0x578   :  { %v3927_v55 = vpop.xlane.xlu0 %3926 }
 0x579   :  { %v3934_v7 = vmul.f32 %v3927_v55, %v12447_v17  ;;  %v9184_v55 = vld [vmem:[%s12417_s12 + $0x1f8] sm:$0xff] }
 0x57a   :  { %4689 = vmatpush.bf16.msra.mxu3 %v9184_v55 }
 0x57b   :  { %v11189_v31 = vsub.f32 %v11166_v11, %v3934_v7 }
 0x57d   :  { %v3942_v18 = vmul.f32 %v11189_v31, %v11189_v31 }
 0x57f   :  { %3946 = vadd.xlane.f32.xlu1 %v3942_v18  ;;  %v9159_v18 = vld [vmem:[%s12417_s12 + $0x130] sm:$0xff] }
 0x580   :  { %v3929_v8 = vpop.xlane.xlu1 %3928  ;;  %4489 = vmatpush.bf16.msrb.mxu0 %v9159_v18 }
 0x581   :  { %v3935_v32 = vmul.f32 %v3929_v8, %v12447_v17  ;;  %v9167_v8 = vld [vmem:[%s12417_s12 + $0x170] sm:$0xff] }
 0x582   :  { %4556 = vmatpush.bf16.msrb.mxu1 %v9167_v8 }
 0x583   :  { %v11195_v14 = vsub.f32 %v11172_v34, %v3935_v32  ;;  %v9175_v32 = vld [vmem:[%s12417_s12 + $0x1b0] sm:$0xff] }
 0x584   :  { %4623 = vmatpush.bf16.msra.mxu2 %v9175_v32  ;;  %4490 = vmatpush.bf16.msrb.mxu0 %v9158_v60  ;;  %v9153_v32 = vld [vmem:[%s12417_s12 + $0x100] sm:$0xff] }
 0x585   :  { %v3943_v36 = vmul.f32 %v11195_v14, %v11195_v14 }
 0x586   :  { %4557 = vmatpush.bf16.msrb.mxu1 %v9166_v2 }
 0x587   :  { %3948 = vadd.xlane.f32.xlu2 %v3943_v36 }
 0x588   :  { %v3931_v13 = vpop.xlane.xlu2 %3930  ;;  %4624 = vmatpush.bf16.msra.mxu2 %v9174_v27  ;;  %4491 = vmatpush.bf16.msrb.mxu0 %v9157_v38 }
 0x589   :  { %v3936_v16 = vmul.f32 %v3931_v13, %v12447_v17 }
 0x58a   :  { %4558 = vmatpush.bf16.msrb.mxu1 %v9165_v44 }
 0x58b   :  { %v11201_v63 = vsub.f32 %v11178_v0, %v3936_v16  ;;  %v9183_v16 = vld [vmem:[%s12417_s12 + $0x1f0] sm:$0xff] }
 0x58c   :  { %4690 = vmatpush.bf16.msra.mxu3 %v9183_v16  ;;  %4625 = vmatpush.bf16.msra.mxu2 %v9173_v6 }
 0x58d   :  { %v3944_v5 = vmul.f32 %v11201_v63, %v11201_v63  ;;  %4492 = vmatpush.bf16.msrb.mxu0 %v9156_v50  ;;  %v9186_v50 = vld [vmem:[%s12418_s13 + $0x8] sm:$0xff] }
 0x58e   :  { %4559 = vmatpush.bf16.msrb.mxu1 %v9164_v30  ;;  %v9190_v30 = vld [vmem:[%s12418_s13 + $0x28] sm:$0xff] }
 0x58f   :  { %3950 = vadd.xlane.f32.xlu0 %v3944_v5 }
 0x590   :  { %v3933_v22 = vpop.xlane.xlu0 %3932  ;;  %4691 = vmatpush.bf16.msra.mxu3 %v9182_v59 }
 0x591   :  { %v3937_v49 = vmul.f32 %v3933_v22, %v12447_v17  ;;  %4493 = vmatpush.bf16.msrb.mxu0 %v9155_v24  ;;  %v9193_v24 = vld [vmem:[%s12418_s13 + $0x40] sm:$0xff] }
 0x592   :  { %4560 = vmatpush.bf16.msrb.mxu1 %v9163_v37  ;;  %v9197_v37 = vld [vmem:[%s12418_s13 + $0x60] sm:$0xff] }
 0x593   :  { %v11207_v10 = vsub.f32 %v11184_v48, %v3937_v49 }
 0x594   :  { %4692 = vmatpush.bf16.msra.mxu3 %v9181_v52 }
 0x595   :  { %v3945_v56 = vmul.f32 %v11207_v10, %v11207_v10 }
 0x597   :  { %3952 = vadd.xlane.f32.xlu1 %v3945_v56 }
 0x5f2   :  { %v3947_v54 = vpop.xlane.xlu1 %3946 }
 0x5f3   :  { %v3954_v46 = vmul.f32 %v3947_v54, %v12447_v17  ;;  %v9172_v54 = vld [vmem:[%s12417_s12 + $0x198] sm:$0xff] }
 0x5f4   :  { %4626 = vmatpush.bf16.msra.mxu2 %v9172_v54  ;;  %v9194_v54 = vld [vmem:[%s12418_s13 + $0x48] sm:$0xff] }
 0x5f5   :  { %v3958_v20 = vadd.f32 1e-05, %v3954_v46 }
 0x5f7   :  { %9422 = vrsqrt.f32 %v3958_v20  ;;  %vm3968_vm0 = vweird.f32 %v3958_v20 }
 0x5f8   :  { %4627 = vmatpush.bf16.msra.mxu2 %v9171_v42  ;;  %v9208_v42 = vld [vmem:[%s12418_s13 + $0xb8] sm:$0xff] }
 0x5fa   :  { %v3949_v21 = vpop.xlane.xlu2 %3948 }
 0x5fb   :  { %v3955_v53 = vmul.f32 %v3949_v21, %v12447_v17 }
 0x5fd   :  { %v9423_v19 = vpop.eup %9422  ;;  %v11309_v61 = vadd.f32 1e-05, %v3955_v53 }
 0x5fe   :  { %v3963_v43 = vmul.f32 %v9423_v19, %v3958_v20  ;;  %vm3969_vm15 = vweird.f32 %v9423_v19  ;;  %v9180_v20 = vld [vmem:[%s12417_s12 + $0x1d8] sm:$0xff] }
 0x5ff   :  { %9424 = vrsqrt.f32 %v11309_v61  ;;  %vm3970_vm1 = vmor %vm3968_vm0, %vm3969_vm15  ;;  %vm3978_vm3 = vweird.f32 %v11309_v61  ;;  %4693 = vmatpush.bf16.msra.mxu3 %v9180_v20  ;;  %v9189_v20 = vld [vmem:[%s12418_s13 + $0x20] sm:$0xff] }
 0x600   :  { %v3964_v7 = vmul.f32 %v9423_v19, %v3963_v43 }
 0x602   :  { %v3965_v36 = vmul.f32 0.5, %v3964_v7  ;;  %v3951_v13 = vpop.xlane.xlu0 %3950 }
 0x603   :  { %v3956_v5 = vmul.f32 %v3951_v13, %v12447_v17  ;;  %4694 = vmatpush.bf16.msra.mxu3 %v9179_v4  ;;  %v9203_v4 = vld [vmem:[%s12418_s13 + $0x90] sm:$0xff] }
 0x604   :  { %v3966_v22 = vsub.f32 1.5, %v3965_v36  ;;  %v9161_v36 = vld [vmem:[%s12417_s12 + $0x140] sm:$0xff] }
 0x605   :  { %v9425_v49 = vpop.eup %9424  ;;  %v11337_v56 = vadd.f32 1e-05, %v3956_v5  ;;  %v9169_v5 = vld [vmem:[%s12417_s12 + $0x180] sm:$0xff] }
 0x606   :  { %v3967_v12 = vmul.f32 %v9423_v19, %v3966_v22  ;;  %v3973_v39 = vmul.f32 %v9425_v49, %v11309_v61  ;;  %vm3979_vm2 = vweird.f32 %v9425_v49  ;;  %v9162_v61 = vld [vmem:[%s12417_s12 + $0x148] sm:$0xff]  ;;  %v9177_v22 = vld [vmem:[%s12417_s12 + $0x1c0] sm:$0xff] }
 0x607   :  { %9426 = vrsqrt.f32 %v11337_v56  ;;  %vm3980_vm4 = vmor %vm3978_vm3, %vm3979_vm2  ;;  %vm3988_vm6 = vweird.f32 %v11337_v56  ;;  %4561 = vmatpush.bf16.msrb.mxu1 %v9162_v61  ;;  %4695 = vmatpush.bf16.msra.mxu3 %v9178_v1  ;;  %v9210_v61 = vld [vmem:[%s12418_s13 + $0xc8] sm:$0xff]  ;;  %v9209_v1 = vld [vmem:[%s12418_s13 + $0xc0] sm:$0xff] }
 0x608   :  { %v3971_v28 = vsel %vm3970_vm1, %v9423_v19, %v3967_v12  ;;  %v3974_v62 = vmul.f32 %v9425_v49, %v3973_v39  ;;  %v9154_v19 = vld [vmem:[%s12417_s12 + $0x108] sm:$0xff] }
 0x609   :  { %v4002_v23 = vmul.f32 %v3971_v28, %v11189_v31  ;;  %4494 = vmatpush.bf16.msrb.mxu0 %v9154_v19  ;;  %v9202_v19 = vld [vmem:[%s12418_s13 + $0x88] sm:$0xff] }
 0x60a   :  { %v3975_v40 = vmul.f32 0.5, %v3974_v62  ;;  %v3953_v26 = vpop.xlane.xlu1 %3952 }
 0x60b   :  { %v3957_v31 = vmul.f32 %v3953_v26, %v12447_v17  ;;  %v4010_v47 = vmul.f32 %v11356_v29, %v4002_v23  ;;  %4562 = vmatpush.bf16.msrb.mxu1 %v9161_v36  ;;  %4696 = vmatpush.bf16.msra.mxu3 %v9177_v22 }
 0x60c   :  { %v3976_v33 = vsub.f32 1.5, %v3975_v40 }
 0x60d   :  { %v9427_v58 = vpop.eup %9426  ;;  %v11378_v25 = vadd.f32 1e-05, %v3957_v31  ;;  %v4018_v35 = vadd.f32 %v11375_v45, %v4010_v47  ;;  %4495 = vmatpush.bf16.msrb.mxu0 %v9153_v32  ;;  %v9195_v47 = vld [vmem:[%s12418_s13 + $0x50] sm:$0xff] }
 0x60e   :  { %v3977_v41 = vmul.f32 %v9425_v49, %v3976_v33  ;;  %v3983_v46 = vmul.f32 %v9427_v58, %v11337_v56  ;;  %vm3989_vm5 = vweird.f32 %v9427_v58  ;;  %v9192_v33 = vld [vmem:[%s12418_s13 + $0x38] sm:$0xff] }
 0x60f   :  { %9428 = vrsqrt.f32 %v11378_v25  ;;  %v4026_v43 = vpack.c.bf16 %v4018_v35, %v4018_v35  ;;  %vm3990_vm7 = vmor %vm3988_vm6, %vm3989_vm5  ;;  %vm3998_vm9 = vweird.f32 %v11378_v25  ;;  %v9211_v35 = vld [vmem:[%s12418_s13 + $0xd0] sm:$0xff] }
 0x610   :  { %v3981_v15 = vsel %vm3980_vm4, %v9425_v49, %v3977_v41  ;;  %v3984_v57 = vmul.f32 %v9427_v58, %v3983_v46  ;;  %v9198_v41 = vld [vmem:[%s12418_s13 + $0x68] sm:$0xff]  ;;  %v9185_v46 = vld [vmem:[%s12418_s13] sm:$0xff] }
 0x611   :  { %v4003_v21 = vmul.f32 %v3981_v15, %v11195_v14  ;;  %v9170_v14 = vld [vmem:[%s12417_s12 + $0x188] sm:$0xff]  ;;  %v4164_v49 = vunpack.c.l.b16 %v4026_v43  ;;  %v9204_v15 = vld [vmem:[%s12418_s13 + $0x98] sm:$0xff]  ;;  %v71_v43 = vld [vmem:[%s12448_s7] sm:$0xff] }
 0x612   :  { %v3985_v51 = vmul.f32 0.5, %v3984_v57  ;;  %4628 = vmatpush.bf16.msra.mxu2 %v9170_v14  ;;  %v9212_v57 = vld [vmem:[%s12418_s13 + $0xd8] sm:$0xff]  ;;  %v9206_v14 = vld [vmem:[%s12418_s13 + $0xa8] sm:$0xff] }
 0x613   :  { %v4011_v53 = vmul.f32 %v11356_v29, %v4003_v21  ;;  %v9216_v21 = vld [vmem:[%s12418_s13 + $0xf8] sm:$0xff] }
 0x614   :  { %v3986_v3 = vsub.f32 1.5, %v3985_v51  ;;  %v9207_v51 = vld [vmem:[%s12418_s13 + $0xb0] sm:$0xff] }
 0x615   :  { %v9429_v9 = vpop.eup %9428  ;;  %v4019_v55 = vadd.f32 %v11375_v45, %v4011_v53  ;;  %v9215_v53 = vld [vmem:[%s12418_s13 + $0xf0] sm:$0xff] }
 0x616   :  { %v3987_v7 = vmul.f32 %v9427_v58, %v3986_v3  ;;  %v3993_v18 = vmul.f32 %v9429_v9, %v11378_v25  ;;  %vm3999_vm8 = vweird.f32 %v9429_v9  ;;  %4629 = vmatpush.bf16.msra.mxu2 %v9169_v5  ;;  %v9199_v25 = vld [vmem:[%s12418_s13 + $0x70] sm:$0xff]  ;;  %v9201_v3 = vld [vmem:[%s12418_s13 + $0x80] sm:$0xff]  ;;  %v9220_v5 = vld [vmem:[%s12419_s14 + $0x18] sm:$0xff] }
 0x617   :  { %v4027_v8 = vpack.c.bf16 %v4019_v55, %v4019_v55  ;;  %vm4000_vm10 = vmor %vm3998_vm9, %vm3999_vm8  ;;  %v72_v55 = vld [vmem:[%s12448_s7 + $0x8] sm:$0xff]  ;;  %s12449_s7 = sld [smem:[#allocation9_spill]] }
 0x618   :  { %v3991_v13 = vsel %vm3990_vm7, %v9427_v58, %v3987_v7  ;;  %v3994_v16 = vmul.f32 %v9429_v9, %v3993_v18  ;;  %v9191_v58 = vld [vmem:[%s12418_s13 + $0x30] sm:$0xff]  ;;  %v9205_v7 = vld [vmem:[%s12418_s13 + $0xa0] sm:$0xff]  ;;  %v4031_v32 = vpack.c.bf16 %v72_v55, %v72_v55 }
 0x619   :  { %v4165_v56 = vunpack.c.l.b16 %v4027_v8  ;;  %v4004_v60 = vmul.f32 %v3991_v13, %v11201_v63  ;;  %v9188_v63 = vld [vmem:[%s12418_s13 + $0x18] sm:$0xff]  ;;  %v9213_v18 = vld [vmem:[%s12418_s13 + $0xe0] sm:$0xff]  ;;  %v4030_v8 = vpack.c.bf16 %v71_v43, %v71_v43 }
 0x61a   :  { %v3995_v2 = vmul.f32 0.5, %v3994_v16  ;;  %v4775_v13 = vunpack.c.l.b16 %v4031_v32 }
 0x61b   :  { %v11438_v27 = vpack.c.b16 %v4165_v56, %v4164_v49  ;;  %v4012_v39 = vmul.f32 %v11356_v29, %v4004_v60  ;;  %v4774_v36 = vunpack.c.l.b16 %v4030_v8  ;;  %v9219_v56 = vld [vmem:[%s12419_s14 + $0x10] sm:$0xff] }
 0x61c   :  { %v3996_v12 = vsub.f32 1.5, %v3995_v2 }
 0x61d   :  { %4228 = vmatmul.bf16.vlgmr.msra.gmra.mxu0 %v11438_v27  ;;  %4295 = vmatmul.bf16.vlgmr.msra.gmra.mxu1 %v11438_v27  ;;  %v4020_v62 = vadd.f32 %v11375_v45, %v4012_v39  ;;  %v11566_v16 = vpack.c.b16 %v4775_v13, %v4774_v36 }
 0x61e   :  { %v3997_v59 = vmul.f32 %v9429_v9, %v3996_v12  ;;  %4362 = vmatmul.bf16.vlgmr.msrb.gmra.mxu2 %v11438_v27  ;;  %4429 = vmatmul.bf16.vlgmr.msrb.gmra.mxu3 %v11438_v27  ;;  %v9218_v12 = vld [vmem:[%s12419_s14 + $0x8] sm:$0xff] }
 0x61f   :  { %4809 = vmatpush.bf16.msra.mxu0 %v9188_v63  ;;  %v4028_v44 = vpack.c.bf16 %v4020_v62, %v4020_v62  ;;  %4847 = vmatpush.bf16.msra.mxu1 %v9192_v33  ;;  %v9228_v63 = vld [vmem:[%s12419_s14 + $0x58] sm:$0xff]  ;;  %v9223_v62 = vld [vmem:[%s12419_s14 + $0x30] sm:$0xff] }
 0x620   :  { %v4001_v28 = vsel %vm4000_vm10, %v9429_v9, %v3997_v59  ;;  %v9214_v9 = vld [vmem:[%s12418_s13 + $0xe8] sm:$0xff] }
 0x621   :  { %v4005_v23 = vmul.f32 %v4001_v28, %v11207_v10  ;;  %v4166_v26 = vunpack.c.l.b16 %v4028_v44  ;;  %v9196_v10 = vld [vmem:[%s12418_s13 + $0x58] sm:$0xff]  ;;  %v9231_v44 = vld [vmem:[%s12419_s14 + $0x70] sm:$0xff] }
 0x622   :  { %4885 = vmatpush.bf16.msrb.mxu2 %v9196_v10  ;;  %v9232_v28 = vld [vmem:[%s12419_s14 + $0x78] sm:$0xff]  ;;  %v9226_v10 = vld [vmem:[%s12419_s14 + $0x48] sm:$0xff] }
 0x623   :  { %v4013_v38 = vmul.f32 %v11356_v29, %v4005_v23  ;;  %v9200_v29 = vld [vmem:[%s12418_s13 + $0x78] sm:$0xff]  ;;  %4848 = vmatpush.bf16.msra.mxu1 %v9191_v58  ;;  %v9217_v23 = vld [vmem:[%s12419_s14] sm:$0xff]  ;;  %v9235_v58 = vld [vmem:[%s12419_s14 + $0x90] sm:$0xff] }
 0x624   :  { %4923 = vmatpush.bf16.msrb.mxu3 %v9200_v29  ;;  %v9230_v29 = vld [vmem:[%s12419_s14 + $0x68] sm:$0xff] }
 0x625   :  { %v4021_v6 = vadd.f32 %v11375_v45, %v4013_v38  ;;  %v9187_v45 = vld [vmem:[%s12418_s13 + $0x10] sm:$0xff] }
 0x626   :  { %4810 = vmatpush.bf16.msra.mxu0 %v9187_v45  ;;  %4886 = vmatpush.bf16.msrb.mxu2 %v9195_v47  ;;  %v9227_v38 = vld [vmem:[%s12419_s14 + $0x50] sm:$0xff]  ;;  %v9221_v45 = vld [vmem:[%s12419_s14 + $0x20] sm:$0xff] }
 0x627   :  { %v4029_v40 = vpack.c.bf16 %v4021_v6, %v4021_v6  ;;  %4849 = vmatpush.bf16.msra.mxu1 %v9190_v30  ;;  %v9225_v47 = vld [vmem:[%s12419_s14 + $0x40] sm:$0xff] }
 0x628   :  { %4924 = vmatpush.bf16.msrb.mxu3 %v9199_v25  ;;  %v9229_v25 = vld [vmem:[%s12419_s14 + $0x60] sm:$0xff] }
 0x629   :  { %v4167_v52 = vunpack.c.l.b16 %v4029_v40 }
 0x62a   :  { %4811 = vmatpush.bf16.msra.mxu0 %v9186_v50  ;;  %4887 = vmatpush.bf16.msrb.mxu2 %v9194_v54  ;;  %v9240_v54 = vld [vmem:[%s12419_s14 + $0xb8] sm:$0xff] }
 0x62b   :  { %v11453_v31 = vpack.c.b16 %v4167_v52, %v4166_v26  ;;  %4850 = vmatpush.bf16.msra.mxu1 %v9189_v20  ;;  %v9222_v26 = vld [vmem:[%s12419_s14 + $0x28] sm:$0xff]  ;;  %v9236_v52 = vld [vmem:[%s12419_s14 + $0x98] sm:$0xff] }
 0x62c   :  { %4925 = vmatpush.bf16.msrb.mxu3 %v9198_v41  ;;  %v9234_v41 = vld [vmem:[%s12419_s14 + $0x88] sm:$0xff] }
 0x62d   :  { %4233 = vmatmul.bf16.gmra.mxu0 %v11453_v31  ;;  %4300 = vmatmul.bf16.gmra.mxu1 %v11453_v31 }
 0x62e   :  { %4367 = vmatmul.bf16.gmra.mxu2 %v11453_v31  ;;  %4434 = vmatmul.bf16.gmra.mxu3 %v11453_v31 }
 0x62f   :  { %4812 = vmatpush.bf16.msra.mxu0 %v9185_v46  ;;  %4888 = vmatpush.bf16.msrb.mxu2 %v9193_v24  ;;  %v9244_v24 = vld [vmem:[%s12419_s14 + $0xd8] sm:$0xff] }
 0x630   :  { %4926 = vmatpush.bf16.msrb.mxu3 %v9197_v37  ;;  %v9248_v37 = vld [vmem:[%s12419_s14 + $0xf8] sm:$0xff] }
 0x63d   :  { %4496 = vmatmul.bf16.vlgmr.msrb.gmra.mxu0 %v11438_v27  ;;  %4563 = vmatmul.bf16.vlgmr.msrb.gmra.mxu1 %v11438_v27 }
 0x63e   :  { %4630 = vmatmul.bf16.vlgmr.msra.gmra.mxu2 %v11438_v27  ;;  %4697 = vmatmul.bf16.vlgmr.msra.gmra.mxu3 %v11438_v27  ;;  %v9224_v27 = vld [vmem:[%s12419_s14 + $0x38] sm:$0xff] }
 0x63f   :  { %4961 = vmatpush.bf16.msrb.mxu0 %v9204_v15  ;;  %5037 = vmatpush.bf16.msra.mxu2 %v9212_v57  ;;  %v9239_v15 = vld [vmem:[%s12419_s14 + $0xb0] sm:$0xff]  ;;  %v9233_v57 = vld [vmem:[%s12419_s14 + $0x80] sm:$0xff] }
 0x640   :  { %4999 = vmatpush.bf16.msrb.mxu1 %v9208_v42  ;;  %5075 = vmatpush.bf16.msra.mxu3 %v9216_v21  ;;  %v9243_v42 = vld [vmem:[%s12419_s14 + $0xd0] sm:$0xff] }
 0x643   :  { %4962 = vmatpush.bf16.msrb.mxu0 %v9203_v4  ;;  %5038 = vmatpush.bf16.msra.mxu2 %v9211_v35  ;;  %v9247_v4 = vld [vmem:[%s12419_s14 + $0xf0] sm:$0xff] }
 0x644   :  { %5000 = vmatpush.bf16.msrb.mxu1 %v9207_v51  ;;  %5076 = vmatpush.bf16.msra.mxu3 %v9215_v53  ;;  %v9238_v51 = vld [vmem:[%s12419_s14 + $0xa8] sm:$0xff] }
 0x647   :  { %4963 = vmatpush.bf16.msrb.mxu0 %v9202_v19  ;;  %5039 = vmatpush.bf16.msra.mxu2 %v9210_v61  ;;  %v9242_v61 = vld [vmem:[%s12419_s14 + $0xc8] sm:$0xff] }
 0x648   :  { %5001 = vmatpush.bf16.msrb.mxu1 %v9206_v14  ;;  %5077 = vmatpush.bf16.msra.mxu3 %v9214_v9  ;;  %v9237_v14 = vld [vmem:[%s12419_s14 + $0xa0] sm:$0xff] }
 0x649   :  { %v9245_v9 = vld [vmem:[%s12419_s14 + $0xe0] sm:$0xff] }
 0x64b   :  { %4964 = vmatpush.bf16.msrb.mxu0 %v9201_v3  ;;  %5040 = vmatpush.bf16.msra.mxu2 %v9209_v1  ;;  %v9246_v3 = vld [vmem:[%s12419_s14 + $0xe8] sm:$0xff]  ;;  %v9241_v1 = vld [vmem:[%s12419_s14 + $0xc0] sm:$0xff] }
 0x64c   :  { %5002 = vmatpush.bf16.msrb.mxu1 %v9205_v7  ;;  %5078 = vmatpush.bf16.msra.mxu3 %v9213_v18 }
 0x64d   :  { %4501 = vmatmul.bf16.gmra.mxu0 %v11453_v31  ;;  %4568 = vmatmul.bf16.gmra.mxu1 %v11453_v31 }
 0x64e   :  { %4635 = vmatmul.bf16.gmra.mxu2 %v11453_v31  ;;  %4702 = vmatmul.bf16.gmra.mxu3 %v11453_v31 }
 0x65d   :  { %8531 = vmatmul.msk.bf16.vlgmr.msra.gmra.mxu0 %vm4801_vm11, %v11566_v16  ;;  %8548 = vmatmul.msk.bf16.vlgmr.msra.gmra.mxu1 %vm4801_vm11, %v11566_v16 }
 0x65e   :  { %8565 = vmatmul.msk.bf16.vlgmr.msrb.gmra.mxu2 %vm4801_vm11, %v11566_v16  ;;  %8582 = vmatmul.msk.bf16.vlgmr.msrb.gmra.mxu3 %vm4801_vm11, %v11566_v16 }
 0x65f   :  { %5177 = vmatpush.bf16.msra.mxu0 %v9220_v5  ;;  %5215 = vmatpush.bf16.msra.mxu1 %v9224_v27 }
 0x660   :  { %5253 = vmatpush.bf16.msrb.mxu2 %v9228_v63  ;;  %5291 = vmatpush.bf16.msrb.mxu3 %v9232_v28 }
 0x663   :  { %5178 = vmatpush.bf16.msra.mxu0 %v9219_v56  ;;  %5216 = vmatpush.bf16.msra.mxu1 %v9223_v62 }
 0x664   :  { %5254 = vmatpush.bf16.msrb.mxu2 %v9227_v38  ;;  %5292 = vmatpush.bf16.msrb.mxu3 %v9231_v44 }
 0x667   :  { %5179 = vmatpush.bf16.msra.mxu0 %v9218_v12  ;;  %5217 = vmatpush.bf16.msra.mxu1 %v9222_v26 }
 0x668   :  { %5255 = vmatpush.bf16.msrb.mxu2 %v9226_v10  ;;  %5293 = vmatpush.bf16.msrb.mxu3 %v9230_v29 }
 0x66b   :  { %5180 = vmatpush.bf16.msra.mxu0 %v9217_v23  ;;  %5218 = vmatpush.bf16.msra.mxu1 %v9221_v45 }
 0x66c   :  { %5256 = vmatpush.bf16.msrb.mxu2 %v9225_v47  ;;  %5294 = vmatpush.bf16.msrb.mxu3 %v9229_v25 }
 0x66d   :  { %8599 = vmatmul.msk.bf16.vlgmr.msrb.gmra.mxu0 %vm4801_vm11, %v11566_v16  ;;  %8616 = vmatmul.msk.bf16.vlgmr.msrb.gmra.mxu1 %vm4801_vm11, %v11566_v16 }
 0x66e   :  { %8633 = vmatmul.msk.bf16.vlgmr.msra.gmra.mxu2 %vm4801_vm11, %v11566_v16  ;;  %8650 = vmatmul.msk.bf16.vlgmr.msra.gmra.mxu3 %vm4801_vm11, %v11566_v16 }
 0x66f   :  { %5329 = vmatpush.bf16.msrb.mxu0 %v9236_v52  ;;  %5367 = vmatpush.bf16.msrb.mxu1 %v9240_v54 }
 0x670   :  { %5405 = vmatpush.bf16.msra.mxu2 %v9244_v24  ;;  %5443 = vmatpush.bf16.msra.mxu3 %v9248_v37 }
 0x673   :  { %5330 = vmatpush.bf16.msrb.mxu0 %v9235_v58  ;;  %5368 = vmatpush.bf16.msrb.mxu1 %v9239_v15 }
 0x674   :  { %5406 = vmatpush.bf16.msra.mxu2 %v9243_v42  ;;  %5444 = vmatpush.bf16.msra.mxu3 %v9247_v4 }
 0x677   :  { %5331 = vmatpush.bf16.msrb.mxu0 %v9234_v41  ;;  %5369 = vmatpush.bf16.msrb.mxu1 %v9238_v51 }
 0x678   :  { %5407 = vmatpush.bf16.msra.mxu2 %v9242_v61  ;;  %5445 = vmatpush.bf16.msra.mxu3 %v9246_v3 }
 0x67b   :  { %5332 = vmatpush.bf16.msrb.mxu0 %v9233_v57  ;;  %5370 = vmatpush.bf16.msrb.mxu1 %v9237_v14 }
 0x67c   :  { %5408 = vmatpush.bf16.msra.mxu2 %v9241_v1  ;;  %5446 = vmatpush.bf16.msra.mxu3 %v9245_v9 }
 0x67d   :  { %8667 = vmatmul.msk.bf16.vlgmr.msra.gmra.mxu0 %vm4801_vm11, %v11566_v16  ;;  %8684 = vmatmul.msk.bf16.vlgmr.msra.gmra.mxu1 %vm4801_vm11, %v11566_v16 }
 0x67e   :  { %8701 = vmatmul.msk.bf16.vlgmr.msrb.gmra.mxu2 %vm4801_vm11, %v11566_v16  ;;  %8718 = vmatmul.msk.bf16.vlgmr.msrb.gmra.mxu3 %vm4801_vm11, %v11566_v16 }
 0x68d   :  { %8735 = vmatmul.msk.bf16.vlgmr.msrb.gmra.mxu0 %vm4801_vm11, %v11566_v16  ;;  %8752 = vmatmul.msk.bf16.vlgmr.msrb.gmra.mxu1 %vm4801_vm11, %v11566_v16 }
 0x68e   :  { %8769 = vmatmul.msk.bf16.vlgmr.msra.gmra.mxu2 %vm4801_vm11, %v11566_v16  ;;  %8786 = vmatmul.msk.bf16.vlgmr.msra.gmra.mxu3 %vm4801_vm11, %v11566_v16 }
 0x69a   :  { %v11587_v22 = vpop.f32.mrf.mxu0  ;;  %v11589_v49 = vpop.f32.mrf.mxu1 }
 0x69b   :  { %v5453_v4 = vpack.c.bf16 %v11587_v22, %v11587_v22  ;;  %v5457_v51 = vpack.c.bf16 %v11589_v49, %v11589_v49 }
 0x69d   :  { %v5548_v49 = vunpack.c.l.b16 %v5457_v51 }
 0x6a1   :  { %v11594_v60 = vpop.f32.mrf.mxu2  ;;  %v11596_v2 = vpop.f32.mrf.mxu3 }
 0x6a2   :  { %v11604_v39 = vpop.f32.mrf.mxu0  ;;  %v11606_v59 = vpop.f32.mrf.mxu1 }
 0x6a3   :  { %v5454_v41 = vpack.c.bf16 %v11604_v39, %v11604_v39  ;;  %v5458_v24 = vpack.c.bf16 %v11606_v59, %v11606_v59 }
 0x6a9   :  { %v11626_v6 = vpop.f32.mrf.mxu2  ;;  %v11628_v40 = vpop.f32.mrf.mxu3 }
 0x6aa   :  { %v11636_v31 = vpop.f32.mrf.mxu0  ;;  %v11638_v33 = vpop.f32.mrf.mxu1 }
 0x6b1   :  { %v11660_v50 = vpop.f32.mrf.mxu2  ;;  %v11662_v30 = vpop.f32.mrf.mxu3 }
 0x6b2   :  { %v11670_v46 = vpop.f32.mrf.mxu0  ;;  %v11672_v20 = vpop.f32.mrf.mxu1 }
 0x6b9   :  { %v11698_v35 = vpop.f32.mrf.mxu2  ;;  %v11700_v21 = vpop.f32.mrf.mxu3 }
 0x6ba   :  { %v11705_v53 = vpop.f32.mrf.mxu0  ;;  %v11707_v19 = vpop.f32.mrf.mxu1 }
 0x6c1   :  { %v11726_v43 = vpop.f32.mrf.mxu2  ;;  %v11728_v55 = vpop.f32.mrf.mxu3 }
 0x6c2   :  { %v11730_v7 = vpop.f32.mrf.mxu0  ;;  %v11732_v18 = vpop.f32.mrf.mxu1 }
 0x6c9   :  { %v11740_v8 = vpop.f32.mrf.mxu2  ;;  %v11742_v32 = vpop.f32.mrf.mxu3 }
 0x6ca   :  { %v11744_v36 = vpop.f32.mrf.mxu0  ;;  %v11746_v13 = vpop.f32.mrf.mxu1 }
 0x6d1   :  { %v11748_v5 = vpop.f32.mrf.mxu2  ;;  %v11750_v56 = vpop.f32.mrf.mxu3 }
 0x6d2   :  { %v11752_v27 = vpop.f32.mrf.mxu0  ;;  %v11754_v12 = vpop.f32.mrf.mxu1 }
 0x6d9   :  { %v11756_v63 = vpop.f32.mrf.mxu2  ;;  %v11758_v28 = vpop.f32.mrf.mxu3 }
 0x6da   :  { %v4814_v16 = vpop.f32.mrf.mxu0  ;;  %v4852_v62 = vpop.f32.mrf.mxu1 }
 0x6db   :  { %v5487_v23 = vpack.c.bf16 %v4852_v62, %v4852_v62  ;;  %v5485_v38 = vpack.c.bf16 %v4814_v16, %v4814_v16  ;;  %v5506_v62 = vunpack.c.l.b16 %v5454_v41 }
 0x6dd   :  { %v5556_v29 = vunpack.c.l.b16 %v5487_v23  ;;  %v5513_v47 = vunpack.c.l.b16 %v5485_v38  ;;  %v5549_v23 = vunpack.c.l.b16 %v5458_v24 }
 0x6e1   :  { %v4890_v44 = vpop.f32.mrf.mxu2  ;;  %v4928_v26 = vpop.f32.mrf.mxu3 }
 0x6e2   :  { %v4816_v52 = vpop.f32.mrf.mxu0  ;;  %v4854_v10 = vpop.f32.mrf.mxu1  ;;  %v5489_v57 = vpack.c.bf16 %v4890_v44, %v4890_v44  ;;  %v5491_v42 = vpack.c.bf16 %v4928_v26, %v4928_v26 }
 0x6e3   :  { %v5486_v45 = vpack.c.bf16 %v4816_v52, %v4816_v52  ;;  %v5488_v58 = vpack.c.bf16 %v4854_v10, %v4854_v10  ;;  %v5505_v52 = vunpack.c.l.b16 %v5453_v4  ;;  %v5462_v10 = vpack.c.bf16 %v11626_v6, %v11626_v6 }
 0x6e4   :  { %v5599_v38 = vunpack.c.l.b16 %v5489_v57  ;;  %v5642_v44 = vunpack.c.l.b16 %v5491_v42 }
 0x6e5   :  { %v5514_v25 = vunpack.c.l.b16 %v5486_v45  ;;  %v5557_v54 = vunpack.c.l.b16 %v5488_v58  ;;  %v5509_v24 = vpack.c.b16 %v5506_v62, %v5505_v52  ;;  %v5592_v42 = vunpack.c.l.b16 %v5462_v10 }
 0x6e6   :  { %v5460_v52 = vpack.c.bf16 %v11672_v20, %v11672_v20  ;;  %v5459_v10 = vpack.c.bf16 %v11638_v33, %v11638_v33  ;;  %v5464_v33 = vpack.c.bf16 %v11698_v35, %v11698_v35 }
 0x6e7   :  { %v5515_v37 = vpack.c.b16 %v5514_v25, %v5513_v47  ;;  %v5558_v15 = vpack.c.b16 %v5557_v54, %v5556_v29  ;;  %v5466_v29 = vpack.c.bf16 %v11628_v40, %v11628_v40  ;;  %v5461_v47 = vpack.c.bf16 %v11594_v60, %v11594_v60 }
 0x6e8   :  { %v5465_v25 = vpack.c.bf16 %v11596_v2, %v11596_v2  ;;  %v5594_v35 = vunpack.c.l.b16 %v5464_v33 }
 0x6e9   :  { %v4892_v61 = vpop.f32.mrf.mxu2  ;;  %v4930_v3 = vpop.f32.mrf.mxu3  ;;  %v5523_v14 = vsel %vm2272_vm13, %v5515_v37, 0  ;;  %v5566_v1 = vsel %vm2272_vm13, %v5558_v15, 0  ;;  %v5552_v37 = vpack.c.b16 %v5549_v23, %v5548_v49  ;;  %v5635_v4 = vunpack.c.l.b16 %v5466_v29 }
 0x6ea   :  { %v5490_v39 = vpack.c.bf16 %v4892_v61, %v4892_v61  ;;  %v5492_v9 = vpack.c.bf16 %v4930_v3, %v4930_v3  ;;  %5532 = vmatpush.bf16.xpose.msra.mxu0 %v5523_v14  ;;  %5575 = vmatpush.bf16.xpose.msra.mxu1 %v5566_v1  ;;  %v4966_v59 = vpop.f32.mrf.mxu0  ;;  %v5004_v16 = vpop.f32.mrf.mxu1  ;;  %v5591_v1 = vunpack.c.l.b16 %v5461_v47  ;;  %v5455_v49 = vpack.c.bf16 %v11636_v31, %v11636_v31 }
 0x6eb   :  { %v5493_v54 = vpack.c.bf16 %v4966_v59, %v4966_v59  ;;  %v5495_v41 = vpack.c.bf16 %v5004_v16, %v5004_v16 }
 0x6ec   :  { %v5600_v22 = vunpack.c.l.b16 %v5490_v39  ;;  %v5643_v26 = vunpack.c.l.b16 %v5492_v9  ;;  %v5634_v39 = vunpack.c.l.b16 %v5465_v25  ;;  %v5595_v16 = vpack.c.b16 %v5592_v42, %v5591_v1 }
 0x6ed   :  { %v5685_v51 = vunpack.c.l.b16 %v5493_v54  ;;  %v5728_v3 = vunpack.c.l.b16 %v5495_v41  ;;  %v5507_v31 = vunpack.c.l.b16 %v5455_v49 }
 0x6ee   :  { %v5601_v45 = vpack.c.b16 %v5600_v22, %v5599_v38  ;;  %v5644_v58 = vpack.c.b16 %v5643_v26, %v5642_v44  ;;  %v5638_v62 = vpack.c.b16 %v5635_v4, %v5634_v39  ;;  %v5456_v26 = vpack.c.bf16 %v11670_v46, %v11670_v46 }
 0x6ef   :  { %v5463_v4 = vpack.c.bf16 %v11660_v50, %v11660_v50 }
 0x6f0   :  { %v5609_v15 = vsel %vm2272_vm13, %v5601_v45, 0  ;;  %v5652_v57 = vsel %vm2272_vm13, %v5644_v58, 0  ;;  %v5508_v41 = vunpack.c.l.b16 %v5456_v26  ;;  %v5481_v26 = vpack.c.bf16 %v11728_v55, %v11728_v55 }
 0x6f1   :  { %5618 = vmatpush.bf16.xpose.msrb.mxu2 %v5609_v15  ;;  %5661 = vmatpush.bf16.xpose.msrb.mxu3 %v5652_v57  ;;  %v5042_v6 = vpop.f32.mrf.mxu2  ;;  %v5080_v40 = vpop.f32.mrf.mxu3  ;;  %v5550_v57 = vunpack.c.l.b16 %v5459_v10  ;;  %v5471_v55 = vpack.c.bf16 %v11744_v36, %v11744_v36 }
 0x6f2   :  { %8787 = vmatmul.msk.bf16.vlgmr.msra.gmra.mxu0 %vm2272_vm13, %v5509_v24  ;;  %8789 = vmatmul.msk.bf16.vlgmr.msra.gmra.mxu1 %vm2272_vm13, %v5552_v37  ;;  %v4968_v60 = vpop.f32.mrf.mxu0  ;;  %v5006_v2 = vpop.f32.mrf.mxu1  ;;  %v5497_v23 = vpack.c.bf16 %v5042_v6, %v5042_v6  ;;  %v5499_v38 = vpack.c.bf16 %v5080_v40, %v5080_v40  ;;  %v5551_v24 = vunpack.c.l.b16 %v5460_v52  ;;  %v5468_v6 = vpack.c.bf16 %v11700_v21, %v11700_v21 }
 0x6f3   :  { %v5494_v61 = vpack.c.bf16 %v4968_v60, %v4968_v60  ;;  %v5496_v14 = vpack.c.bf16 %v5006_v2, %v5006_v2  ;;  %v5467_v60 = vpack.c.bf16 %v11662_v30, %v11662_v30  ;;  %v5510_v2 = vpack.c.b16 %v5508_v41, %v5507_v31 }
 0x6f4   :  { %v5771_v46 = vunpack.c.l.b16 %v5497_v23  ;;  %v5814_v25 = vunpack.c.l.b16 %v5499_v38  ;;  %v5593_v21 = vunpack.c.l.b16 %v5463_v4  ;;  %v5470_v30 = vpack.c.bf16 %v11730_v7, %v11730_v7 }
 0x6f5   :  { %v5686_v9 = vunpack.c.l.b16 %v5494_v61  ;;  %v5729_v59 = vunpack.c.l.b16 %v5496_v14  ;;  %v5637_v14 = vunpack.c.l.b16 %v5468_v6  ;;  %v5636_v1 = vunpack.c.l.b16 %v5467_v60 }
 0x6f6   :  { %v5596_v50 = vpack.c.b16 %v5594_v35, %v5593_v21  ;;  %v5478_v7 = vpack.c.bf16 %v11740_v8, %v11740_v8  ;;  %v5483_v41 = vpack.c.bf16 %v11750_v56, %v11750_v56 }
 0x6f7   :  { %v5687_v44 = vpack.c.b16 %v5686_v9, %v5685_v51  ;;  %v5730_v22 = vpack.c.b16 %v5729_v59, %v5728_v3  ;;  %v5553_v51 = vpack.c.b16 %v5551_v24, %v5550_v57  ;;  %v5639_v39 = vpack.c.b16 %v5637_v14, %v5636_v1 }
 0x6f8   :  { %8791 = vmatmul.msk.bf16.vlgmr.msrb.gmra.mxu2 %vm2272_vm13, %v5595_v16  ;;  %8793 = vmatmul.msk.bf16.vlgmr.msrb.gmra.mxu3 %vm2272_vm13, %v5638_v62  ;;  %v5474_v9 = vpack.c.bf16 %v11732_v18, %v11732_v18  ;;  %v5469_v59 = vpack.c.bf16 %v11705_v53, %v11705_v53  ;;  %v5473_v16 = vpack.c.bf16 %v11707_v19, %v11707_v19  ;;  %v5678_v62 = vunpack.c.l.b16 %v5470_v30 }
 0x6f9   :  { %v5695_v29 = vsel %vm2272_vm13, %v5687_v44, 0  ;;  %v5044_v45 = vpop.f32.mrf.mxu2  ;;  %v5082_v58 = vpop.f32.mrf.mxu3  ;;  %v5738_v47 = vsel %vm2272_vm13, %v5730_v22, 0  ;;  %v5482_v18 = vpack.c.bf16 %v11742_v32, %v11742_v32  ;;  %v5477_v22 = vpack.c.bf16 %v11726_v43, %v11726_v43 }
 0x6fa   :  { %5704 = vmatpush.bf16.xpose.msrb.mxu0 %v5695_v29  ;;  %v5498_v20 = vpack.c.bf16 %v5044_v45, %v5044_v45  ;;  %v5500_v54 = vpack.c.bf16 %v5082_v58, %v5082_v58  ;;  %5747 = vmatpush.bf16.xpose.msrb.mxu1 %v5738_v47  ;;  %v5721_v23 = vunpack.c.l.b16 %v5474_v9  ;;  %v5677_v38 = vunpack.c.l.b16 %v5469_v59  ;;  %v5182_v33 = vpop.f32.mrf.mxu0 }
 0x6fb   :  { %v5720_v44 = vunpack.c.l.b16 %v5473_v16  ;;  %v5764_v49 = vunpack.c.l.b16 %v5478_v7  ;;  %v5807_v19 = vunpack.c.l.b16 %v5482_v18  ;;  %v5763_v10 = vunpack.c.l.b16 %v5477_v22 }
 0x6fc   :  { %v5772_v37 = vunpack.c.l.b16 %v5498_v20  ;;  %v5815_v15 = vunpack.c.l.b16 %v5500_v54  ;;  %v5681_v53 = vpack.c.b16 %v5678_v62, %v5677_v38  ;;  %v5806_v29 = vunpack.c.l.b16 %v5481_v26 }
 0x6fd   :  { %v5724_v52 = vpack.c.b16 %v5721_v23, %v5720_v44  ;;  %v5767_v8 = vpack.c.b16 %v5764_v49, %v5763_v10  ;;  %v5472_v32 = vpack.c.bf16 %v11752_v27, %v11752_v27  ;;  %v5476_v43 = vpack.c.bf16 %v11754_v12, %v11754_v12 }
 0x6fe   :  { %v5773_v40 = vpack.c.b16 %v5772_v37, %v5771_v46  ;;  %v5816_v42 = vpack.c.b16 %v5815_v15, %v5814_v25  ;;  %v5810_v45 = vpack.c.b16 %v5807_v19, %v5806_v29  ;;  %v5475_v58 = vpack.c.bf16 %v11746_v13, %v11746_v13 }
 0x6ff   :  { %v5680_v47 = vunpack.c.l.b16 %v5472_v32  ;;  %v5723_v46 = vunpack.c.l.b16 %v5476_v43  ;;  %v5679_v25 = vunpack.c.l.b16 %v5471_v55  ;;  %v5480_v27 = vpack.c.bf16 %v11756_v63, %v11756_v63 }
 0x700   :  { %v5781_v61 = vsel %vm2272_vm13, %v5773_v40, 0  ;;  %v5824_v3 = vsel %vm2272_vm13, %v5816_v42, 0  ;;  %v5722_v20 = vunpack.c.l.b16 %v5475_v58  ;;  %v5484_v12 = vpack.c.bf16 %v11758_v28, %v11758_v28  ;;  %v5220_v28 = vpop.f32.mrf.mxu1 }
 0x701   :  { %5790 = vmatpush.bf16.xpose.msra.mxu2 %v5781_v61  ;;  %5833 = vmatpush.bf16.xpose.msra.mxu3 %v5824_v3  ;;  %v5479_v54 = vpack.c.bf16 %v11748_v5, %v11748_v5  ;;  %v5682_v36 = vpack.c.b16 %v5680_v47, %v5679_v25  ;;  %v5766_v37 = vunpack.c.l.b16 %v5480_v27  ;;  %v5808_v31 = vunpack.c.l.b16 %v5483_v41  ;;  %v5296_v35 = vpop.f32.mrf.mxu3 }
 0x702   :  { %8788 = vmatmul.msk.bf16.gmra.mxu0 %vm2272_vm13, %v5510_v2  ;;  %8790 = vmatmul.msk.bf16.gmra.mxu1 %vm2272_vm13, %v5553_v51  ;;  %v5725_v24 = vpack.c.b16 %v5723_v46, %v5722_v20  ;;  %v5809_v13 = vunpack.c.l.b16 %v5484_v12  ;;  %v6293_v5 = vpack.c.bf16 %v5182_v33, %v5182_v33  ;;  %v5184_v56 = vpop.f32.mrf.mxu0  ;;  %v6295_v4 = vpack.c.bf16 %v5220_v28, %v5220_v28  ;;  %v5258_v51 = vpop.f32.mrf.mxu2 }
 0x703   :  { %v5765_v15 = vunpack.c.l.b16 %v5479_v54  ;;  %v6294_v40 = vpack.c.bf16 %v5184_v56, %v5184_v56 }
 0x704   :  { %v5811_v57 = vpack.c.b16 %v5809_v13, %v5808_v31  ;;  %v6321_v6 = vunpack.c.l.b16 %v6293_v5  ;;  %v6362_v61 = vunpack.c.l.b16 %v6295_v4 }
 0x705   :  { %v5768_v63 = vpack.c.b16 %v5766_v37, %v5765_v15  ;;  %v6322_v42 = vunpack.c.l.b16 %v6294_v40 }
 0x707   :  { %v6323_v60 = vpack.c.b16 %v6322_v42, %v6321_v6 }
 0x708   :  { %8792 = vmatmul.msk.bf16.gmra.mxu2 %vm2272_vm13, %v5596_v50  ;;  %8794 = vmatmul.msk.bf16.gmra.mxu3 %vm2272_vm13, %v5639_v39  ;;  %v5222_v2 = vpop.f32.mrf.mxu1  ;;  %v6297_v50 = vpack.c.bf16 %v5258_v51, %v5258_v51  ;;  %v6299_v39 = vpack.c.bf16 %v5296_v35, %v5296_v35 }
 0x709   :  { %6338 = vmatpush.bf16.msra.mxu0 %v6323_v60  ;;  %v6296_v3 = vpack.c.bf16 %v5222_v2, %v5222_v2  ;;  %v5298_v23 = vpop.f32.mrf.mxu3  ;;  %v11866_v60 = vld [vmem:[%s12449_s7 + $0x8] sm:$0xff] }
 0x70a   :  { %v5334_v14 = vpop.f32.mrf.mxu0  ;;  %v5260_v59 = vpop.f32.mrf.mxu2  ;;  %v6403_v16 = vunpack.c.l.b16 %v6297_v50  ;;  %v6444_v44 = vunpack.c.l.b16 %v6299_v39  ;;  %v6300_v18 = vpack.c.bf16 %v5298_v23, %v5298_v23 }
 0x70b   :  { %v6363_v21 = vunpack.c.l.b16 %v6296_v3  ;;  %v6301_v30 = vpack.c.bf16 %v5334_v14, %v5334_v14  ;;  %v6298_v62 = vpack.c.bf16 %v5260_v59, %v5260_v59 }
 0x70d   :  { %v6364_v1 = vpack.c.b16 %v6363_v21, %v6362_v61  ;;  %v6485_v7 = vunpack.c.l.b16 %v6301_v30  ;;  %v6404_v26 = vunpack.c.l.b16 %v6298_v62 }
 0x70f   :  { %6379 = vmatpush.bf16.msra.mxu1 %v6364_v1  ;;  %v6405_v19 = vpack.c.b16 %v6404_v26, %v6403_v16 }
 0x710   :  { %v5372_v9 = vpop.f32.mrf.mxu1 }
 0x711   :  { %v6303_v49 = vpack.c.bf16 %v5372_v9, %v5372_v9  ;;  %6420 = vmatpush.bf16.msrb.mxu2 %v6405_v19  ;;  %v5448_v55 = vpop.f32.mrf.mxu3 }
 0x712   :  { %8795 = vmatmul.msk.bf16.vlgmr.msrb.gmra.mxu0 %vm2272_vm13, %v5681_v53  ;;  %8797 = vmatmul.msk.bf16.vlgmr.msrb.gmra.mxu1 %vm2272_vm13, %v5724_v52  ;;  %v5336_v38 = vpop.f32.mrf.mxu0  ;;  %v6445_v53 = vunpack.c.l.b16 %v6300_v18  ;;  %v6307_v25 = vpack.c.bf16 %v5448_v55, %v5448_v55 }
 0x713   :  { %v6302_v22 = vpack.c.bf16 %v5336_v38, %v5336_v38  ;;  %v6526_v32 = vunpack.c.l.b16 %v6303_v49  ;;  %v11889_v38 = vld [vmem:[%s12449_s7 + $0x10] sm:$0xff] }
 0x714   :  { %v6446_v10 = vpack.c.b16 %v6445_v53, %v6444_v44  ;;  %v6608_v41 = vunpack.c.l.b16 %v6307_v25 }
 0x715   :  { %v6486_v52 = vunpack.c.l.b16 %v6302_v22 }
 0x716   :  { %6461 = vmatpush.bf16.msrb.mxu3 %v6446_v10 }
 0x717   :  { %v6487_v29 = vpack.c.b16 %v6486_v52, %v6485_v7 }
 0x718   :  { %8799 = vmatmul.msk.bf16.vlgmr.msra.gmra.mxu2 %vm2272_vm13, %v5767_v8  ;;  %8801 = vmatmul.msk.bf16.vlgmr.msra.gmra.mxu3 %vm2272_vm13, %v5810_v45  ;;  %v5374_v8 = vpop.f32.mrf.mxu1  ;;  %v5410_v45 = vpop.f32.mrf.mxu2 }
 0x719   :  { %6502 = vmatpush.bf16.msrb.mxu0 %v6487_v29  ;;  %v6304_v43 = vpack.c.bf16 %v5374_v8, %v5374_v8  ;;  %v6305_v46 = vpack.c.bf16 %v5410_v45, %v5410_v45  ;;  %v5450_v54 = vpop.f32.mrf.mxu3 }
 0x71b   :  { %v6527_v58 = vunpack.c.l.b16 %v6304_v43  ;;  %v6567_v27 = vunpack.c.l.b16 %v6305_v46  ;;  %v11909_v43 = vld [vmem:[%s12449_s7 + $0x18] sm:$0xff] }
 0x71d   :  { %v6528_v47 = vpack.c.b16 %v6527_v58, %v6526_v32 }
 0x71f   :  { %6543 = vmatpush.bf16.msrb.mxu1 %v6528_v47 }
 0x720   :  { %v5412_v20 = vpop.f32.mrf.mxu2 }
 0x721   :  { %v6306_v12 = vpack.c.bf16 %v5412_v20, %v5412_v20 }
 0x722   :  { %8796 = vmatmul.msk.bf16.gmra.mxu0 %vm2272_vm13, %v5682_v36  ;;  %8798 = vmatmul.msk.bf16.gmra.mxu1 %vm2272_vm13, %v5725_v24  ;;  %v6308_v36 = vpack.c.bf16 %v5450_v54, %v5450_v54 }
 0x723   :  { %v6568_v24 = vunpack.c.l.b16 %v6306_v12 }
 0x724   :  { %v6609_v37 = vunpack.c.l.b16 %v6308_v36 }
 0x725   :  { %v6569_v13 = vpack.c.b16 %v6568_v24, %v6567_v27 }
 0x726   :  { %v6610_v15 = vpack.c.b16 %v6609_v37, %v6608_v41 }
 0x727   :  { %6584 = vmatpush.bf16.msra.mxu2 %v6569_v13 }
 0x728   :  { %8800 = vmatmul.msk.bf16.gmra.mxu2 %vm2272_vm13, %v5768_v63  ;;  %8802 = vmatmul.msk.bf16.gmra.mxu3 %vm2272_vm13, %v5811_v57  ;;  %v11851_v57 = vld [vmem:[%s12449_s7] sm:$0xff]  ;;  %s7399_s7 = sshll.u32 %s12425_s20, 4  ;;  %s7400_s7 = int_to_ptr.hbm [resolvable:$true] %s7399_s7 }
 0x729   :  { %6625 = vmatpush.bf16.msra.mxu3 %v6610_v15 }
 0x76f   :  { %v5534_v31 = vpop.f32.mrf.mxu0  ;;  %v5577_v63 = vpop.f32.mrf.mxu1 }
 0x770   :  { %v5845_v33 = vmul.f32 0.25, %v5534_v31  ;;  %v5849_v5 = vmul.f32 0.25, %v5577_v63 }
 0x772   :  { %v11854_v28 = vadd.f32 %v5849_v5, %v11851_v57  ;;  %v11857_v56 = vadd.f32 %v5845_v33, %v11851_v57 }
 0x774   :  { %v5921_v6 = vsel %vm2272_vm13, %v11854_v28, -inf  ;;  %v5909_v40 = vsel %vm2272_vm13, %v11857_v56, -inf }
 0x775   :  { %5922 = vmax.xlane.f32.xlu2 %v5921_v6  ;;  %5910 = vmax.xlane.f32.xlu0 %v5909_v40 }
 0x777   :  { %v5536_v42 = vpop.f32.mrf.mxu0  ;;  %v5579_v4 = vpop.f32.mrf.mxu1 }
 0x778   :  { %v5846_v2 = vmul.f32 0.25, %v5536_v42  ;;  %v5850_v51 = vmul.f32 0.25, %v5579_v4 }
 0x77a   :  { %v11869_v61 = vadd.f32 %v5850_v51, %v11866_v60  ;;  %v11872_v3 = vadd.f32 %v5846_v2, %v11866_v60 }
 0x77b   :  { %v5620_v35 = vpop.f32.mrf.mxu2  ;;  %v5663_v14 = vpop.f32.mrf.mxu3 }
 0x77c   :  { %v5853_v21 = vmul.f32 0.25, %v5620_v35  ;;  %v5857_v1 = vmul.f32 0.25, %v5663_v14  ;;  %v5924_v50 = vsel %vm2272_vm13, %v11869_v61, -inf  ;;  %v5912_v39 = vsel %vm2272_vm13, %v11872_v3, -inf }
 0x77d   :  { %5925 = vmax.xlane.f32.xlu0 %v5924_v50  ;;  %5913 = vmax.xlane.f32.xlu1 %v5912_v39 }
 0x77e   :  { %v11879_v30 = vadd.f32 %v5853_v21, %v11851_v57  ;;  %v11884_v23 = vadd.f32 %v5857_v1, %v11851_v57 }
 0x77f   :  { %v5539_v9 = vpop.f32.mrf.mxu0  ;;  %v5582_v59 = vpop.f32.mrf.mxu1 }
 0x780   :  { %v5847_v16 = vmul.f32 0.25, %v5539_v9  ;;  %v5933_v62 = vsel %vm2272_vm13, %v11879_v30, -inf  ;;  %v5851_v44 = vmul.f32 0.25, %v5582_v59  ;;  %v5945_v26 = vsel %vm2272_vm13, %v11884_v23, -inf }
 0x781   :  { %5934 = vmax.xlane.f32.xlu2 %v5933_v62 }
 0x782   :  { %v11894_v53 = vadd.f32 %v5847_v16, %v11889_v38  ;;  %v11900_v10 = vadd.f32 %v5851_v44, %v11889_v38 }
 0x783   :  { %v5622_v7 = vpop.f32.mrf.mxu2  ;;  %v5665_v18 = vpop.f32.mrf.mxu3 }
 0x784   :  { %v5854_v22 = vmul.f32 0.25, %v5622_v7  ;;  %v5858_v29 = vmul.f32 0.25, %v5665_v18  ;;  %v5915_v32 = vsel %vm2272_vm13, %v11894_v53, -inf  ;;  %v5927_v46 = vsel %vm2272_vm13, %v11900_v10, -inf }
 0x785   :  { %5946 = vmax.xlane.f32.xlu1 %v5945_v26 }
 0x786   :  { %v11897_v52 = vadd.f32 %v5854_v22, %v11866_v60  ;;  %v11914_v25 = vadd.f32 %v5858_v29, %v11866_v60 }
 0x787   :  { %v5541_v49 = vpop.f32.mrf.mxu0  ;;  %v5584_v19 = vpop.f32.mrf.mxu1 }
 0x788   :  { %v5848_v8 = vmul.f32 0.25, %v5541_v49  ;;  %v5936_v45 = vsel %vm2272_vm13, %v11897_v52, -inf  ;;  %v5852_v27 = vmul.f32 0.25, %v5584_v19  ;;  %v5948_v41 = vsel %vm2272_vm13, %v11914_v25, -inf }
 0x789   :  { %5937 = vmax.xlane.f32.xlu0 %v5936_v45  ;;  %5916 = vmax.xlane.f32.xlu2 %v5915_v32 }
 0x78a   :  { %v11917_v20 = vadd.f32 %v5848_v8, %v11909_v43  ;;  %v11929_v63 = vadd.f32 %v5852_v27, %v11909_v43 }
 0x78b   :  { %v5625_v55 = vpop.f32.mrf.mxu2  ;;  %v5668_v58 = vpop.f32.mrf.mxu3 }
 0x78c   :  { %v5855_v47 = vmul.f32 0.25, %v5625_v55  ;;  %v5859_v54 = vmul.f32 0.25, %v5668_v58  ;;  %v5918_v36 = vsel %vm2272_vm13, %v11917_v20, -inf  ;;  %v5930_v42 = vsel %vm2272_vm13, %v11929_v63, -inf }
 0x78d   :  { %5928 = vmax.xlane.f32.xlu1 %v5927_v46 }
 0x78e   :  { %v11924_v24 = vadd.f32 %v5855_v47, %v11889_v38  ;;  %v11932_v33 = vadd.f32 %v5859_v54, %v11889_v38 }
 0x78f   :  { %v5706_v12 = vpop.f32.mrf.mxu0  ;;  %v5749_v37 = vpop.f32.mrf.mxu1 }
 0x790   :  { %v5861_v15 = vmul.f32 0.25, %v5706_v12  ;;  %v5939_v31 = vsel %vm2272_vm13, %v11924_v24, -inf  ;;  %v5865_v6 = vmul.f32 0.25, %v5749_v37  ;;  %v5951_v4 = vsel %vm2272_vm13, %v11932_v33, -inf }
 0x791   :  { %5949 = vmax.xlane.f32.xlu2 %v5948_v41  ;;  %5919 = vmax.xlane.f32.xlu0 %v5918_v36 }
 0x792   :  { %v11939_v2 = vadd.f32 %v5861_v15, %v11851_v57  ;;  %v11942_v21 = vadd.f32 %v5865_v6, %v11851_v57 }
 0x793   :  { %v5627_v13 = vpop.f32.mrf.mxu2  ;;  %v5670_v5 = vpop.f32.mrf.mxu3 }
 0x794   :  { %v5856_v40 = vmul.f32 0.25, %v5627_v13  ;;  %v5860_v1 = vmul.f32 0.25, %v5670_v5  ;;  %v5957_v50 = vsel %vm2272_vm13, %v11939_v2, -inf  ;;  %v5969_v59 = vsel %vm2272_vm13, %v11942_v21, -inf }
 0x795   :  { %5940 = vmax.xlane.f32.xlu1 %v5939_v31 }
 0x796   :  { %v11947_v39 = vadd.f32 %v5856_v40, %v11909_v43  ;;  %v11954_v7 = vadd.f32 %v5860_v1, %v11909_v43 }
 0x797   :  { %v5708_v51 = vpop.f32.mrf.mxu0  ;;  %v5751_v35 = vpop.f32.mrf.mxu1 }
 0x798   :  { %v5862_v16 = vmul.f32 0.25, %v5708_v51  ;;  %v5942_v44 = vsel %vm2272_vm13, %v11947_v39, -inf  ;;  %v5866_v26 = vmul.f32 0.25, %v5751_v35  ;;  %v5954_v49 = vsel %vm2272_vm13, %v11954_v7, -inf }
 0x799   :  { %5931 = vmax.xlane.f32.xlu2 %v5930_v42  ;;  %5952 = vmax.xlane.f32.xlu0 %v5951_v4 }
 0x79a   :  { %v11962_v29 = vadd.f32 %v5862_v16, %v11866_v60  ;;  %v11969_v47 = vadd.f32 %v5866_v26, %v11866_v60 }
 0x79b   :  { %v5792_v14 = vpop.f32.mrf.mxu2  ;;  %v5835_v9 = vpop.f32.mrf.mxu3 }
 0x79c   :  { %v5869_v62 = vmul.f32 0.25, %v5792_v14  ;;  %v5873_v45 = vmul.f32 0.25, %v5835_v9  ;;  %v5960_v58 = vsel %vm2272_vm13, %v11962_v29, -inf  ;;  %v5972_v41 = vsel %vm2272_vm13, %v11969_v47, -inf }
 0x79d   :  { %5958 = vmax.xlane.f32.xlu1 %v5957_v50 }
 0x79e   :  { %v11959_v19 = vadd.f32 %v5869_v62, %v11851_v57  ;;  %v11972_v12 = vadd.f32 %v5873_v45, %v11851_v57 }
 0x79f   :  { %v5711_v18 = vpop.f32.mrf.mxu0  ;;  %v5754_v8 = vpop.f32.mrf.mxu1 }
 0x7a0   :  { %v5867_v32 = vmul.f32 0.25, %v5754_v8  ;;  %v5981_v55 = vsel %vm2272_vm13, %v11959_v19, -inf  ;;  %v5863_v54 = vmul.f32 0.25, %v5711_v18  ;;  %v5993_v13 = vsel %vm2272_vm13, %v11972_v12, -inf }
 0x7a1   :  { %5943 = vmax.xlane.f32.xlu2 %v5942_v44  ;;  %5970 = vmax.xlane.f32.xlu0 %v5969_v59 }
 0x7a2   :  { %v11977_v36 = vadd.f32 %v5867_v32, %v11889_v38  ;;  %v11984_v57 = vadd.f32 %v5863_v54, %v11889_v38 }
 0x7a3   :  { %v5794_v22 = vpop.f32.mrf.mxu2  ;;  %v5837_v46 = vpop.f32.mrf.mxu3 }
 0x7a4   :  { %v5874_v15 = vmul.f32 0.25, %v5837_v46  ;;  %v5975_v5 = vsel %vm2272_vm13, %v11977_v36, -inf  ;;  %v5870_v6 = vmul.f32 0.25, %v5794_v22  ;;  %v5963_v42 = vsel %vm2272_vm13, %v11984_v57, -inf }
 0x7a5   :  { %5955 = vmax.xlane.f32.xlu1 %v5954_v49 }
 0x7a6   :  { %v11989_v4 = vadd.f32 %v5874_v15, %v11866_v60  ;;  %v11995_v14 = vadd.f32 %v5870_v6, %v11866_v60 }
 0x7a7   :  { %v5713_v37 = vpop.f32.mrf.mxu0  ;;  %v5756_v16 = vpop.f32.mrf.mxu1 }
 0x7a8   :  { %v5864_v31 = vmul.f32 0.25, %v5713_v37  ;;  %v5996_v9 = vsel %vm2272_vm13, %v11989_v4, -inf  ;;  %v5868_v62 = vmul.f32 0.25, %v5756_v16  ;;  %v5984_v44 = vsel %vm2272_vm13, %v11995_v14, -inf }
 0x7a9   :  { %5982 = vmax.xlane.f32.xlu0 %v5981_v55  ;;  %5961 = vmax.xlane.f32.xlu2 %v5960_v58 }
 0x7aa   :  { %v11992_v51 = vadd.f32 %v5864_v31, %v11909_v43  ;;  %v12014_v45 = vadd.f32 %v5868_v62, %v11909_v43 }
 0x7ab   :  { %v5797_v27 = vpop.f32.mrf.mxu2  ;;  %v5840_v40 = vpop.f32.mrf.mxu3 }
 0x7ac   :  { %v5871_v1 = vmul.f32 0.25, %v5797_v27  ;;  %v5966_v59 = vsel %vm2272_vm13, %v11992_v51, -inf  ;;  %v5875_v32 = vmul.f32 0.25, %v5840_v40  ;;  %v5978_v55 = vsel %vm2272_vm13, %v12014_v45, -inf }
 0x7ad   :  { %5973 = vmax.xlane.f32.xlu1 %v5972_v41 }
 0x7ae   :  { %v12007_v60 = vadd.f32 %v5871_v1, %v11889_v38  ;;  %v12024_v27 = vadd.f32 %v5875_v32, %v11889_v38 }
 0x7b0   :  { %v5987_v8 = vsel %vm2272_vm13, %v12007_v60, -inf  ;;  %v5999_v54 = vsel %vm2272_vm13, %v12024_v27, -inf }
 0x7b1   :  { %5976 = vmax.xlane.f32.xlu0 %v5975_v5  ;;  %5994 = vmax.xlane.f32.xlu2 %v5993_v13 }
 0x7b3   :  { %v5799_v35 = vpop.f32.mrf.mxu2  ;;  %v5842_v22 = vpop.f32.mrf.mxu3 }
 0x7b4   :  { %v5872_v50 = vmul.f32 0.25, %v5799_v35  ;;  %v5876_v26 = vmul.f32 0.25, %v5842_v22 }
 0x7b5   :  { %5964 = vmax.xlane.f32.xlu1 %v5963_v42 }
 0x7b6   :  { %v12004_v18 = vadd.f32 %v5872_v50, %v11909_v43  ;;  %v12019_v58 = vadd.f32 %v5876_v26, %v11909_v43 }
 0x7b8   :  { %v5990_v49 = vsel %vm2272_vm13, %v12004_v18, -inf  ;;  %v6002_v46 = vsel %vm2272_vm13, %v12019_v58, -inf }
 0x7b9   :  { %5997 = vmax.xlane.f32.xlu0 %v5996_v9  ;;  %5967 = vmax.xlane.f32.xlu2 %v5966_v59 }
 0x7bd   :  { %5985 = vmax.xlane.f32.xlu1 %v5984_v44 }
 0x7c1   :  { %5991 = vmax.xlane.f32.xlu0 %v5990_v49  ;;  %5988 = vmax.xlane.f32.xlu2 %v5987_v8 }
 0x7c5   :  { %5979 = vmax.xlane.f32.xlu1 %v5978_v55 }
 0x7c9   :  { %6003 = vmax.xlane.f32.xlu2 %v6002_v46 }
 0x7cd   :  { %6000 = vmax.xlane.f32.xlu1 %v5999_v54 }
 0x7e8   :  { %v5923_v41 = vpop.xlane.xlu2 %5922  ;;  %v5911_v37 = vpop.xlane.xlu0 %5910 }
 0x7e9   :  { %v6009_v13 = vsub.f32 %v11854_v28, %v5923_v41  ;;  %v6005_v15 = vsub.f32 %v11857_v56, %v5911_v37 }
 0x7eb   :  { %v6045_v43 = vmul.f32 1.442695, %v6009_v13  ;;  %v6037_v31 = vmul.f32 1.442695, %v6005_v15 }
 0x7ed   :  { %9430 = vpow2.f32 %v6045_v43 }
 0x7ee   :  { %9432 = vpow2.f32 %v6037_v31 }
 0x7f0   :  { %v5926_v5 = vpop.xlane.xlu0 %5925  ;;  %v5914_v6 = vpop.xlane.xlu1 %5913 }
 0x7f1   :  { %v6010_v38 = vsub.f32 %v11869_v61, %v5926_v5  ;;  %v6006_v40 = vsub.f32 %v11872_v3, %v5914_v6 }
 0x7f3   :  { %v12032_v42 = vpop.eup %9430  ;;  %v6047_v35 = vmul.f32 1.442695, %v6010_v38  ;;  %v6039_v1 = vmul.f32 1.442695, %v6006_v40 }
 0x7f4   :  { %v12034_v50 = vpop.eup %9432  ;;  %v5935_v9 = vpop.xlane.xlu2 %5934  ;;  %v6113_v28 = vsel %vm2272_vm13, %v12032_v42, 0.0 }
 0x7f5   :  { %9434 = vpow2.f32 %v6047_v35  ;;  %v6013_v56 = vsub.f32 %v11879_v30, %v5935_v9  ;;  %6114 = vadd.xlane.f32.xlu1 %v6113_v28  ;;  %v6101_v59 = vsel %vm2272_vm13, %v12034_v50, 0.0 }
 0x7f6   :  { %9436 = vpow2.f32 %v6039_v1  ;;  %6102 = vadd.xlane.f32.xlu2 %v6101_v59 }
 0x7f7   :  { %v6053_v61 = vmul.f32 1.442695, %v6013_v56 }
 0x7f8   :  { %v5947_v3 = vpop.xlane.xlu1 %5946 }
 0x7f9   :  { %v6017_v16 = vsub.f32 %v11884_v23, %v5947_v3  ;;  %9438 = vpow2.f32 %v6053_v61 }
 0x7fb   :  { %v12042_v62 = vpop.eup %9434  ;;  %v6061_v44 = vmul.f32 1.442695, %v6017_v16 }
 0x7fc   :  { %v12044_v22 = vpop.eup %9436  ;;  %v5938_v26 = vpop.xlane.xlu0 %5937  ;;  %v6116_v30 = vsel %vm2272_vm13, %v12042_v62, 0.0 }
 0x7fd   :  { %v5917_v49 = vpop.xlane.xlu2 %5916  ;;  %9440 = vpow2.f32 %v6061_v44  ;;  %v6014_v8 = vsub.f32 %v11897_v52, %v5938_v26  ;;  %v6104_v32 = vsel %vm2272_vm13, %v12044_v22, 0.0 }
 0x7fe   :  { %6105 = vadd.xlane.f32.xlu0 %v6104_v32  ;;  %6117 = vadd.xlane.f32.xlu2 %v6116_v30  ;;  %v6007_v55 = vsub.f32 %v11894_v53, %v5917_v49 }
 0x7ff   :  { %v6055_v23 = vmul.f32 1.442695, %v6014_v8  ;;  %v12053_v41 = vpop.eup %9438 }
 0x800   :  { %v5929_v46 = vpop.xlane.xlu1 %5928  ;;  %v6041_v13 = vmul.f32 1.442695, %v6007_v55  ;;  %v6125_v6 = vsel %vm2272_vm13, %v12053_v41, 0.0 }
 0x801   :  { %9442 = vpow2.f32 %v6055_v23  ;;  %v6011_v54 = vsub.f32 %v11900_v10, %v5929_v46 }
 0x803   :  { %v12055_v37 = vpop.eup %9440  ;;  %v6049_v15 = vmul.f32 1.442695, %v6011_v54 }
 0x804   :  { %v5920_v52 = vpop.xlane.xlu0 %5919  ;;  %v6137_v31 = vsel %vm2272_vm13, %v12055_v37, 0.0 }
 0x805   :  { %v5950_v43 = vpop.xlane.xlu2 %5949  ;;  %9444 = vpow2.f32 %v6049_v15  ;;  %v6008_v53 = vsub.f32 %v11917_v20, %v5920_v52 }
 0x806   :  { %v6018_v5 = vsub.f32 %v11914_v25, %v5950_v43  ;;  %6126 = vadd.xlane.f32.xlu0 %v6125_v6  ;;  %6138 = vadd.xlane.f32.xlu2 %v6137_v31  ;;  %9446 = vpow2.f32 %v6041_v13 }
 0x807   :  { %v12063_v10 = vpop.eup %9442  ;;  %v6043_v38 = vmul.f32 1.442695, %v6008_v53 }
 0x808   :  { %v6063_v40 = vmul.f32 1.442695, %v6018_v5  ;;  %v5941_v35 = vpop.xlane.xlu1 %5940  ;;  %v6128_v1 = vsel %vm2272_vm13, %v12063_v10, 0.0 }
 0x809   :  { %6129 = vadd.xlane.f32.xlu1 %v6128_v1  ;;  %9448 = vpow2.f32 %v6043_v38  ;;  %v6015_v25 = vsub.f32 %v11924_v24, %v5941_v35 }
 0x80a   :  { %9450 = vpow2.f32 %v6063_v40 }
 0x80b   :  { %v12067_v9 = vpop.eup %9444  ;;  %v6057_v44 = vmul.f32 1.442695, %v6015_v25 }
 0x80c   :  { %v5953_v28 = vpop.xlane.xlu0 %5952  ;;  %v6119_v56 = vsel %vm2272_vm13, %v12067_v9, 0.0  ;;  %v12072_v59 = vpop.eup %9446 }
 0x80d   :  { %v5932_v20 = vpop.xlane.xlu2 %5931  ;;  %v6019_v61 = vsub.f32 %v11932_v33, %v5953_v28  ;;  %v6107_v49 = vsel %vm2272_vm13, %v12072_v59, 0.0 }
 0x80e   :  { %6120 = vadd.xlane.f32.xlu0 %v6119_v56  ;;  %v6012_v46 = vsub.f32 %v11929_v63, %v5932_v20 }
 0x80f   :  { %v6065_v3 = vmul.f32 1.442695, %v6019_v61  ;;  %v12075_v16 = vpop.eup %9448 }
 0x810   :  { %v5959_v26 = vpop.xlane.xlu1 %5958  ;;  %v6110_v24 = vsel %vm2272_vm13, %v12075_v16, 0.0  ;;  %v12081_v30 = vpop.eup %9450 }
 0x811   :  { %6108 = vadd.xlane.f32.xlu1 %v6107_v49  ;;  %9452 = vpow2.f32 %v6065_v3  ;;  %6111 = vadd.xlane.f32.xlu2 %v6110_v24  ;;  %v6140_v55 = vsel %vm2272_vm13, %v12081_v30, 0.0  ;;  %v6021_v53 = vsub.f32 %v11939_v2, %v5959_v26 }
 0x812   :  { %9454 = vpow2.f32 %v6057_v44 }
 0x813   :  { %v6069_v20 = vmul.f32 1.442695, %v6021_v53 }
 0x814   :  { %v5971_v33 = vpop.xlane.xlu0 %5970 }
 0x815   :  { %v5944_v8 = vpop.xlane.xlu2 %5943  ;;  %v6025_v23 = vsub.f32 %v11942_v21, %v5971_v33  ;;  %v6051_v21 = vmul.f32 1.442695, %v6012_v46 }
 0x816   :  { %v6016_v32 = vsub.f32 %v11947_v39, %v5944_v8  ;;  %6141 = vadd.xlane.f32.xlu0 %v6140_v55 }
 0x817   :  { %v6077_v13 = vmul.f32 1.442695, %v6025_v23  ;;  %v12088_v15 = vpop.eup %9452 }
 0x818   :  { %v6059_v54 = vmul.f32 1.442695, %v6016_v32  ;;  %v5956_v43 = vpop.xlane.xlu1 %5955  ;;  %v6143_v31 = vsel %vm2272_vm13, %v12088_v15, 0.0  ;;  %v12093_v39 = vpop.eup %9454 }
 0x819   :  { %v6020_v52 = vsub.f32 %v11954_v7, %v5956_v43  ;;  %6144 = vadd.xlane.f32.xlu2 %v6143_v31  ;;  %v6131_v40 = vsel %vm2272_vm13, %v12093_v39, 0.0 }
 0x81a   :  { %9456 = vpow2.f32 %v6059_v54 }
 0x81b   :  { %9458 = vpow2.f32 %v6077_v13  ;;  %v6067_v5 = vmul.f32 1.442695, %v6020_v52 }
 0x81c   :  { %v5983_v63 = vpop.xlane.xlu0 %5982 }
 0x81d   :  { %v5962_v6 = vpop.xlane.xlu2 %5961  ;;  %9460 = vpow2.f32 %v6067_v5  ;;  %v6029_v38 = vsub.f32 %v11959_v19, %v5983_v63 }
 0x81e   :  { %6132 = vadd.xlane.f32.xlu0 %v6131_v40  ;;  %9462 = vpow2.f32 %v6051_v21  ;;  %v6022_v1 = vsub.f32 %v11962_v29, %v5962_v6 }
 0x81f   :  { %v6085_v35 = vmul.f32 1.442695, %v6029_v38 }
 0x820   :  { %v12099_v7 = vpop.eup %9456  ;;  %v5974_v28 = vpop.xlane.xlu1 %5973  ;;  %v6071_v61 = vmul.f32 1.442695, %v6022_v1 }
 0x821   :  { %v12102_v25 = vpop.eup %9458  ;;  %v6134_v2 = vsel %vm2272_vm13, %v12099_v7, 0.0  ;;  %9464 = vpow2.f32 %v6085_v35  ;;  %v6026_v53 = vsub.f32 %v11969_v47, %v5974_v28 }
 0x822   :  { %6135 = vadd.xlane.f32.xlu1 %v6134_v2  ;;  %v6161_v19 = vsel %vm2272_vm13, %v12102_v25, 0.0  ;;  %9466 = vpow2.f32 %v6069_v20 }
 0x823   :  { %6162 = vadd.xlane.f32.xlu2 %v6161_v19  ;;  %v12108_v56 = vpop.eup %9460  ;;  %9468 = vpow2.f32 %v6071_v61  ;;  %v6079_v20 = vmul.f32 1.442695, %v6026_v53 }
 0x824   :  { %v12110_v3 = vpop.xlane.xlu0 %5976  ;;  %v6146_v44 = vsel %vm2272_vm13, %v12108_v56, 0.0  ;;  %v12114_v26 = vpop.eup %9462 }
 0x825   :  { %v5995_v29 = vpop.xlane.xlu2 %5994  ;;  %v6122_v33 = vsel %vm2272_vm13, %v12114_v26, 0.0 }
 0x826   :  { %6147 = vadd.xlane.f32.xlu0 %v6146_v44  ;;  %v6033_v24 = vsub.f32 %v11972_v12, %v5995_v29 }
 0x827   :  { %v12116_v49 = vpop.eup %9464 }
 0x828   :  { %v5965_v8 = vpop.xlane.xlu1 %5964  ;;  %v6173_v32 = vsel %vm2272_vm13, %v12116_v49, 0.0  ;;  %v12123_v23 = vpop.eup %9466  ;;  %v6093_v55 = vmul.f32 1.442695, %v6033_v24 }
 0x829   :  { %v12125_v13 = vpop.eup %9468  ;;  %v6149_v12 = vsel %vm2272_vm13, %v12123_v23, 0.0  ;;  %v6023_v2 = vsub.f32 %v11984_v57, %v5965_v8 }
 0x82a   :  { %6123 = vadd.xlane.f32.xlu1 %v6122_v33  ;;  %9470 = vpow2.f32 %v6093_v55  ;;  %v6152_v21 = vsel %vm2272_vm13, %v12125_v13, 0.0  ;;  %v6027_v55 = vsub.f32 %v11977_v36, %v12110_v3 }
 0x82b   :  { %6174 = vadd.xlane.f32.xlu2 %v6173_v32 }
 0x82c   :  { %v5998_v46 = vpop.xlane.xlu0 %5997 }
 0x82d   :  { %v5968_v54 = vpop.xlane.xlu2 %5967  ;;  %v6034_v43 = vsub.f32 %v11989_v4, %v5998_v46 }
 0x82e   :  { %6150 = vadd.xlane.f32.xlu0 %v6149_v12 }
 0x82f   :  { %v6095_v52 = vmul.f32 1.442695, %v6034_v43 }
 0x830   :  { %v5986_v31 = vpop.xlane.xlu1 %5985  ;;  %v12134_v4 = vpop.eup %9470 }
 0x831   :  { %9472 = vpow2.f32 %v6095_v52  ;;  %v6030_v5 = vsub.f32 %v11995_v14, %v5986_v31  ;;  %v6185_v47 = vsel %vm2272_vm13, %v12134_v4, 0.0 }
 0x832   :  { %6153 = vadd.xlane.f32.xlu1 %v6152_v21 }
 0x833   :  { %v6087_v63 = vmul.f32 1.442695, %v6030_v5  ;;  %v6081_v5 = vmul.f32 1.442695, %v6027_v55 }
 0x834   :  { %v5992_v6 = vpop.xlane.xlu0 %5991 }
 0x835   :  { %v5989_v38 = vpop.xlane.xlu2 %5988  ;;  %9474 = vpow2.f32 %v6087_v63  ;;  %v6032_v40 = vsub.f32 %v12004_v18, %v5992_v6 }
 0x836   :  { %v6031_v35 = vsub.f32 %v12007_v60, %v5989_v38  ;;  %v6073_v60 = vmul.f32 1.442695, %v6023_v2 }
 0x837   :  { %v12138_v1 = vpop.eup %9472  ;;  %v6091_v19 = vmul.f32 1.442695, %v6032_v40 }
 0x838   :  { %v6089_v14 = vmul.f32 1.442695, %v6031_v35  ;;  %v5980_v61 = vpop.xlane.xlu1 %5979  ;;  %v6188_v28 = vsel %vm2272_vm13, %v12138_v1, 0.0 }
 0x839   :  { %9476 = vpow2.f32 %v6091_v19  ;;  %6189 = vadd.xlane.f32.xlu2 %v6188_v28  ;;  %v6028_v8 = vsub.f32 %v12014_v45, %v5980_v61  ;;  %v6024_v45 = vsub.f32 %v11992_v51, %v5968_v54 }
 0x83a   :  { %6186 = vadd.xlane.f32.xlu1 %v6185_v47  ;;  %9478 = vpow2.f32 %v6089_v14 }
 0x83b   :  { %v12145_v18 = vpop.eup %9474  ;;  %9480 = vpow2.f32 %v6079_v20  ;;  %v6083_v31 = vmul.f32 1.442695, %v6028_v8 }
 0x83c   :  { %v6176_v57 = vsel %vm2272_vm13, %v12145_v18, 0.0  ;;  %9482 = vpow2.f32 %v6073_v60 }
 0x83d   :  { %v6004_v29 = vpop.xlane.xlu2 %6003  ;;  %6177 = vadd.xlane.f32.xlu0 %v6176_v57 }
 0x83e   :  { %v6036_v44 = vsub.f32 %v12019_v58, %v6004_v29 }
 0x83f   :  { %v12150_v24 = vpop.eup %9476 }
 0x840   :  { %v6099_v33 = vmul.f32 1.442695, %v6036_v44  ;;  %v12153_v32 = vpop.eup %9478  ;;  %v6001_v46 = vpop.xlane.xlu1 %6000  ;;  %v6182_v43 = vsel %vm2272_vm13, %v12150_v24, 0.0 }
 0x841   :  { %v12159_v12 = vpop.eup %9480  ;;  %v6035_v58 = vsub.f32 %v12024_v27, %v6001_v46  ;;  %6183 = vadd.xlane.f32.xlu2 %v6182_v43  ;;  %v6179_v52 = vsel %vm2272_vm13, %v12153_v32, 0.0  ;;  %v6075_v27 = vmul.f32 1.442695, %v6024_v45 }
 0x842   :  { %9484 = vpow2.f32 %v6099_v33  ;;  %6180 = vadd.xlane.f32.xlu1 %v6179_v52  ;;  %v6164_v36 = vsel %vm2272_vm13, %v12159_v12, 0.0  ;;  %v12167_v3 = vpop.eup %9482 }
 0x843   :  { %v6097_v21 = vmul.f32 1.442695, %v6035_v58  ;;  %v6155_v63 = vsel %vm2272_vm13, %v12167_v3, 0.0 }
 0x845   :  { %9486 = vpow2.f32 %v6097_v21  ;;  %6165 = vadd.xlane.f32.xlu0 %v6164_v36 }
 0x846   :  { %9488 = vpow2.f32 %v6083_v31 }
 0x847   :  { %9490 = vpow2.f32 %v6081_v5 }
 0x848   :  { %v12169_v53 = vpop.eup %9484  ;;  %9492 = vpow2.f32 %v6075_v27 }
 0x849   :  { %v6194_v51 = vsel %vm2272_vm13, %v12169_v53, 0.0  ;;  %6156 = vadd.xlane.f32.xlu2 %v6155_v63 }
 0x84a   :  { %6195 = vadd.xlane.f32.xlu1 %v6194_v51 }
 0x84b   :  { %v12175_v54 = vpop.eup %9486 }
 0x84c   :  { %v6191_v6 = vsel %vm2272_vm13, %v12175_v54, 0.0  ;;  %v12179_v38 = vpop.eup %9488 }
 0x84d   :  { %6192 = vadd.xlane.f32.xlu0 %v6191_v6  ;;  %v12181_v40 = vpop.eup %9490  ;;  %v6170_v35 = vsel %vm2272_vm13, %v12179_v38, 0.0 }
 0x84e   :  { %v12185_v20 = vpop.eup %9492  ;;  %v6167_v2 = vsel %vm2272_vm13, %v12181_v40, 0.0 }
 0x84f   :  { %v6158_v19 = vsel %vm2272_vm13, %v12185_v20, 0.0 }
 0x851   :  { %6171 = vadd.xlane.f32.xlu2 %v6170_v35 }
 0x852   :  { %6168 = vadd.xlane.f32.xlu1 %v6167_v2 }
 0x855   :  { %6159 = vadd.xlane.f32.xlu0 %v6158_v19 }
 0x868   :  { %v6115_v61 = vpop.xlane.xlu1 %6114 }
 0x869   :  { %v6103_v14 = vpop.xlane.xlu2 %6102 }
 0x86a   :  { %9494 = vrcp.f32 %v6103_v14 }
 0x86b   :  { %9496 = vrcp.f32 %v6115_v61 }
 0x870   :  { %v9495_v60 = vpop.eup %9494 }
 0x871   :  { %v6106_v47 = vpop.xlane.xlu0 %6105  ;;  %v6118_v28 = vpop.xlane.xlu2 %6117  ;;  %v6229_v57 = vmul.f32 %v9495_v60, %v12034_v50 }
 0x872   :  { %9498 = vrcp.f32 %v6106_v47  ;;  %v9497_v29 = vpop.eup %9496 }
 0x873   :  { %9500 = vrcp.f32 %v6118_v28  ;;  %v6233_v44 = vmul.f32 %v9497_v29, %v12032_v42  ;;  %v6261_v55 = vpack.c.bf16 %v6229_v57, %v6229_v57 }
 0x875   :  { %v6265_v58 = vpack.c.bf16 %v6233_v44, %v6233_v44  ;;  %v6313_v5 = vunpack.c.l.b16 %v6261_v55 }
 0x877   :  { %v6354_v50 = vunpack.c.l.b16 %v6265_v58 }
 0x878   :  { %v9499_v8 = vpop.eup %9498 }
 0x879   :  { %v9501_v33 = vpop.eup %9500  ;;  %v6230_v46 = vmul.f32 %v9499_v8, %v12044_v22  ;;  %v6127_v43 = vpop.xlane.xlu0 %6126 }
 0x87a   :  { %v6234_v52 = vmul.f32 %v9501_v33, %v12042_v62  ;;  %9502 = vrcp.f32 %v6127_v43  ;;  %v6139_v27 = vpop.xlane.xlu2 %6138 }
 0x87b   :  { %v6262_v45 = vpack.c.bf16 %v6230_v46, %v6230_v46 }
 0x87c   :  { %v6266_v31 = vpack.c.bf16 %v6234_v52, %v6234_v52  ;;  %v6130_v21 = vpop.xlane.xlu1 %6129 }
 0x87d   :  { %v6314_v36 = vunpack.c.l.b16 %v6262_v45  ;;  %9504 = vrcp.f32 %v6130_v21 }
 0x87e   :  { %v6355_v63 = vunpack.c.l.b16 %v6266_v31  ;;  %9506 = vrcp.f32 %v6139_v27 }
 0x87f   :  { %v6317_v42 = vpack.c.b16 %v6314_v36, %v6313_v5 }
 0x880   :  { %v9503_v51 = vpop.eup %9502  ;;  %v6358_v6 = vpack.c.b16 %v6355_v63, %v6354_v50 }
 0x881   :  { %v6237_v35 = vmul.f32 %v9503_v51, %v12053_v41  ;;  %v6121_v22 = vpop.xlane.xlu0 %6120  ;;  %8803 = vmatmul.msk.bf16.vlgmr.msra.gmra.mxu0 %vm2272_vm13, %v6317_v42 }
 0x882   :  { %8805 = vmatmul.msk.bf16.vlgmr.msra.gmra.mxu1 %vm2272_vm13, %v6358_v6 }
 0x883   :  { %v9505_v62 = vpop.eup %9504  ;;  %v6269_v2 = vpack.c.bf16 %v6237_v35, %v6237_v35 }
 0x884   :  { %v6238_v19 = vmul.f32 %v9505_v62, %v12063_v10  ;;  %v6109_v14 = vpop.xlane.xlu1 %6108  ;;  %v6112_v61 = vpop.xlane.xlu2 %6111 }
 0x885   :  { %9508 = vrcp.f32 %v6109_v14  ;;  %v6395_v28 = vunpack.c.l.b16 %v6269_v2  ;;  %v9507_v57 = vpop.eup %9506 }
 0x886   :  { %v6270_v47 = vpack.c.bf16 %v6238_v19, %v6238_v19  ;;  %9510 = vrcp.f32 %v6112_v61  ;;  %v6241_v55 = vmul.f32 %v9507_v57, %v12055_v37 }
 0x888   :  { %v6396_v60 = vunpack.c.l.b16 %v6270_v47  ;;  %v6273_v31 = vpack.c.bf16 %v6241_v55, %v6241_v55 }
 0x889   :  { %v6142_v29 = vpop.xlane.xlu0 %6141 }
 0x88a   :  { %v6399_v41 = vpack.c.b16 %v6396_v60, %v6395_v28  ;;  %9512 = vrcp.f32 %v6142_v29  ;;  %v6436_v63 = vunpack.c.l.b16 %v6273_v31 }
 0x88b   :  { %v9509_v44 = vpop.eup %9508 }
 0x88c   :  { %v9511_v8 = vpop.eup %9510  ;;  %v6231_v33 = vmul.f32 %v9509_v44, %v12072_v59  ;;  %8807 = vmatmul.msk.bf16.vlgmr.msrb.gmra.mxu2 %vm2272_vm13, %v6399_v41  ;;  %v6145_v45 = vpop.xlane.xlu2 %6144 }
 0x88d   :  { %v6232_v10 = vmul.f32 %v9511_v8, %v12075_v16 }
 0x88e   :  { %v6263_v46 = vpack.c.bf16 %v6231_v33, %v6231_v33 }
 0x88f   :  { %v6264_v43 = vpack.c.bf16 %v6232_v10, %v6232_v10 }
 0x890   :  { %v9513_v58 = vpop.eup %9512  ;;  %v6315_v52 = vunpack.c.l.b16 %v6263_v46 }
 0x891   :  { %v6316_v21 = vunpack.c.l.b16 %v6264_v43  ;;  %v6242_v5 = vmul.f32 %v9513_v58, %v12081_v30  ;;  %v6133_v36 = vpop.xlane.xlu0 %6132 }
 0x892   :  { %9514 = vrcp.f32 %v6133_v36 }
 0x893   :  { %v6274_v27 = vpack.c.bf16 %v6242_v5, %v6242_v5  ;;  %v6318_v50 = vpack.c.b16 %v6316_v21, %v6315_v52  ;;  %9516 = vrcp.f32 %v6145_v45 }
 0x895   :  { %v6136_v59 = vpop.xlane.xlu1 %6135  ;;  %v6437_v42 = vunpack.c.l.b16 %v6274_v27  ;;  %8804 = vmatmul.msk.bf16.gmra.mxu0 %vm2272_vm13, %v6318_v50 }
 0x896   :  { %9518 = vrcp.f32 %v6136_v59  ;;  %v6163_v35 = vpop.xlane.xlu2 %6162 }
 0x897   :  { %9520 = vrcp.f32 %v6121_v22  ;;  %v6440_v37 = vpack.c.b16 %v6437_v42, %v6436_v63 }
 0x898   :  { %v9515_v16 = vpop.eup %9514 }
 0x899   :  { %v6239_v51 = vmul.f32 %v9515_v16, %v12093_v39  ;;  %v6148_v6 = vpop.xlane.xlu0 %6147  ;;  %8809 = vmatmul.msk.bf16.vlgmr.msrb.gmra.mxu3 %vm2272_vm13, %v6440_v37  ;;  %v9517_v30 = vpop.eup %9516 }
 0x89a   :  { %9522 = vrcp.f32 %v6148_v6  ;;  %v6243_v47 = vmul.f32 %v9517_v30, %v12088_v15 }
 0x89b   :  { %v6271_v2 = vpack.c.bf16 %v6239_v51, %v6239_v51 }
 0x89c   :  { %v9519_v62 = vpop.eup %9518  ;;  %v6275_v57 = vpack.c.bf16 %v6243_v47, %v6243_v47 }
 0x89d   :  { %v6240_v19 = vmul.f32 %v9519_v62, %v12099_v7  ;;  %v6124_v14 = vpop.xlane.xlu1 %6123  ;;  %v9521_v61 = vpop.eup %9520  ;;  %v6397_v39 = vunpack.c.l.b16 %v6271_v2 }
 0x89e   :  { %9524 = vrcp.f32 %v6124_v14  ;;  %v6235_v60 = vmul.f32 %v9521_v61, %v12067_v9  ;;  %v6175_v46 = vpop.xlane.xlu2 %6174  ;;  %v6438_v43 = vunpack.c.l.b16 %v6275_v57 }
 0x89f   :  { %v6272_v22 = vpack.c.bf16 %v6240_v19, %v6240_v19 }
 0x8a0   :  { %v9523_v28 = vpop.eup %9522  ;;  %v6267_v7 = vpack.c.bf16 %v6235_v60, %v6235_v60 }
 0x8a1   :  { %v6398_v29 = vunpack.c.l.b16 %v6272_v22  ;;  %v6244_v41 = vmul.f32 %v9523_v28, %v12108_v56  ;;  %v6151_v44 = vpop.xlane.xlu0 %6150 }
 0x8a2   :  { %9526 = vrcp.f32 %v6151_v44  ;;  %v6356_v31 = vunpack.c.l.b16 %v6267_v7 }
 0x8a3   :  { %v6400_v8 = vpack.c.b16 %v6398_v29, %v6397_v39  ;;  %v6276_v55 = vpack.c.bf16 %v6244_v41, %v6244_v41 }
 0x8a4   :  { %v9525_v33 = vpop.eup %9524 }
 0x8a5   :  { %v6236_v10 = vmul.f32 %v9525_v33, %v12114_v26  ;;  %8808 = vmatmul.msk.bf16.gmra.mxu2 %vm2272_vm13, %v6400_v8  ;;  %v6154_v15 = vpop.xlane.xlu1 %6153  ;;  %v6439_v58 = vunpack.c.l.b16 %v6276_v55 }
 0x8a6   :  { %9528 = vrcp.f32 %v6154_v15 }
 0x8a7   :  { %v6268_v9 = vpack.c.bf16 %v6236_v10, %v6236_v10  ;;  %v6441_v52 = vpack.c.b16 %v6439_v58, %v6438_v43  ;;  %9530 = vrcp.f32 %v6175_v46 }
 0x8a8   :  { %v9527_v45 = vpop.eup %9526 }
 0x8a9   :  { %v6357_v56 = vunpack.c.l.b16 %v6268_v9  ;;  %v6245_v21 = vmul.f32 %v9527_v45, %v12123_v23  ;;  %8810 = vmatmul.msk.bf16.gmra.mxu3 %vm2272_vm13, %v6441_v52 }
 0x8ab   :  { %v6359_v5 = vpack.c.b16 %v6357_v56, %v6356_v31  ;;  %v6277_v26 = vpack.c.bf16 %v6245_v21, %v6245_v21 }
 0x8ac   :  { %v9529_v36 = vpop.eup %9528  ;;  %v6190_v59 = vpop.xlane.xlu2 %6189 }
 0x8ad   :  { %v6246_v27 = vmul.f32 %v9529_v36, %v12125_v13  ;;  %v6187_v50 = vpop.xlane.xlu1 %6186  ;;  %8806 = vmatmul.msk.bf16.gmra.mxu1 %vm2272_vm13, %v6359_v5  ;;  %v6477_v42 = vunpack.c.l.b16 %v6277_v26  ;;  %v9531_v51 = vpop.eup %9530 }
 0x8ae   :  { %9532 = vrcp.f32 %v6187_v50  ;;  %v6253_v62 = vmul.f32 %v9531_v51, %v12116_v49 }
 0x8af   :  { %v6278_v63 = vpack.c.bf16 %v6246_v27, %v6246_v27  ;;  %9534 = vrcp.f32 %v6190_v59 }
 0x8b0   :  { %v6178_v16 = vpop.xlane.xlu0 %6177  ;;  %v6285_v28 = vpack.c.bf16 %v6253_v62, %v6253_v62 }
 0x8b1   :  { %v6478_v37 = vunpack.c.l.b16 %v6278_v63  ;;  %9536 = vrcp.f32 %v6178_v16 }
 0x8b2   :  { %9538 = vrcp.f32 %v6163_v35  ;;  %v6559_v44 = vunpack.c.l.b16 %v6285_v28 }
 0x8b3   :  { %v6481_v23 = vpack.c.b16 %v6478_v37, %v6477_v42 }
 0x8b4   :  { %v9533_v6 = vpop.eup %9532  ;;  %v6184_v2 = vpop.xlane.xlu2 %6183 }
 0x8b5   :  { %v9535_v30 = vpop.eup %9534  ;;  %v6257_v13 = vmul.f32 %v9533_v6, %v12134_v4  ;;  %8811 = vmatmul.msk.bf16.vlgmr.msrb.gmra.mxu0 %vm2272_vm13, %v6481_v23  ;;  %v6181_v14 = vpop.xlane.xlu1 %6180  ;;  %9540 = vrcp.f32 %v6184_v2 }
 0x8b6   :  { %v6258_v19 = vmul.f32 %v9535_v30, %v12138_v1  ;;  %9542 = vrcp.f32 %v6181_v14 }
 0x8b7   :  { %v6289_v61 = vpack.c.bf16 %v6257_v13, %v6257_v13  ;;  %v9537_v47 = vpop.eup %9536 }
 0x8b8   :  { %v6290_v22 = vpack.c.bf16 %v6258_v19, %v6258_v19  ;;  %v6254_v39 = vmul.f32 %v9537_v47, %v12145_v18  ;;  %v6166_v35 = vpop.xlane.xlu0 %6165  ;;  %v9539_v29 = vpop.eup %9538 }
 0x8b9   :  { %v6600_v60 = vunpack.c.l.b16 %v6289_v61  ;;  %9544 = vrcp.f32 %v6166_v35  ;;  %v6249_v41 = vmul.f32 %v9539_v29, %v12102_v25  ;;  %v9251_v29 = vld [vmem:[%s12420_s15 + $0x10] sm:$0xff] }
 0x8ba   :  { %v6601_v49 = vunpack.c.l.b16 %v6290_v22  ;;  %v6286_v4 = vpack.c.bf16 %v6254_v39, %v6254_v39  ;;  %6796 = vmatpush.bf16.msrb.mxu2 %v9251_v29 }
 0x8bb   :  { %v9541_v33 = vpop.eup %9540  ;;  %v6281_v46 = vpack.c.bf16 %v6249_v41, %v6249_v41 }
 0x8bc   :  { %v6604_v57 = vpack.c.b16 %v6601_v49, %v6600_v60  ;;  %v6560_v1 = vunpack.c.l.b16 %v6286_v4  ;;  %v6157_v8 = vpop.xlane.xlu2 %6156  ;;  %v9543_v7 = vpop.eup %9542  ;;  %v6256_v58 = vmul.f32 %v9541_v33, %v12150_v24  ;;  %v9252_v33 = vld [vmem:[%s12420_s15 + $0x18] sm:$0xff] }
 0x8bd   :  { %v6196_v55 = vpop.xlane.xlu1 %6195  ;;  %v6255_v25 = vmul.f32 %v9543_v7, %v12153_v32  ;;  %v6518_v45 = vunpack.c.l.b16 %v6281_v46  ;;  %6837 = vmatpush.bf16.msrb.mxu3 %v9252_v33 }
 0x8be   :  { %8817 = vmatmul.msk.bf16.vlgmr.msra.gmra.mxu3 %vm2272_vm13, %v6604_v57  ;;  %v6563_v10 = vpack.c.b16 %v6560_v1, %v6559_v44  ;;  %9546 = vrcp.f32 %v6196_v55 }
 0x8bf   :  { %v9545_v18 = vpop.eup %9544  ;;  %v6287_v36 = vpack.c.bf16 %v6255_v25, %v6255_v25 }
 0x8c0   :  { %v6250_v15 = vmul.f32 %v9545_v18, %v12159_v12  ;;  %v6193_v43 = vpop.xlane.xlu0 %6192  ;;  %8815 = vmatmul.msk.bf16.vlgmr.msra.gmra.mxu2 %vm2272_vm13, %v6563_v10  ;;  %v6288_v12 = vpack.c.bf16 %v6256_v58, %v6256_v58 }
 0x8c1   :  { %9548 = vrcp.f32 %v6193_v43  ;;  %v6561_v63 = vunpack.c.l.b16 %v6287_v36 }
 0x8c2   :  { %v6282_v9 = vpack.c.bf16 %v6250_v15, %v6250_v15  ;;  %9550 = vrcp.f32 %v6157_v8  ;;  %v6562_v42 = vunpack.c.l.b16 %v6288_v12 }
 0x8c4   :  { %v9547_v52 = vpop.eup %9546  ;;  %v6519_v31 = vunpack.c.l.b16 %v6282_v9  ;;  %v6172_v56 = vpop.xlane.xlu2 %6171 }
 0x8c5   :  { %v6260_v21 = vmul.f32 %v9547_v52, %v12169_v53  ;;  %v6169_v5 = vpop.xlane.xlu1 %6168  ;;  %9552 = vrcp.f32 %v6172_v56 }
 0x8c6   :  { %v6522_v26 = vpack.c.b16 %v6519_v31, %v6518_v45  ;;  %9554 = vrcp.f32 %v6169_v5 }
 0x8c7   :  { %v9549_v27 = vpop.eup %9548  ;;  %v6292_v50 = vpack.c.bf16 %v6260_v21, %v6260_v21 }
 0x8c8   :  { %v6259_v32 = vmul.f32 %v9549_v27, %v12175_v54  ;;  %v6160_v59 = vpop.xlane.xlu0 %6159  ;;  %8813 = vmatmul.msk.bf16.vlgmr.msrb.gmra.mxu1 %vm2272_vm13, %v6522_v26  ;;  %v9551_v24 = vpop.eup %9550  ;;  %v6564_v54 = vpack.c.b16 %v6562_v42, %v6561_v63  ;;  %v9255_v63 = vld [vmem:[%s12420_s15 + $0x30] sm:$0xff] }
 0x8c9   :  { %9556 = vrcp.f32 %v6160_v59  ;;  %v6603_v51 = vunpack.c.l.b16 %v6292_v50  ;;  %v6247_v23 = vmul.f32 %v9551_v24, %v12167_v3  ;;  %6960 = vmatpush.bf16.msra.mxu2 %v9255_v63 }
 0x8ca   :  { %v6291_v37 = vpack.c.bf16 %v6259_v32, %v6259_v32  ;;  %v9253_v32 = vld [vmem:[%s12420_s15 + $0x20] sm:$0xff] }
 0x8cb   :  { %v9553_v16 = vpop.eup %9552  ;;  %v6279_v61 = vpack.c.bf16 %v6247_v23, %v6247_v23 }
 0x8cc   :  { %v9555_v53 = vpop.eup %9554  ;;  %v6602_v6 = vunpack.c.l.b16 %v6291_v37  ;;  %v6252_v30 = vmul.f32 %v9553_v16, %v12179_v38  ;;  %v9256_v16 = vld [vmem:[%s12420_s15 + $0x38] sm:$0xff] }
 0x8cd   :  { %v6251_v62 = vmul.f32 %v9555_v53, %v12181_v40  ;;  %v6479_v60 = vunpack.c.l.b16 %v6279_v61  ;;  %v9249_v40 = vld [vmem:[%s12420_s15] sm:$0xff]  ;;  %7001 = vmatpush.bf16.msra.mxu3 %v9256_v16 }
 0x8ce   :  { %v6284_v13 = vpack.c.bf16 %v6252_v30, %v6252_v30  ;;  %v6605_v2 = vpack.c.b16 %v6603_v51, %v6602_v6  ;;  %6714 = vmatpush.bf16.msra.mxu0 %v9249_v40  ;;  %v9254_v6 = vld [vmem:[%s12420_s15 + $0x28] sm:$0xff] }
 0x8cf   :  { %v9557_v19 = vpop.eup %9556  ;;  %v6283_v14 = vpack.c.bf16 %v6251_v62, %v6251_v62 }
 0x8d0   :  { %v6248_v47 = vmul.f32 %v9557_v19, %v12185_v20  ;;  %8816 = vmatmul.msk.bf16.gmra.mxu2 %vm2272_vm13, %v6564_v54  ;;  %8818 = vmatmul.msk.bf16.gmra.mxu3 %vm2272_vm13, %v6605_v2  ;;  %v6521_v28 = vunpack.c.l.b16 %v6284_v13  ;;  %v9250_v20 = vld [vmem:[%s12420_s15 + $0x8] sm:$0xff] }
 0x8d1   :  { %v6520_v22 = vunpack.c.l.b16 %v6283_v14  ;;  %6755 = vmatpush.bf16.msra.mxu1 %v9250_v20 }
 0x8d2   :  { %v6280_v3 = vpack.c.bf16 %v6248_v47, %v6248_v47  ;;  %6878 = vmatpush.bf16.msrb.mxu0 %v9253_v32 }
 0x8d3   :  { %v6523_v35 = vpack.c.b16 %v6521_v28, %v6520_v22 }
 0x8d4   :  { %v6480_v39 = vunpack.c.l.b16 %v6280_v3 }
 0x8d5   :  { %6919 = vmatpush.bf16.msrb.mxu1 %v9254_v6 }
 0x8d6   :  { %v6482_v38 = vpack.c.b16 %v6480_v39, %v6479_v60 }
 0x8d8   :  { %8812 = vmatmul.msk.bf16.gmra.mxu0 %vm2272_vm13, %v6482_v38  ;;  %8814 = vmatmul.msk.bf16.gmra.mxu1 %vm2272_vm13, %v6523_v35 }
 0x8fe   :  { %v6340_v49 = vpop.f32.mrf.mxu0 }
 0x8ff   :  { %v6381_v4 = vpop.f32.mrf.mxu1  ;;  %v6653_v57 = vpack.c.bf16 %v6340_v49, %v6340_v49 }
 0x900   :  { %v6657_v41 = vpack.c.bf16 %v6381_v4, %v6381_v4 }
 0x901   :  { %v6689_v7 = vunpack.c.l.b16 %v6653_v57 }
 0x902   :  { %v6730_v18 = vunpack.c.l.b16 %v6657_v41 }
 0x906   :  { %v6342_v44 = vpop.f32.mrf.mxu0 }
 0x907   :  { %v6654_v1 = vpack.c.bf16 %v6342_v44, %v6342_v44  ;;  %v6383_v8 = vpop.f32.mrf.mxu1 }
 0x908   :  { %v6658_v55 = vpack.c.bf16 %v6383_v8, %v6383_v8 }
 0x909   :  { %v6690_v10 = vunpack.c.l.b16 %v6654_v1 }
 0x90a   :  { %v6731_v46 = vunpack.c.l.b16 %v6658_v55 }
 0x90b   :  { %v6693_v15 = vpack.c.b16 %v6690_v10, %v6689_v7 }
 0x90c   :  { %v6734_v43 = vpack.c.b16 %v6731_v46, %v6730_v18 }
 0x90d   :  { %8823 = vmatmul.msk.bf16.vlgmr.msra.gmra.mxu0 %vm2272_vm13, %v6693_v15 }
 0x90e   :  { %8829 = vmatmul.msk.bf16.vlgmr.msra.gmra.mxu1 %vm2272_vm13, %v6734_v43 }
 0x90f   :  { %v6422_v25 = vpop.f32.mrf.mxu2 }
 0x910   :  { %v6661_v9 = vpack.c.bf16 %v6422_v25, %v6422_v25 }
 0x912   :  { %v6345_v58 = vpop.f32.mrf.mxu0  ;;  %v6771_v56 = vunpack.c.l.b16 %v6661_v9 }
 0x913   :  { %v6655_v31 = vpack.c.bf16 %v6345_v58, %v6345_v58 }
 0x915   :  { %v6691_v27 = vunpack.c.l.b16 %v6655_v31 }
 0x917   :  { %v6424_v52 = vpop.f32.mrf.mxu2 }
 0x918   :  { %v6662_v45 = vpack.c.bf16 %v6424_v52, %v6424_v52 }
 0x91a   :  { %v6772_v21 = vunpack.c.l.b16 %v6662_v45  ;;  %v6347_v5 = vpop.f32.mrf.mxu0 }
 0x91b   :  { %v6656_v36 = vpack.c.bf16 %v6347_v5, %v6347_v5 }
 0x91c   :  { %v6775_v12 = vpack.c.b16 %v6772_v21, %v6771_v56  ;;  %v6463_v26 = vpop.f32.mrf.mxu3 }
 0x91d   :  { %v6692_v50 = vunpack.c.l.b16 %v6656_v36  ;;  %v6665_v24 = vpack.c.bf16 %v6463_v26, %v6463_v26 }
 0x91e   :  { %8835 = vmatmul.msk.bf16.vlgmr.msrb.gmra.mxu2 %vm2272_vm13, %v6775_v12 }
 0x91f   :  { %v6694_v59 = vpack.c.b16 %v6692_v50, %v6691_v27  ;;  %v6812_v53 = vunpack.c.l.b16 %v6665_v24 }
 0x921   :  { %8824 = vmatmul.msk.bf16.gmra.mxu0 %vm2272_vm13, %v6694_v59 }
 0x924   :  { %v6465_v42 = vpop.f32.mrf.mxu3 }
 0x925   :  { %v6666_v37 = vpack.c.bf16 %v6465_v42, %v6465_v42 }
 0x927   :  { %v6813_v51 = vunpack.c.l.b16 %v6666_v37 }
 0x928   :  { %v6427_v23 = vpop.f32.mrf.mxu2 }
 0x929   :  { %v6816_v30 = vpack.c.b16 %v6813_v51, %v6812_v53  ;;  %v6663_v54 = vpack.c.bf16 %v6427_v23, %v6427_v23 }
 0x92a   :  { %v6386_v62 = vpop.f32.mrf.mxu1 }
 0x92b   :  { %8841 = vmatmul.msk.bf16.vlgmr.msrb.gmra.mxu3 %vm2272_vm13, %v6816_v30  ;;  %v6659_v19 = vpack.c.bf16 %v6386_v62, %v6386_v62  ;;  %v6773_v22 = vunpack.c.l.b16 %v6663_v54 }
 0x92c   :  { %v6468_v13 = vpop.f32.mrf.mxu3 }
 0x92d   :  { %v6667_v60 = vpack.c.bf16 %v6468_v13, %v6468_v13  ;;  %v6732_v39 = vunpack.c.l.b16 %v6659_v19 }
 0x92f   :  { %v6814_v49 = vunpack.c.l.b16 %v6667_v60 }
 0x930   :  { %v6429_v2 = vpop.f32.mrf.mxu2 }
 0x931   :  { %v6664_v14 = vpack.c.bf16 %v6429_v2, %v6429_v2 }
 0x932   :  { %v6388_v61 = vpop.f32.mrf.mxu1  ;;  %v6504_v47 = vpop.f32.mrf.mxu0 }
 0x933   :  { %v6774_v28 = vunpack.c.l.b16 %v6664_v14  ;;  %v6660_v3 = vpack.c.bf16 %v6388_v61, %v6388_v61  ;;  %v6669_v57 = vpack.c.bf16 %v6504_v47, %v6504_v47 }
 0x934   :  { %v6470_v40 = vpop.f32.mrf.mxu3 }
 0x935   :  { %v6776_v38 = vpack.c.b16 %v6774_v28, %v6773_v22  ;;  %v6733_v35 = vunpack.c.l.b16 %v6660_v3  ;;  %v6668_v20 = vpack.c.bf16 %v6470_v40, %v6470_v40  ;;  %v6853_v8 = vunpack.c.l.b16 %v6669_v57 }
 0x937   :  { %v6735_v29 = vpack.c.b16 %v6733_v35, %v6732_v39  ;;  %8836 = vmatmul.msk.bf16.gmra.mxu2 %vm2272_vm13, %v6776_v38  ;;  %v6815_v4 = vunpack.c.l.b16 %v6668_v20 }
 0x939   :  { %8830 = vmatmul.msk.bf16.gmra.mxu1 %vm2272_vm13, %v6735_v29  ;;  %v6817_v41 = vpack.c.b16 %v6815_v4, %v6814_v49 }
 0x93a   :  { %v6506_v44 = vpop.f32.mrf.mxu0 }
 0x93b   :  { %v6670_v1 = vpack.c.bf16 %v6506_v44, %v6506_v44  ;;  %8842 = vmatmul.msk.bf16.gmra.mxu3 %vm2272_vm13, %v6817_v41 }
 0x93d   :  { %v6854_v33 = vunpack.c.l.b16 %v6670_v1 }
 0x93f   :  { %v6857_v55 = vpack.c.b16 %v6854_v33, %v6853_v8 }
 0x941   :  { %v6627_v7 = vpop.f32.mrf.mxu3  ;;  %8847 = vmatmul.msk.bf16.vlgmr.msrb.gmra.mxu0 %vm2272_vm13, %v6857_v55 }
 0x942   :  { %v6681_v46 = vpack.c.bf16 %v6627_v7, %v6627_v7 }
 0x943   :  { %v6586_v10 = vpop.f32.mrf.mxu2 }
 0x944   :  { %v6677_v25 = vpack.c.bf16 %v6586_v10, %v6586_v10  ;;  %v6976_v58 = vunpack.c.l.b16 %v6681_v46 }
 0x945   :  { %v6545_v18 = vpop.f32.mrf.mxu1 }
 0x946   :  { %v6673_v45 = vpack.c.bf16 %v6545_v18, %v6545_v18  ;;  %v6935_v5 = vunpack.c.l.b16 %v6677_v25 }
 0x948   :  { %v6894_v26 = vunpack.c.l.b16 %v6673_v45 }
 0x949   :  { %v6629_v15 = vpop.f32.mrf.mxu3 }
 0x94a   :  { %v6682_v43 = vpack.c.bf16 %v6629_v15, %v6629_v15 }
 0x94b   :  { %v6588_v52 = vpop.f32.mrf.mxu2 }
 0x94c   :  { %v6977_v9 = vunpack.c.l.b16 %v6682_v43  ;;  %v6678_v31 = vpack.c.bf16 %v6588_v52, %v6588_v52 }
 0x94d   :  { %v6547_v21 = vpop.f32.mrf.mxu1 }
 0x94e   :  { %v6980_v56 = vpack.c.b16 %v6977_v9, %v6976_v58  ;;  %v6936_v36 = vunpack.c.l.b16 %v6678_v31  ;;  %v6674_v12 = vpack.c.bf16 %v6547_v21, %v6547_v21 }
 0x950   :  { %8865 = vmatmul.msk.bf16.vlgmr.msra.gmra.mxu3 %vm2272_vm13, %v6980_v56  ;;  %v6939_v27 = vpack.c.b16 %v6936_v36, %v6935_v5  ;;  %v6895_v50 = vunpack.c.l.b16 %v6674_v12 }
 0x952   :  { %v6898_v32 = vpack.c.b16 %v6895_v50, %v6894_v26  ;;  %8859 = vmatmul.msk.bf16.vlgmr.msra.gmra.mxu2 %vm2272_vm13, %v6939_v27 }
 0x953   :  { %v6591_v59 = vpop.f32.mrf.mxu2  ;;  %v6632_v24 = vpop.f32.mrf.mxu3 }
 0x954   :  { %8853 = vmatmul.msk.bf16.vlgmr.msrb.gmra.mxu1 %vm2272_vm13, %v6898_v32  ;;  %v6679_v37 = vpack.c.bf16 %v6591_v59, %v6591_v59  ;;  %v6683_v16 = vpack.c.bf16 %v6632_v24, %v6632_v24 }
 0x955   :  { %v6509_v63 = vpop.f32.mrf.mxu0  ;;  %v6550_v42 = vpop.f32.mrf.mxu1 }
 0x956   :  { %v6671_v53 = vpack.c.bf16 %v6509_v63, %v6509_v63  ;;  %v6675_v51 = vpack.c.bf16 %v6550_v42, %v6550_v42  ;;  %v6937_v13 = vunpack.c.l.b16 %v6679_v37  ;;  %v6978_v54 = vunpack.c.l.b16 %v6683_v16 }
 0x958   :  { %v6855_v28 = vunpack.c.l.b16 %v6671_v53  ;;  %v6896_v3 = vunpack.c.l.b16 %v6675_v51 }
 0x95b   :  { %v6593_v23 = vpop.f32.mrf.mxu2  ;;  %v6634_v6 = vpop.f32.mrf.mxu3 }
 0x95c   :  { %v6680_v30 = vpack.c.bf16 %v6593_v23, %v6593_v23  ;;  %v6684_v62 = vpack.c.bf16 %v6634_v6, %v6634_v6 }
 0x95d   :  { %v6511_v2 = vpop.f32.mrf.mxu0  ;;  %v6552_v19 = vpop.f32.mrf.mxu1 }
 0x95e   :  { %v6938_v14 = vunpack.c.l.b16 %v6680_v30  ;;  %v6979_v61 = vunpack.c.l.b16 %v6684_v62  ;;  %v6672_v47 = vpack.c.bf16 %v6511_v2, %v6511_v2  ;;  %v6676_v22 = vpack.c.bf16 %v6552_v19, %v6552_v19 }
 0x960   :  { %v6940_v60 = vpack.c.b16 %v6938_v14, %v6937_v13  ;;  %v6981_v39 = vpack.c.b16 %v6979_v61, %v6978_v54  ;;  %v6856_v38 = vunpack.c.l.b16 %v6672_v47  ;;  %v6897_v35 = vunpack.c.l.b16 %v6676_v22 }
 0x962   :  { %v6858_v40 = vpack.c.b16 %v6856_v38, %v6855_v28  ;;  %v6899_v20 = vpack.c.b16 %v6897_v35, %v6896_v3  ;;  %8860 = vmatmul.msk.bf16.gmra.mxu2 %vm2272_vm13, %v6940_v60  ;;  %8866 = vmatmul.msk.bf16.gmra.mxu3 %vm2272_vm13, %v6981_v39 }
 0x964   :  { %8848 = vmatmul.msk.bf16.gmra.mxu0 %vm2272_vm13, %v6858_v40  ;;  %8854 = vmatmul.msk.bf16.gmra.mxu1 %vm2272_vm13, %v6899_v20 }
 0x98a   :  { %v6716_v29 = vpop.f32.mrf.mxu0 }
 0x98b   :  { %v6757_v49 = vpop.f32.mrf.mxu1 }
 0x98c   :  { %v7013_v43 = vadd.f32 %v6757_v49, %v6716_v29 }
 0x992   :  { %v6718_v41 = vpop.f32.mrf.mxu0 }
 0x993   :  { %v6759_v44 = vpop.f32.mrf.mxu1 }
 0x994   :  { %v7020_v21 = vadd.f32 %v6759_v44, %v6718_v41 }
 0x99e   :  { %v6721_v8 = vpop.f32.mrf.mxu0 }
 0x9a1   :  { %v6798_v57 = vpop.f32.mrf.mxu2 }
 0x9a2   :  { %v7014_v9 = vadd.f32 %v7013_v43, %v6798_v57 }
 0x9a6   :  { %v6723_v18 = vpop.f32.mrf.mxu0 }
 0x9a9   :  { %v6800_v33 = vpop.f32.mrf.mxu2 }
 0x9aa   :  { %v7021_v12 = vadd.f32 %v7020_v21, %v6800_v33 }
 0x9ae   :  { %v6839_v4 = vpop.f32.mrf.mxu3 }
 0x9af   :  { %v7015_v52 = vadd.f32 %v7014_v9, %v6839_v4  ;;  %v9263_v9 = vld [vmem:[%s12423_s18 + $0x30] sm:$0xff] }
 0x9b6   :  { %v6841_v1 = vpop.f32.mrf.mxu3  ;;  %v6762_v55 = vpop.f32.mrf.mxu1 }
 0x9b7   :  { %v7022_v50 = vadd.f32 %v7021_v12, %v6841_v1  ;;  %v7027_v42 = vadd.f32 %v6762_v55, %v6721_v8 }
 0x9ba   :  { %v6803_v10 = vpop.f32.mrf.mxu2 }
 0x9bb   :  { %v7028_v51 = vadd.f32 %v7027_v42, %v6803_v10 }
 0x9be   :  { %v6844_v7 = vpop.f32.mrf.mxu3  ;;  %v6764_v46 = vpop.f32.mrf.mxu1 }
 0x9bf   :  { %v6880_v25 = vpop.f32.mrf.mxu0  ;;  %v7029_v6 = vadd.f32 %v7028_v51, %v6844_v7  ;;  %v7034_v19 = vadd.f32 %v6764_v46, %v6723_v18 }
 0x9c0   :  { %v7016_v31 = vadd.f32 %v7015_v52, %v6880_v25  ;;  %v9262_v52 = vld [vmem:[%s12423_s18 + $0x28] sm:$0xff] }
 0x9c2   :  { %v6805_v58 = vpop.f32.mrf.mxu2 }
 0x9c3   :  { %v7035_v47 = vadd.f32 %v7034_v19, %v6805_v58  ;;  %v9264_v58 = vld [vmem:[%s12423_s18 + $0x38] sm:$0xff] }
 0x9c4   :  { %7207 = vmatpush.bf16.msra.mxu0 %v9264_v58 }
 0x9c6   :  { %v6846_v15 = vpop.f32.mrf.mxu3 }
 0x9c7   :  { %v6882_v27 = vpop.f32.mrf.mxu0  ;;  %v7036_v28 = vadd.f32 %v7035_v47, %v6846_v15 }
 0x9c8   :  { %v7023_v24 = vadd.f32 %v7022_v50, %v6882_v27  ;;  %7208 = vmatpush.bf16.msra.mxu0 %v9263_v9 }
 0x9cc   :  { %7209 = vmatpush.bf16.msra.mxu0 %v9262_v52 }
 0x9d1   :  { %v6921_v45 = vpop.f32.mrf.mxu1 }
 0x9d2   :  { %v7017_v5 = vadd.f32 %v7016_v31, %v6921_v45  ;;  %v9261_v45 = vld [vmem:[%s12423_s18 + $0x20] sm:$0xff]  ;;  %v9260_v31 = vld [vmem:[%s12423_s18 + $0x18] sm:$0xff] }
 0x9d3   :  { %v7003_v56 = vpop.f32.mrf.mxu3  ;;  %7210 = vmatpush.bf16.msra.mxu0 %v9261_v45 }
 0x9d5   :  { %v6962_v36 = vpop.f32.mrf.mxu2 }
 0x9d6   :  { %v7018_v26 = vadd.f32 %v7017_v5, %v6962_v36  ;;  %v9258_v5 = vld [vmem:[%s12423_s18 + $0x8] sm:$0xff] }
 0x9d7   :  { %7211 = vmatpush.bf16.msra.mxu0 %v9260_v31 }
 0x9d8   :  { %v7019_v32 = vadd.f32 %v7018_v26, %v7003_v56  ;;  %v9259_v56 = vld [vmem:[%s12423_s18 + $0x10] sm:$0xff]  ;;  %v9257_v26 = vld [vmem:[%s12423_s18] sm:$0xff] }
 0x9d9   :  { %v6923_v59 = vpop.f32.mrf.mxu1 }
 0x9da   :  { %v12280_v63 = vadd.f32 %v7019_v32, %v11166_v11  ;;  %v7024_v37 = vadd.f32 %v7023_v24, %v6923_v59 }
 0x9db   :  { %v7005_v16 = vpop.f32.mrf.mxu3  ;;  %7212 = vmatpush.bf16.msra.mxu0 %v9259_v56 }
 0x9dc   :  { %7045 = vadd.xlane.f32.xlu0 %v12280_v63 }
 0x9dd   :  { %v6964_v53 = vpop.f32.mrf.mxu2 }
 0x9de   :  { %v7025_v23 = vadd.f32 %v7024_v37, %v6964_v53 }
 0x9df   :  { %7213 = vmatpush.bf16.msra.mxu0 %v9258_v5 }
 0x9e0   :  { %v7026_v30 = vadd.f32 %v7025_v23, %v7005_v16 }
 0x9e1   :  { %v6885_v62 = vpop.f32.mrf.mxu0  ;;  %v6926_v13 = vpop.f32.mrf.mxu1 }
 0x9e2   :  { %v7030_v54 = vadd.f32 %v7029_v6, %v6885_v62  ;;  %v12284_v2 = vadd.f32 %v7026_v30, %v11172_v34 }
 0x9e3   :  { %7214 = vmatpush.bf16.msra.mxu0 %v9257_v26 }
 0x9e4   :  { %v7031_v14 = vadd.f32 %v7030_v54, %v6926_v13  ;;  %7047 = vadd.xlane.f32.xlu1 %v12284_v2 }
 0x9e5   :  { %v6967_v11 = vpop.f32.mrf.mxu2  ;;  %v7008_v61 = vpop.f32.mrf.mxu3 }
 0x9e6   :  { %v7032_v22 = vadd.f32 %v7031_v14, %v6967_v11 }
 0x9e8   :  { %v7033_v3 = vadd.f32 %v7032_v22, %v7008_v61  ;;  %v9282_v22 = vld [vmem:[%s12421_s16] ss:$0 sm:$0xff]  ;;  %s9613_s16 = smov 64  }
 0x9e9   :  { %v6887_v60 = vpop.f32.mrf.mxu0  ;;  %v6928_v35 = vpop.f32.mrf.mxu1 }
 0x9ea   :  { %v12288_v39 = vadd.f32 %v7033_v3, %v11178_v0  ;;  %v7037_v38 = vadd.f32 %v7036_v28, %v6887_v60 }
 0x9ec   :  { %v7038_v40 = vadd.f32 %v7037_v38, %v6928_v35  ;;  %7049 = vadd.xlane.f32.xlu2 %v12288_v39 }
 0x9ed   :  { %v6969_v34 = vpop.f32.mrf.mxu2  ;;  %v7010_v29 = vpop.f32.mrf.mxu3 }
 0x9ee   :  { %v7039_v20 = vadd.f32 %v7038_v40, %v6969_v34 }
 0x9f0   :  { %v7040_v49 = vadd.f32 %v7039_v20, %v7010_v29 }
 0x9f2   :  { %v12292_v4 = vadd.f32 %v7040_v49, %v11184_v48 }
 0x9f4   :  { %7051 = vadd.xlane.f32.xlu0 %v12292_v4 }
 0xa4f   :  { %v7046_v57 = vpop.xlane.xlu0 %7045 }
 0xa50   :  { %v7053_v41 = vmul.f32 %v7046_v57, %v12447_v17 }
 0xa52   :  { %v12297_v0 = vsub.f32 %v12280_v63, %v7053_v41 }
 0xa54   :  { %v7061_v44 = vmul.f32 %v12297_v0, %v12297_v0 }
 0xa56   :  { %7065 = vadd.xlane.f32.xlu1 %v7061_v44 }
 0xa57   :  { %v7048_v1 = vpop.xlane.xlu1 %7047 }
 0xa58   :  { %v7054_v8 = vmul.f32 %v7048_v1, %v12447_v17 }
 0xa5a   :  { %v12303_v33 = vsub.f32 %v12284_v2, %v7054_v8 }
 0xa5c   :  { %v7062_v48 = vmul.f32 %v12303_v33, %v12303_v33 }
 0xa5e   :  { %7067 = vadd.xlane.f32.xlu2 %v7062_v48 }
 0xa5f   :  { %v7050_v55 = vpop.xlane.xlu2 %7049 }
 0xa60   :  { %v7055_v7 = vmul.f32 %v7050_v55, %v12447_v17 }
 0xa62   :  { %v12309_v10 = vsub.f32 %v12288_v39, %v7055_v7 }
 0xa64   :  { %v7063_v18 = vmul.f32 %v12309_v10, %v12309_v10 }
 0xa66   :  { %7069 = vadd.xlane.f32.xlu0 %v7063_v18 }
 0xa67   :  { %v7052_v46 = vpop.xlane.xlu0 %7051 }
 0xa68   :  { %v7056_v15 = vmul.f32 %v7052_v46, %v12447_v17 }
 0xa6a   :  { %v12315_v43 = vsub.f32 %v12292_v4, %v7056_v15 }
 0xa6c   :  { %v7064_v25 = vmul.f32 %v12315_v43, %v12315_v43 }
 0xa6e   :  { %7071 = vadd.xlane.f32.xlu1 %v7064_v25 }
 0xac9   :  { %v7066_v21 = vpop.xlane.xlu1 %7065 }
 0xaca   :  { %v7073_v36 = vmul.f32 %v7066_v21, %v12447_v17 }
 0xacc   :  { %v7077_v12 = vadd.f32 1e-05, %v7073_v36  ;;  %v9268_v36 = vld [vmem:[%s12424_s19 + $0x18] sm:$0xff] }
 0xacd   :  { %7370 = vmatpush.bf16.msra.mxu1 %v9268_v36 }
 0xace   :  { %9558 = vrsqrt.f32 %v7077_v12  ;;  %vm7087_vm13 = vweird.f32 %v7077_v12 }
 0xad1   :  { %v7068_v27 = vpop.xlane.xlu2 %7067 }
 0xad2   :  { %v7074_v50 = vmul.f32 %v7068_v27, %v12447_v17 }
 0xad4   :  { %v9559_v32 = vpop.eup %9558  ;;  %v7078_v59 = vadd.f32 1e-05, %v7074_v50 }
 0xad5   :  { %v7082_v24 = vmul.f32 %v9559_v32, %v7077_v12  ;;  %vm7088_vm12 = vweird.f32 %v9559_v32 }
 0xad6   :  { %9560 = vrsqrt.f32 %v7078_v59  ;;  %vm7089_vm14 = vmor %vm7087_vm13, %vm7088_vm12  ;;  %vm7097_vm0 = vweird.f32 %v7078_v59 }
 0xad7   :  { %v7083_v42 = vmul.f32 %v9559_v32, %v7082_v24  ;;  %v9267_v24 = vld [vmem:[%s12424_s19 + $0x10] sm:$0xff] }
 0xad8   :  { %7371 = vmatpush.bf16.msra.mxu1 %v9267_v24 }
 0xad9   :  { %v7084_v37 = vmul.f32 0.5, %v7083_v42  ;;  %v7070_v16 = vpop.xlane.xlu0 %7069 }
 0xada   :  { %v7075_v53 = vmul.f32 %v7070_v16, %v12447_v17 }
 0xadb   :  { %v7085_v51 = vsub.f32 1.5, %v7084_v37  ;;  %v9266_v37 = vld [vmem:[%s12424_s19 + $0x8] sm:$0xff] }
 0xadc   :  { %v9561_v23 = vpop.eup %9560  ;;  %v7079_v6 = vadd.f32 1e-05, %v7075_v53  ;;  %7372 = vmatpush.bf16.msra.mxu1 %v9266_v37 }
 0xadd   :  { %v7086_v30 = vmul.f32 %v9559_v32, %v7085_v51  ;;  %v7092_v62 = vmul.f32 %v9561_v23, %v7078_v59  ;;  %vm7098_vm15 = vweird.f32 %v9561_v23 }
 0xade   :  { %9562 = vrsqrt.f32 %v7079_v6  ;;  %vm7099_vm1 = vmor %vm7097_vm0, %vm7098_vm15  ;;  %vm7107_vm3 = vweird.f32 %v7079_v6 }
 0xadf   :  { %v7093_v13 = vmul.f32 %v9561_v23, %v7092_v62  ;;  %v7090_v54 = vsel %vm7089_vm14, %v9559_v32, %v7086_v30 }
 0xae0   :  { %v7121_v28 = vmul.f32 %v7090_v54, %v12297_v0 }
 0xae1   :  { %v7094_v19 = vmul.f32 0.5, %v7093_v13  ;;  %v7072_v14 = vpop.xlane.xlu1 %7071 }
 0xae2   :  { %v7076_v11 = vmul.f32 %v7072_v14, %v12447_v17  ;;  %v9283_v17 = vld [vmem:[%s12422_s17] ss:$0 sm:$0xff]  ;;  %v7129_v34 = vmul.f32 %v9282_v22, %v7121_v28 }
 0xae3   :  { %v7095_v61 = vsub.f32 1.5, %v7094_v19 }
 0xae4   :  { %v9563_v47 = vpop.eup %9562  ;;  %v7080_v3 = vadd.f32 1e-05, %v7076_v11  ;;  %v7137_v0 = vadd.f32 %v9283_v17, %v7129_v34 }
 0xae5   :  { %v7096_v60 = vmul.f32 %v9561_v23, %v7095_v61  ;;  %v7102_v38 = vmul.f32 %v9563_v47, %v7079_v6  ;;  %vm7108_vm2 = vweird.f32 %v9563_v47 }
 0xae6   :  { %9564 = vrsqrt.f32 %v7080_v3  ;;  %vm7109_vm4 = vmor %vm7107_vm3, %vm7108_vm2  ;;  %vm7117_vm6 = vweird.f32 %v7080_v3 }
 0xae7   :  { %v7100_v35 = vsel %vm7099_vm1, %v9561_v23, %v7096_v60  ;;  %v7103_v40 = vmul.f32 %v9563_v47, %v7102_v38  ;;  %v9265_v23 = vld [vmem:[%s12424_s19] sm:$0xff]  ;;  %s9614_s19 = smov [#allocation2]  }
 0xae8   :  { %v7122_v20 = vmul.f32 %v7100_v35, %v12303_v33  ;;  %7373 = vmatpush.bf16.msra.mxu1 %v9265_v23  ;;  %s7397_s15 = sshll.u32 %s9614_s19, 4  ;;  %s7398_s15 = int_to_ptr.vmem [resolvable:$true] %s7397_s15 }
 0xae9   :  { %v7104_v29 = vmul.f32 0.5, %v7103_v40 }
 0xaea   :  { %v7130_v49 = vmul.f32 %v9282_v22, %v7122_v20 }
 0xaeb   :  { %v7105_v57 = vsub.f32 1.5, %v7104_v29 }
 0xaec   :  { %v9565_v41 = vpop.eup %9564  ;;  %v7138_v44 = vadd.f32 %v9283_v17, %v7130_v49 }
 0xaed   :  { %v7106_v1 = vmul.f32 %v9563_v47, %v7105_v57  ;;  %v7112_v8 = vmul.f32 %v9565_v41, %v7080_v3  ;;  %vm7118_vm5 = vweird.f32 %v9565_v41 }
 0xaee   :  { %v7157_v48 = vpack.c.bf16 %v7138_v44, %v7137_v0  ;;  %vm7119_vm7 = vmor %vm7117_vm6, %vm7118_vm5 }
 0xaef   :  { %v7113_v55 = vmul.f32 %v9565_v41, %v7112_v8  ;;  %v7110_v7 = vsel %vm7109_vm4, %v9563_v47, %v7106_v1 }
 0xaf0   :  { %7215 = vmatmul.bf16.vlgmr.msra.gmra.mxu0 %v7157_v48  ;;  %v7123_v33 = vmul.f32 %v7110_v7, %v12309_v10 }
 0xaf1   :  { %v7114_v18 = vmul.f32 0.5, %v7113_v55 }
 0xaf2   :  { %v7131_v9 = vmul.f32 %v9282_v22, %v7123_v33 }
 0xaf3   :  { %v7115_v46 = vsub.f32 1.5, %v7114_v18 }
 0xaf4   :  { %v7139_v45 = vadd.f32 %v9283_v17, %v7131_v9 }
 0xaf5   :  { %v7116_v15 = vmul.f32 %v9565_v41, %v7115_v46 }
 0xaf7   :  { %v7120_v25 = vsel %vm7119_vm7, %v9565_v41, %v7116_v15 }
 0xaf8   :  { %v7124_v58 = vmul.f32 %v7120_v25, %v12315_v43 }
 0xafa   :  { %v7132_v52 = vmul.f32 %v9282_v22, %v7124_v58 }
 0xafc   :  { %v7140_v31 = vadd.f32 %v9283_v17, %v7132_v52 }
 0xafe   :  { %v7158_v56 = vpack.c.bf16 %v7140_v31, %v7139_v45 }
 0xb00   :  { %7220 = vmatmul.bf16.gmra.mxu0 %v7158_v56 }
 0xb6d   :  { %v12357_v21 = vpop.f32.mrf.mxu0 }
 0xb6e   :  { %7310 = vrot.lane.b32.xlu2 %v12357_v21, %s9613_s16  ;;  %v8899_v12 = vmul.f32 -1.442695, %v12357_v21 }
 0xb70   :  { %9566 = vpow2.f32 %v8899_v12 }
 0xb75   :  { %v12360_v5 = vpop.f32.mrf.mxu0 }
 0xb76   :  { %7312 = vrot.lane.b32.xlu0 %v12360_v5, %s9613_s16  ;;  %v8900_v26 = vmul.f32 -1.442695, %v12360_v5  ;;  %v9567_v32 = vpop.eup %9566 }
 0xb77   :  { %v7238_v42 = vadd.f32 1.0, %v9567_v32 }
 0xb78   :  { %9568 = vpow2.f32 %v8900_v26 }
 0xb79   :  { %vm7247_vm10 = vweird.f32 %v7238_v42  ;;  %v7253_v34 = vand.u32 2147483648, %v7238_v42  ;;  %v7251_v29 = vand.u32 2147483647, %v7238_v42 }
 0xb7b   :  { %v7254_v1 = vor.u32 1.1754944e-38, %v7253_v34  ;;  %vm7252_vm15 = vcmp.eq.f32.partialorder %v7251_v29, 8.507059e+37 }
 0xb7d   :  { %v12363_v10 = vpop.f32.mrf.mxu0 }
 0xb7e   :  { %7314 = vrot.lane.b32.xlu1 %v12363_v10, %s9613_s16  ;;  %v8901_v27 = vmul.f32 -1.442695, %v12363_v10  ;;  %v9569_v59 = vpop.eup %9568 }
 0xb7f   :  { %v7239_v16 = vadd.f32 1.0, %v9569_v59 }
 0xb80   :  { %9570 = vpow2.f32 %v8901_v27 }
 0xb81   :  { %v7268_v20 = vand.u32 2147483648, %v7239_v16  ;;  %vm7262_vm13 = vweird.f32 %v7239_v16  ;;  %v7266_v49 = vand.u32 2147483647, %v7239_v16 }
 0xb83   :  { %v7269_v8 = vor.u32 1.1754944e-38, %v7268_v20  ;;  %vm7267_vm0 = vcmp.eq.f32.partialorder %v7266_v49, 8.507059e+37 }
 0xb85   :  { %v12366_v43 = vpop.f32.mrf.mxu0 }
 0xb86   :  { %7316 = vrot.lane.b32.xlu2 %v12366_v43, %s9613_s16  ;;  %v8902_v50 = vmul.f32 -1.442695, %v12366_v43  ;;  %v9571_v53 = vpop.eup %9570 }
 0xb87   :  { %v12385_v6 = vadd.f32 1.0, %v9571_v53 }
 0xb88   :  { %9572 = vpow2.f32 %v8902_v50 }
 0xb89   :  { %9574 = vrcp.f32 %v7238_v42  ;;  %vm7277_vm3 = vweird.f32 %v12385_v6  ;;  %v7281_v15 = vand.u32 2147483647, %v12385_v6  ;;  %v7283_v25 = vand.u32 2147483648, %v12385_v6 }
 0xb8a   :  { %9576 = vrcp.f32 %v7239_v16 }
 0xb8b   :  { %9578 = vrcp.f32 %v12385_v6  ;;  %v7284_v27 = vor.u32 1.1754944e-38, %v7283_v25 }
 0xb8e   :  { %v9573_v51 = vpop.eup %9572 }
 0xb8f   :  { %v7241_v30 = vadd.f32 1.0, %v9573_v51  ;;  %v9575_v62 = vpop.eup %9574 }
 0xb90   :  { %v9577_v13 = vpop.eup %9576  ;;  %v7243_v54 = vmul.f32 %v9575_v62, %v7238_v42  ;;  %vm7248_vm8 = vweird.f32 %v9575_v62 }
 0xb91   :  { %9580 = vrcp.f32 %v7241_v30  ;;  %v7258_v19 = vmul.f32 %v9577_v13, %v7239_v16  ;;  %v9579_v11 = vpop.eup %9578  ;;  %vm7263_vm9 = vweird.f32 %v9577_v13  ;;  %vm7249_vm12 = vmor %vm7247_vm10, %vm7248_vm8  ;;  %v7298_v46 = vand.u32 2147483648, %v7241_v30 }
 0xb92   :  { %v7244_v14 = vsub.f32 1.0, %v7243_v54  ;;  %v7273_v60 = vmul.f32 %v9579_v11, %v12385_v6  ;;  %vm7264_vm14 = vmor %vm7262_vm13, %vm7263_vm9  ;;  %vm7278_vm1 = vweird.f32 %v9579_v11  ;;  %vm7292_vm4 = vweird.f32 %v7241_v30 }
 0xb93   :  { %v7259_v61 = vsub.f32 1.0, %v7258_v19  ;;  %v7296_v58 = vand.u32 2147483647, %v7241_v30  ;;  %vm7279_vm5 = vmor %vm7277_vm3, %vm7278_vm1  ;;  %v7299_v26 = vor.u32 1.1754944e-38, %v7298_v46  ;;  %vm7282_vm8 = vcmp.eq.f32.partialorder %v7281_v15, 8.507059e+37 }
 0xb94   :  { %v7245_v22 = vmul.f32 %v9575_v62, %v7244_v14  ;;  %v7274_v17 = vsub.f32 1.0, %v7273_v60 }
 0xb95   :  { %v7260_v3 = vmul.f32 %v9577_v13, %v7259_v61  ;;  %vm7297_vm7 = vcmp.eq.f32.partialorder %v7296_v58, 8.507059e+37 }
 0xb96   :  { %v7246_v38 = vadd.f32 %v9575_v62, %v7245_v22  ;;  %v7275_v44 = vmul.f32 %v9579_v11, %v7274_v17 }
 0xb97   :  { %v9581_v47 = vpop.eup %9580  ;;  %v7261_v40 = vadd.f32 %v9577_v13, %v7260_v3 }
 0xb98   :  { %v7288_v28 = vmul.f32 %v9581_v47, %v7241_v30  ;;  %v7250_v41 = vsel %vm7249_vm12, %v9575_v62, %v7246_v38  ;;  %vm7293_vm2 = vweird.f32 %v9581_v47  ;;  %v7276_v18 = vadd.f32 %v9579_v11, %v7275_v44 }
 0xb99   :  { %v7265_v0 = vsel %vm7264_vm14, %v9577_v13, %v7261_v40  ;;  %v7255_v48 = vsel %vm7252_vm15, %v7254_v1, %v7250_v41  ;;  %vm7294_vm6 = vmor %vm7292_vm4, %vm7293_vm2 }
 0xb9a   :  { %v7289_v35 = vsub.f32 1.0, %v7288_v28  ;;  %v7270_v55 = vsel %vm7267_vm0, %v7269_v8, %v7265_v0  ;;  %v7302_v9 = vmul.f32 %v7255_v48, %v12357_v21  ;;  %v7280_v12 = vsel %vm7279_vm5, %v9579_v11, %v7276_v18 }
 0xb9b   :  { %v7303_v52 = vmul.f32 %v7270_v55, %v12360_v5  ;;  %v7285_v59 = vsel %vm7282_vm8, %v7284_v27, %v7280_v12 }
 0xb9c   :  { %v7290_v57 = vmul.f32 %v9581_v47, %v7289_v35  ;;  %v7304_v5 = vmul.f32 %v7285_v59, %v12363_v10 }
 0xb9e   :  { %v7291_v7 = vadd.f32 %v9581_v47, %v7290_v57 }
 0xba0   :  { %v7295_v31 = vsel %vm7294_vm6, %v9581_v47, %v7291_v7 }
 0xba1   :  { %v7300_v32 = vsel %vm7297_vm7, %v7299_v26, %v7295_v31 }
 0xba2   :  { %v7305_v21 = vmul.f32 %v7300_v32, %v12366_v43 }
 0xbc8   :  { %v7311_v33 = vpop.permute.xlu2 %7310 }
 0xbc9   :  { %v7322_v56 = vmul.f32 %v7311_v33, %v7302_v9 }
 0xbe0   :  { %v7317_v24 = vpop.permute.xlu2 %7316 }
 0xbe1   :  { %v7325_v37 = vmul.f32 %v7317_v24, %v7305_v21 }
 0xbe8   :  { %v7313_v45 = vpop.permute.xlu0 %7312 }
 0xbe9   :  { %v7323_v36 = vmul.f32 %v7313_v45, %v7303_v52 }
 0xbeb   :  { %v7334_v50 = vpack.c.bf16 %v7323_v36, %v7322_v56 }
 0xbed   :  { %8919 = vmatmul.msk.bf16.vlgmr.msra.gmra.mxu1 %vm4801_vm11, %v7334_v50 }
 0xbf0   :  { %v7315_v42 = vpop.permute.xlu1 %7314 }
 0xbf1   :  { %v7324_v16 = vmul.f32 %v7315_v42, %v7304_v5 }
 0xbf3   :  { %v7335_v53 = vpack.c.bf16 %v7325_v37, %v7324_v16 }
 0xbfd   :  { %8920 = vmatmul.msk.bf16.gmra.mxu1 %vm4801_vm11, %v7335_v53 }
 0xc6a   :  { %v7375_v51 = vpop.f32.mrf.mxu1 }
 0xc6b   :  { %v7385_v23 = vadd.f32 %v7375_v51, %v12280_v63 }
 0xc6d   :  { %7389 = vst [vmem:[#allocation2] sm:$0xff] %v7385_v23 }
 0xc72   :  { %v7377_v6 = vpop.f32.mrf.mxu1 }
 0xc73   :  { %v7386_v30 = vadd.f32 %v7377_v6, %v12284_v2 }
 0xc75   :  { %7390 = vst [vmem:[#allocation2 + $0x8] sm:$0xff] %v7386_v30 }
 0xc7a   :  { %v7380_v62 = vpop.f32.mrf.mxu1 }
 0xc7b   :  { %v7387_v13 = vadd.f32 %v7380_v62, %v12288_v39 }
 0xc7d   :  { %7391 = vst [vmem:[#allocation2 + $0x10] sm:$0xff] %v7387_v13 }
 0xc82   :  { %v7382_v10 = vpop.f32.mrf.mxu1 }
 0xc83   :  { %v7388_v63 = vadd.f32 %v7382_v10, %v12292_v4 }
 0xc85   :  { %7392 = vst [vmem:[#allocation2 + $0x18] sm:$0xff] %v7388_v63 }
 0xc86   :  { %7405 = dma.vmem_to_hbm [thread:$0]  %s7398_s15, 512, %s7400_s7, [#allocation3], %s9615_s2, %s9615_s2, %s9616_s11  }
 0xc87   :  { %9610 = dma.done.wait [#allocation3], 512  }
 0xc88   :  { %9611 = vsyncadd [#allocation3], 4294966784 }
 0xc89   :  { %7410 = vsyncpa [#allocation3], 1 }

</bundles_post_ra>
